<compile_context>
chip_gen: v7x
topology: tpu7x:2x2x1
jax: 0.10.0
libtpu: 0.0.40
codegen_flags: <defaults>
</compile_context>

<pallas_src>
import functools

import jax
import jax.numpy as jnp
from jax import lax
from jax.experimental import pallas as pl
from jax.experimental.pallas import tpu as pltpu

NEG_SLOPE = 0.9   # LeakyReLU(0.9)
SUBLANES = 8      # f32 sublane count -> batch padding target
OUT_LANES = 128   # lane-dense output width


def _lrelu(x):
    return jnp.where(x > 0, x, NEG_SLOPE * x)


# ----------------------------------------------------------------------------
# Fused kernel builder (closure over the static config).
# Sequence activations are time-major 2D: row = t * Bp + b.
# ----------------------------------------------------------------------------
def _build_kernel(Bp, T, Cin, L, num_layers):
    L2 = 2 * L
    T2 = T // 2
    G5 = 4 * L2          # rnn5 gate width
    N = T * Bp           # rows of the time-major conv activation

    def run_lstm(gx_at, whh_ref, H, emit):
        """LSTM recurrence over T2 steps on a (Bp, H) state.

        gx_at(t) -> (Bp, 4H) precomputed input-gate block (bias included),
        gate column order i | f | o | g (host-permuted so the three sigmoids
        are one contiguous 3H-wide EUP call).  emit(t, h) stores the output.
        """
        # TODO(synk): for non-toy T2 switch to lax.fori_loop over a VMEM gx
        # scratch (pl.ds + pl.multiple_of) to bound live ranges / code size.
        whh = whh_ref[...]
        h = jnp.zeros((Bp, H), jnp.float32)
        c = jnp.zeros((Bp, H), jnp.float32)
        for t in range(T2):
            g = gx_at(t) + jnp.dot(h, whh, preferred_element_type=jnp.float32)
            sg = jax.nn.sigmoid(g[:, 0:3 * H])      # i | f | o  (contiguous)
            i_g = sg[:, 0:H]
            f_g = sg[:, H:2 * H]
            o_g = sg[:, 2 * H:3 * H]
            g_g = jnp.tanh(g[:, 3 * H:4 * H])
            c = f_g * c + i_g * g_g
            h = o_g * jnp.tanh(c)
            emit(t, h)

    def kernel(*refs):
        it = iter(refs)
        x_ref = next(it)                      # (T*Bp, Cin) time-major input
        cw_ref, cb_ref = next(it), next(it)   # (Cin, 3*L2), (1, L2)
        rnn2 = [(next(it), next(it), next(it)) for _ in range(num_layers)]
        w3_ref, b3_ref, w4_ref, b4_ref = next(it), next(it), next(it), next(it)
        rnn5 = [(next(it), next(it), next(it)) for _ in range(num_layers)]
        ctw_ref, ctb_ref = next(it), next(it)  # (L2, OUT_LANES), (1, OUT_LANES)
        o_ref = next(it)                       # (T2*Bp, OUT_LANES)
        s_a = next(it)                         # (T2*Bp, L)   rnn2 inter-layer seq
        s_b = next(it)                         # (T2*Bp, L2)  rnn5 sequence
        s_l3 = next(it)                        # (Bp, T2*L)   linear3 input (batch-major)

        # ---- stage 1: Conv1d(k=3, s=1, p=1) + LeakyReLU ---------------------
        # One MXU push: P = x @ [W_k0 | W_k1 | W_k2]; tap slices are combined
        # with sublane rolls (XLU) + boundary masks (== zero padding).
        x = x_ref[...]
        p_all = jnp.dot(x, cw_ref[...],
                        preferred_element_type=jnp.float32)    # (T*Bp, 3*L2)
        p0 = p_all[:, 0:L2]            # tap k=0 -> multiplies x[t-1]
        p1 = p_all[:, L2:2 * L2]       # tap k=1 -> x[t]
        p2 = p_all[:, 2 * L2:]         # tap k=2 -> x[t+1]
        rows = lax.broadcasted_iota(jnp.int32, (N, L2), 0)
        p0s = jnp.where(rows < Bp, 0.0, pltpu.roll(p0, shift=Bp, axis=0))
        p2s = jnp.where(rows >= N - Bp, 0.0,
                        pltpu.roll(p2, shift=N - Bp, axis=0))
        h = _lrelu(p0s + p1 + p2s + cb_ref[...])                # (T*Bp, L2)

        # ---- MaxPool1d(2) over time: one roll + max (no per-step stores) ----
        # Rows [2t*Bp : 2t*Bp+Bp] hold max(h[2t], h[2t+1]); odd blocks are junk
        # and are simply never read (the layer-0 gate precompute below runs on
        # all rows, only the valid stride-2 blocks are sliced in the loop).
        pooled2 = jnp.maximum(h, pltpu.roll(h, shift=N - Bp, axis=0))

        # ---- stage 2: rnn2 (LSTM stack, hidden = L) -------------------------
        # The LAST layer writes its hidden states column-wise into s_l3
        # (batch-major (Bp, T2*L) == PyTorch .reshape(B, -1) layout) so that
        # linear3 is a single matmul; intermediate layers stay time-major.
        for li in range(num_layers):
            wih_ref, whh_ref, b_ref = rnn2[li]
            if li == 0:
                gx = jnp.dot(pooled2, wih_ref[...],
                             preferred_element_type=jnp.float32) + b_ref[...]
                gx_at = lambda t, gx=gx: gx[2 * t * Bp:2 * t * Bp + Bp, :]
            else:
                gx = jnp.dot(s_a[...], wih_ref[...],
                             preferred_element_type=jnp.float32) + b_ref[...]
                gx_at = lambda t, gx=gx: gx[t * Bp:(t + 1) * Bp, :]
            if li == num_layers - 1:
                def emit(t, hh):
                    s_l3[:, t * L:(t + 1) * L] = hh
            else:
                def emit(t, hh):
                    s_a[t * Bp:(t + 1) * Bp, :] = hh
            run_lstm(gx_at, whh_ref, L, emit)

        # ---- stage 3: linear3 + LeakyReLU, linear4 + LeakyReLU --------------
        # Single matmuls: (Bp, T2*L) @ (T2*L, L) and (Bp, L) @ (L, T2*L).
        h3 = _lrelu(jnp.dot(s_l3[...], w3_ref[...],
                            preferred_element_type=jnp.float32) + b3_ref[...])
        y4 = _lrelu(jnp.dot(h3, w4_ref[...],
                            preferred_element_type=jnp.float32) + b4_ref[...])
        # y4 is batch-major (Bp, T2*L); column block t == rnn5 input at step t.

        # ---- stage 4: rnn5 (LSTM stack, hidden = 2L) ------------------------
        for li in range(num_layers):
            wih_ref, whh_ref, b_ref = rnn5[li]
            if li == 0:
                # Block-diagonal input weight: one matmul on the batch-major
                # y4 yields every step's input-gate block, so the recurrence
                # loop keeps exactly one small MXU dot (h @ Whh) per step.
                gx = jnp.dot(y4, wih_ref[...],
                             preferred_element_type=jnp.float32) + b_ref[...]
                gx_at = lambda t, gx=gx: gx[:, t * G5:(t + 1) * G5]
            else:
                gx = jnp.dot(s_b[...], wih_ref[...],
                             preferred_element_type=jnp.float32) + b_ref[...]
                gx_at = lambda t, gx=gx: gx[t * Bp:(t + 1) * Bp, :]

            def emit(t, hh):
                s_b[t * Bp:(t + 1) * Bp, :] = hh
            run_lstm(gx_at, whh_ref, L2, emit)

        # ---- stage 5: ConvTranspose1d(k=2, s=2) + LeakyReLU -----------------
        # stride == kernel: out[2t+k] = in[t] @ W[:,:,k] + b.  Weight/bias are
        # zero-padded to 128 output lanes -> full-lane unmasked final store;
        # the wrapper slices the real 2*Cin columns and interleaves.
        y = jnp.dot(s_b[...], ctw_ref[...],
                    preferred_element_type=jnp.float32) + ctb_ref[...]
        o_ref[...] = _lrelu(y)                                  # (T2*Bp, 128)

    return kernel


# ----------------------------------------------------------------------------
# Wrapper: layout plumbing (batch padding, time-major packing, weight packing)
# + single pallas_call.
# ----------------------------------------------------------------------------
def crae2_forward(x, params, input_size, latent_size, max_len, num_layers):
    B, T, Cin = x.shape
    assert T == max_len and Cin == input_size and T % 2 == 0
    assert 2 * Cin <= OUT_LANES
    L = latent_size
    L2 = 2 * L
    T2 = T // 2
    Bp = ((B + SUBLANES - 1) // SUBLANES) * SUBLANES   # pad batch to sublane tile

    kernel = _build_kernel(Bp, T, Cin, L, num_layers)

    f32 = jnp.float32
    flat = [params["conv1_w"], params["conv1_b"]]
    for lay in params["rnn2"]:
        flat.extend(lay)
    flat.extend([params["w3"], params["b3"], params["w4"], params["b4"]])
    # rnn5 layer 0: block-diagonal input weight (T2*L, T2*4*L2) + tiled bias,
    # so the whole sequence's input-gate precompute is one matmul on the
    # batch-major linear4 output (no time-major relayout inside the kernel).
    wih0, whh0, b0 = params["rnn5"][0]
    flat.extend([jnp.kron(jnp.eye(T2, dtype=f32), wih0), whh0,
                 jnp.tile(b0, (1, T2))])
    for lay in params["rnn5"][1:]:
        flat.extend(lay)
    # conv6: zero-pad packed weight/bias to 128 output lanes (lane-dense store).
    ctw_p = jnp.zeros((L2, OUT_LANES), f32).at[:, :2 * Cin].set(params["conv6_w"])
    ctb_p = jnp.zeros((1, OUT_LANES), f32).at[:, :2 * Cin].set(params["conv6_b"])
    flat.extend([ctw_p, ctb_p])

    # time-major, batch-padded input: row = t * Bp + b (padded rows are zeros
    # and their results are sliced away below).
    x_p = jnp.zeros((Bp, T, Cin), f32).at[:B].set(x)
    x_tm = jnp.transpose(x_p, (1, 0, 2)).reshape(T * Bp, Cin)

    # TODO(synk): on v6e/v7x cast matmul operands to bf16 (keep gate math and
    # the cell state in f32); on v7x add a parallel batch grid once B is big.
    out2d = pl.pallas_call(
        kernel,
        out_shape=jax.ShapeDtypeStruct((T2 * Bp, OUT_LANES), jnp.float32),
        scratch_shapes=[
            pltpu.VMEM((T2 * Bp, L), jnp.float32),    # rnn2 inter-layer sequence
            pltpu.VMEM((T2 * Bp, L2), jnp.float32),   # rnn5 sequence
            pltpu.VMEM((Bp, T2 * L), jnp.float32),    # linear3 input (batch-major)
        ],
    )(x_tm, *flat)

    # rows are (t2, b); real cols are (k, c); output time index = 2*t2 + k.
    out = (out2d[:, :2 * Cin]
           .reshape(T2, Bp, 2, Cin)[:, :B]
           .transpose(1, 0, 2, 3)
           .reshape(B, T, Cin))
    return out


# ----------------------------------------------------------------------------
# Synthetic parameters, already packed in the kernel-ready layouts.
# Mapping from PyTorch tensors (documented for real-checkpoint loading):
#   Conv1d weight (Cout, Cin, 3)            -> conv1_w (Cin, 3*Cout): cols
#                                              [k*Cout:(k+1)*Cout] = W[:,:,k].T
#   LSTM weight_ih (4H, In)/weight_hh (4H,H)-> transposed (In,4H)/(H,4H) with
#                                              gate columns permuted i|f|g|o ->
#                                              i|f|o|g; bias = b_ih + b_hh.
#   Linear weight (out, in)                 -> transposed (in, out).
#   ConvTranspose1d weight (Cin, Cout, 2)   -> conv6_w (Cin, 2*Cout): cols
#                                              [k*Cout:(k+1)*Cout] = W[:,:,k];
#                                              bias tiled twice.
# ----------------------------------------------------------------------------
def make_params(key, input_size, latent_size, max_len, num_layers):
    L = latent_size
    L2 = 2 * L
    T2 = max_len // 2
    ks = iter(jax.random.split(key, 64))

    def rnd(shape):
        return 0.1 * jax.random.normal(next(ks), shape, jnp.float32)

    p = {}
    p["conv1_w"] = rnd((input_size, 3 * L2))
    p["conv1_b"] = rnd((1, L2))
    p["rnn2"] = []
    for l in range(num_layers):
        in_dim = L2 if l == 0 else L
        p["rnn2"].append((rnd((in_dim, 4 * L)), rnd((L, 4 * L)), rnd((1, 4 * L))))
    p["w3"] = rnd((L * T2, L))
    p["b3"] = rnd((1, L))
    p["w4"] = rnd((L, L * T2))
    p["b4"] = rnd((1, L * T2))
    p["rnn5"] = []
    for l in range(num_layers):
        in_dim = L if l == 0 else L2
        p["rnn5"].append((rnd((in_dim, 4 * L2)), rnd((L2, 4 * L2)), rnd((1, 4 * L2))))
    p["conv6_w"] = rnd((L2, 2 * input_size))
    b6 = rnd((1, input_size))
    p["conv6_b"] = jnp.concatenate([b6, b6], axis=-1)
    return p


if __name__ == "__main__":
    input_size, latent_size, max_len, num_layers = 4, 8, 16, 2
    batch = 2

    key = jax.random.PRNGKey(0)
    kx, kp = jax.random.split(key)
    x = jax.random.normal(kx, (batch, max_len, input_size), jnp.float32)
    params = make_params(kp, input_size, latent_size, max_len, num_layers)

    fwd = jax.jit(functools.partial(
        crae2_forward, input_size=input_size, latent_size=latent_size,
        max_len=max_len, num_layers=num_layers))
    out = jax.block_until_ready(fwd(x, params))

    assert out.shape == (batch, max_len, input_size), out.shape
    assert bool(jnp.all(jnp.isfinite(out)))
    print("KERNEL_OK")
</pallas_src>

<mosaic_0001>
module attributes {stable_mosaic.version = 11 : i64} {
  func.func @kernel(%arg0: memref<128x4xf32, #tpu.memory_space<vmem>>, %arg1: memref<4x48xf32, #tpu.memory_space<vmem>>, %arg2: memref<1x16xf32, #tpu.memory_space<vmem>>, %arg3: memref<16x32xf32, #tpu.memory_space<vmem>>, %arg4: memref<8x32xf32, #tpu.memory_space<vmem>>, %arg5: memref<1x32xf32, #tpu.memory_space<vmem>>, %arg6: memref<8x32xf32, #tpu.memory_space<vmem>>, %arg7: memref<8x32xf32, #tpu.memory_space<vmem>>, %arg8: memref<1x32xf32, #tpu.memory_space<vmem>>, %arg9: memref<64x8xf32, #tpu.memory_space<vmem>>, %arg10: memref<1x8xf32, #tpu.memory_space<vmem>>, %arg11: memref<8x64xf32, #tpu.memory_space<vmem>>, %arg12: memref<1x64xf32, #tpu.memory_space<vmem>>, %arg13: memref<64x512xf32, #tpu.memory_space<vmem>>, %arg14: memref<16x64xf32, #tpu.memory_space<vmem>>, %arg15: memref<1x512xf32, #tpu.memory_space<vmem>>, %arg16: memref<16x64xf32, #tpu.memory_space<vmem>>, %arg17: memref<16x64xf32, #tpu.memory_space<vmem>>, %arg18: memref<1x64xf32, #tpu.memory_space<vmem>>, %arg19: memref<16x128xf32, #tpu.memory_space<vmem>>, %arg20: memref<1x128xf32, #tpu.memory_space<vmem>>, %arg21: memref<64x128xf32, #tpu.memory_space<vmem>>, %arg22: memref<64x8xf32, #tpu.memory_space<vmem>>, %arg23: memref<64x16xf32, #tpu.memory_space<vmem>>, %arg24: memref<8x64xf32, #tpu.memory_space<vmem>>) attributes {dimension_semantics = [], scalar_prefetch = 0 : i64, scratch_operands = 3 : i64, tpu.core_type = #tpu.core_type<tc>} {
    %c0 = arith.constant 0 : index
    %c0_0 = arith.constant 0 : index
    %0 = vector.load %arg0[%c0, %c0_0] : memref<128x4xf32, #tpu.memory_space<vmem>>, vector<128x4xf32>
    %c0_1 = arith.constant 0 : index
    %c0_2 = arith.constant 0 : index
    %1 = vector.load %arg1[%c0_1, %c0_2] : memref<4x48xf32, #tpu.memory_space<vmem>>, vector<4x48xf32>
    %cst = arith.constant dense<0.000000e+00> : vector<128x48xf32>
    %2 = tpu.matmul %0, %1, %cst {dimension_numbers = #tpu.dot_dimension_numbers<[1], [0], [0], [1], [0, 0, 1, 1], [], []>} : vector<128x4xf32>, vector<4x48xf32>, vector<128x48xf32> -> vector<128x48xf32>
    %3 = vector.extract_strided_slice %2 {offsets = [0, 0], sizes = [128, 16], strides = [1, 1]} : vector<128x48xf32> to vector<128x16xf32>
    %4 = vector.extract_strided_slice %2 {offsets = [0, 16], sizes = [128, 16], strides = [1, 1]} : vector<128x48xf32> to vector<128x16xf32>
    %5 = vector.extract_strided_slice %2 {offsets = [0, 32], sizes = [128, 16], strides = [1, 1]} : vector<128x48xf32> to vector<128x16xf32>
    %6 = tpu.iota {dimensions = array<i32: 0>} : vector<128x16xi32>
    %c8_i32 = arith.constant 8 : i32
    %7 = vector.broadcast %c8_i32 : i32 to vector<128x16xi32>
    %8 = arith.cmpi slt, %6, %7 : vector<128x16xi32>
    %c8_i32_3 = arith.constant 8 : i32
    %9 = tpu.dynamic_rotate %3 by %c8_i32_3 dim 0 : vector<128x16xf32>, i32 -> vector<128x16xf32>
    %cst_4 = arith.constant 0.000000e+00 : f32
    %10 = vector.broadcast %cst_4 : f32 to vector<128x16xf32>
    %11 = arith.select %8, %10, %9 : vector<128x16xi1>, vector<128x16xf32>
    %c120_i32 = arith.constant 120 : i32
    %12 = vector.broadcast %c120_i32 : i32 to vector<128x16xi32>
    %13 = arith.cmpi sge, %6, %12 : vector<128x16xi32>
    %c120_i32_5 = arith.constant 120 : i32
    %14 = tpu.dynamic_rotate %5 by %c120_i32_5 dim 0 : vector<128x16xf32>, i32 -> vector<128x16xf32>
    %cst_6 = arith.constant 0.000000e+00 : f32
    %15 = vector.broadcast %cst_6 : f32 to vector<128x16xf32>
    %16 = arith.select %13, %15, %14 : vector<128x16xi1>, vector<128x16xf32>
    %17 = arith.addf %11, %4 : vector<128x16xf32>
    %18 = arith.addf %17, %16 : vector<128x16xf32>
    %c0_7 = arith.constant 0 : index
    %c0_8 = arith.constant 0 : index
    %19 = vector.load %arg2[%c0_7, %c0_8] : memref<1x16xf32, #tpu.memory_space<vmem>>, vector<1x16xf32>
    %20 = vector.broadcast %19 : vector<1x16xf32> to vector<128x16xf32>
    %21 = arith.addf %18, %20 : vector<128x16xf32>
    %cst_9 = arith.constant 0.000000e+00 : f32
    %22 = vector.broadcast %cst_9 : f32 to vector<128x16xf32>
    %23 = arith.cmpf ogt, %21, %22 : vector<128x16xf32>
    %cst_10 = arith.constant 0.899999976 : f32
    %24 = vector.broadcast %cst_10 : f32 to vector<128x16xf32>
    %25 = arith.mulf %24, %21 : vector<128x16xf32>
    %26 = arith.select %23, %21, %25 : vector<128x16xi1>, vector<128x16xf32>
    %c120_i32_11 = arith.constant 120 : i32
    %27 = tpu.dynamic_rotate %26 by %c120_i32_11 dim 0 : vector<128x16xf32>, i32 -> vector<128x16xf32>
    %28 = arith.maximumf %26, %27 : vector<128x16xf32>
    %c0_12 = arith.constant 0 : index
    %c0_13 = arith.constant 0 : index
    %29 = vector.load %arg3[%c0_12, %c0_13] : memref<16x32xf32, #tpu.memory_space<vmem>>, vector<16x32xf32>
    %cst_14 = arith.constant dense<0.000000e+00> : vector<128x32xf32>
    %30 = tpu.matmul %28, %29, %cst_14 {dimension_numbers = #tpu.dot_dimension_numbers<[1], [0], [0], [1], [0, 0, 1, 1], [], []>} : vector<128x16xf32>, vector<16x32xf32>, vector<128x32xf32> -> vector<128x32xf32>
    %c0_15 = arith.constant 0 : index
    %c0_16 = arith.constant 0 : index
    %31 = vector.load %arg5[%c0_15, %c0_16] : memref<1x32xf32, #tpu.memory_space<vmem>>, vector<1x32xf32>
    %32 = vector.broadcast %31 : vector<1x32xf32> to vector<128x32xf32>
    %33 = arith.addf %30, %32 : vector<128x32xf32>
    %c0_17 = arith.constant 0 : index
    %c0_18 = arith.constant 0 : index
    %34 = vector.load %arg4[%c0_17, %c0_18] : memref<8x32xf32, #tpu.memory_space<vmem>>, vector<8x32xf32>
    %cst_19 = arith.constant 0.000000e+00 : f32
    %35 = vector.broadcast %cst_19 : f32 to vector<8x8xf32>
    %cst_20 = arith.constant 0.000000e+00 : f32
    %36 = vector.broadcast %cst_20 : f32 to vector<8x8xf32>
    %37 = vector.extract_strided_slice %33 {offsets = [0, 0], sizes = [8, 32], strides = [1, 1]} : vector<128x32xf32> to vector<8x32xf32>
    %cst_21 = arith.constant dense<0.000000e+00> : vector<8x32xf32>
    %38 = tpu.matmul %35, %34, %cst_21 {dimension_numbers = #tpu.dot_dimension_numbers<[1], [0], [0], [1], [0, 0, 1, 1], [], []>} : vector<8x8xf32>, vector<8x32xf32>, vector<8x32xf32> -> vector<8x32xf32>
    %39 = arith.addf %37, %38 : vector<8x32xf32>
    %40 = vector.extract_strided_slice %39 {offsets = [0, 0], sizes = [8, 24], strides = [1, 1]} : vector<8x32xf32> to vector<8x24xf32>
    %41 = arith.negf %40 : vector<8x24xf32>
    %42 = math.exp %41 : vector<8x24xf32>
    %cst_22 = arith.constant 1.000000e+00 : f32
    %43 = vector.broadcast %cst_22 : f32 to vector<8x24xf32>
    %44 = arith.addf %43, %42 : vector<8x24xf32>
    %45 = arith.divf %43, %44 : vector<8x24xf32>
    %46 = vector.extract_strided_slice %45 {offsets = [0, 0], sizes = [8, 8], strides = [1, 1]} : vector<8x24xf32> to vector<8x8xf32>
    %47 = vector.extract_strided_slice %45 {offsets = [0, 8], sizes = [8, 8], strides = [1, 1]} : vector<8x24xf32> to vector<8x8xf32>
    %48 = vector.extract_strided_slice %45 {offsets = [0, 16], sizes = [8, 8], strides = [1, 1]} : vector<8x24xf32> to vector<8x8xf32>
    %49 = vector.extract_strided_slice %39 {offsets = [0, 24], sizes = [8, 8], strides = [1, 1]} : vector<8x32xf32> to vector<8x8xf32>
    %50 = math.tanh %49 : vector<8x8xf32>
    %51 = arith.mulf %47, %36 : vector<8x8xf32>
    %52 = arith.mulf %46, %50 : vector<8x8xf32>
    %53 = arith.addf %51, %52 : vector<8x8xf32>
    %54 = math.tanh %53 : vector<8x8xf32>
    %55 = arith.mulf %48, %54 : vector<8x8xf32>
    %c0_23 = arith.constant 0 : index
    %c0_24 = arith.constant 0 : index
    %56 = vector.load %arg22[%c0_23, %c0_24] : memref<64x8xf32, #tpu.memory_space<vmem>>, vector<8x8xf32>
    tpu.vector_store %arg22[%c0_23, %c0_24], %55 {strides = array<i32>} : memref<64x8xf32, #tpu.memory_space<vmem>>, vector<8x8xf32>,
    %57 = vector.extract_strided_slice %33 {offsets = [16, 0], sizes = [8, 32], strides = [1, 1]} : vector<128x32xf32> to vector<8x32xf32>
    %cst_25 = arith.constant dense<0.000000e+00> : vector<8x32xf32>
    %58 = tpu.matmul %55, %34, %cst_25 {dimension_numbers = #tpu.dot_dimension_numbers<[1], [0], [0], [1], [0, 0, 1, 1], [], []>} : vector<8x8xf32>, vector<8x32xf32>, vector<8x32xf32> -> vector<8x32xf32>
    %59 = arith.addf %57, %58 : vector<8x32xf32>
    %60 = vector.extract_strided_slice %59 {offsets = [0, 0], sizes = [8, 24], strides = [1, 1]} : vector<8x32xf32> to vector<8x24xf32>
    %61 = arith.negf %60 : vector<8x24xf32>
    %62 = math.exp %61 : vector<8x24xf32>
    %cst_26 = arith.constant 1.000000e+00 : f32
    %63 = vector.broadcast %cst_26 : f32 to vector<8x24xf32>
    %64 = arith.addf %63, %62 : vector<8x24xf32>
    %65 = arith.divf %63, %64 : vector<8x24xf32>
    %66 = vector.extract_strided_slice %65 {offsets = [0, 0], sizes = [8, 8], strides = [1, 1]} : vector<8x24xf32> to vector<8x8xf32>
    %67 = vector.extract_strided_slice %65 {offsets = [0, 8], sizes = [8, 8], strides = [1, 1]} : vector<8x24xf32> to vector<8x8xf32>
    %68 = vector.extract_strided_slice %65 {offsets = [0, 16], sizes = [8, 8], strides = [1, 1]} : vector<8x24xf32> to vector<8x8xf32>
    %69 = vector.extract_strided_slice %59 {offsets = [0, 24], sizes = [8, 8], strides = [1, 1]} : vector<8x32xf32> to vector<8x8xf32>
    %70 = math.tanh %69 : vector<8x8xf32>
    %71 = arith.mulf %67, %53 : vector<8x8xf32>
    %72 = arith.mulf %66, %70 : vector<8x8xf32>
    %73 = arith.addf %71, %72 : vector<8x8xf32>
    %74 = math.tanh %73 : vector<8x8xf32>
    %75 = arith.mulf %68, %74 : vector<8x8xf32>
    %c8 = arith.constant 8 : index
    %c0_27 = arith.constant 0 : index
    %76 = vector.load %arg22[%c8, %c0_27] : memref<64x8xf32, #tpu.memory_space<vmem>>, vector<8x8xf32>
    tpu.vector_store %arg22[%c8, %c0_27], %75 {strides = array<i32>} : memref<64x8xf32, #tpu.memory_space<vmem>>, vector<8x8xf32>,
    %77 = vector.extract_strided_slice %33 {offsets = [32, 0], sizes = [8, 32], strides = [1, 1]} : vector<128x32xf32> to vector<8x32xf32>
    %cst_28 = arith.constant dense<0.000000e+00> : vector<8x32xf32>
    %78 = tpu.matmul %75, %34, %cst_28 {dimension_numbers = #tpu.dot_dimension_numbers<[1], [0], [0], [1], [0, 0, 1, 1], [], []>} : vector<8x8xf32>, vector<8x32xf32>, vector<8x32xf32> -> vector<8x32xf32>
    %79 = arith.addf %77, %78 : vector<8x32xf32>
    %80 = vector.extract_strided_slice %79 {offsets = [0, 0], sizes = [8, 24], strides = [1, 1]} : vector<8x32xf32> to vector<8x24xf32>
    %81 = arith.negf %80 : vector<8x24xf32>
    %82 = math.exp %81 : vector<8x24xf32>
    %cst_29 = arith.constant 1.000000e+00 : f32
    %83 = vector.broadcast %cst_29 : f32 to vector<8x24xf32>
    %84 = arith.addf %83, %82 : vector<8x24xf32>
    %85 = arith.divf %83, %84 : vector<8x24xf32>
    %86 = vector.extract_strided_slice %85 {offsets = [0, 0], sizes = [8, 8], strides = [1, 1]} : vector<8x24xf32> to vector<8x8xf32>
    %87 = vector.extract_strided_slice %85 {offsets = [0, 8], sizes = [8, 8], strides = [1, 1]} : vector<8x24xf32> to vector<8x8xf32>
    %88 = vector.extract_strided_slice %85 {offsets = [0, 16], sizes = [8, 8], strides = [1, 1]} : vector<8x24xf32> to vector<8x8xf32>
    %89 = vector.extract_strided_slice %79 {offsets = [0, 24], sizes = [8, 8], strides = [1, 1]} : vector<8x32xf32> to vector<8x8xf32>
    %90 = math.tanh %89 : vector<8x8xf32>
    %91 = arith.mulf %87, %73 : vector<8x8xf32>
    %92 = arith.mulf %86, %90 : vector<8x8xf32>
    %93 = arith.addf %91, %92 : vector<8x8xf32>
    %94 = math.tanh %93 : vector<8x8xf32>
    %95 = arith.mulf %88, %94 : vector<8x8xf32>
    %c16 = arith.constant 16 : index
    %c0_30 = arith.constant 0 : index
    %96 = vector.load %arg22[%c16, %c0_30] : memref<64x8xf32, #tpu.memory_space<vmem>>, vector<8x8xf32>
    tpu.vector_store %arg22[%c16, %c0_30], %95 {strides = array<i32>} : memref<64x8xf32, #tpu.memory_space<vmem>>, vector<8x8xf32>,
    %97 = vector.extract_strided_slice %33 {offsets = [48, 0], sizes = [8, 32], strides = [1, 1]} : vector<128x32xf32> to vector<8x32xf32>
    %cst_31 = arith.constant dense<0.000000e+00> : vector<8x32xf32>
    %98 = tpu.matmul %95, %34, %cst_31 {dimension_numbers = #tpu.dot_dimension_numbers<[1], [0], [0], [1], [0, 0, 1, 1], [], []>} : vector<8x8xf32>, vector<8x32xf32>, vector<8x32xf32> -> vector<8x32xf32>
    %99 = arith.addf %97, %98 : vector<8x32xf32>
    %100 = vector.extract_strided_slice %99 {offsets = [0, 0], sizes = [8, 24], strides = [1, 1]} : vector<8x32xf32> to vector<8x24xf32>
    %101 = arith.negf %100 : vector<8x24xf32>
    %102 = math.exp %101 : vector<8x24xf32>
    %cst_32 = arith.constant 1.000000e+00 : f32
    %103 = vector.broadcast %cst_32 : f32 to vector<8x24xf32>
    %104 = arith.addf %103, %102 : vector<8x24xf32>
    %105 = arith.divf %103, %104 : vector<8x24xf32>
    %106 = vector.extract_strided_slice %105 {offsets = [0, 0], sizes = [8, 8], strides = [1, 1]} : vector<8x24xf32> to vector<8x8xf32>
    %107 = vector.extract_strided_slice %105 {offsets = [0, 8], sizes = [8, 8], strides = [1, 1]} : vector<8x24xf32> to vector<8x8xf32>
    %108 = vector.extract_strided_slice %105 {offsets = [0, 16], sizes = [8, 8], strides = [1, 1]} : vector<8x24xf32> to vector<8x8xf32>
    %109 = vector.extract_strided_slice %99 {offsets = [0, 24], sizes = [8, 8], strides = [1, 1]} : vector<8x32xf32> to vector<8x8xf32>
    %110 = math.tanh %109 : vector<8x8xf32>
    %111 = arith.mulf %107, %93 : vector<8x8xf32>
    %112 = arith.mulf %106, %110 : vector<8x8xf32>
    %113 = arith.addf %111, %112 : vector<8x8xf32>
    %114 = math.tanh %113 : vector<8x8xf32>
    %115 = arith.mulf %108, %114 : vector<8x8xf32>
    %c24 = arith.constant 24 : index
    %c0_33 = arith.constant 0 : index
    %116 = vector.load %arg22[%c24, %c0_33] : memref<64x8xf32, #tpu.memory_space<vmem>>, vector<8x8xf32>
    tpu.vector_store %arg22[%c24, %c0_33], %115 {strides = array<i32>} : memref<64x8xf32, #tpu.memory_space<vmem>>, vector<8x8xf32>,
    %117 = vector.extract_strided_slice %33 {offsets = [64, 0], sizes = [8, 32], strides = [1, 1]} : vector<128x32xf32> to vector<8x32xf32>
    %cst_34 = arith.constant dense<0.000000e+00> : vector<8x32xf32>
    %118 = tpu.matmul %115, %34, %cst_34 {dimension_numbers = #tpu.dot_dimension_numbers<[1], [0], [0], [1], [0, 0, 1, 1], [], []>} : vector<8x8xf32>, vector<8x32xf32>, vector<8x32xf32> -> vector<8x32xf32>
    %119 = arith.addf %117, %118 : vector<8x32xf32>
    %120 = vector.extract_strided_slice %119 {offsets = [0, 0], sizes = [8, 24], strides = [1, 1]} : vector<8x32xf32> to vector<8x24xf32>
    %121 = arith.negf %120 : vector<8x24xf32>
    %122 = math.exp %121 : vector<8x24xf32>
    %cst_35 = arith.constant 1.000000e+00 : f32
    %123 = vector.broadcast %cst_35 : f32 to vector<8x24xf32>
    %124 = arith.addf %123, %122 : vector<8x24xf32>
    %125 = arith.divf %123, %124 : vector<8x24xf32>
    %126 = vector.extract_strided_slice %125 {offsets = [0, 0], sizes = [8, 8], strides = [1, 1]} : vector<8x24xf32> to vector<8x8xf32>
    %127 = vector.extract_strided_slice %125 {offsets = [0, 8], sizes = [8, 8], strides = [1, 1]} : vector<8x24xf32> to vector<8x8xf32>
    %128 = vector.extract_strided_slice %125 {offsets = [0, 16], sizes = [8, 8], strides = [1, 1]} : vector<8x24xf32> to vector<8x8xf32>
    %129 = vector.extract_strided_slice %119 {offsets = [0, 24], sizes = [8, 8], strides = [1, 1]} : vector<8x32xf32> to vector<8x8xf32>
    %130 = math.tanh %129 : vector<8x8xf32>
    %131 = arith.mulf %127, %113 : vector<8x8xf32>
    %132 = arith.mulf %126, %130 : vector<8x8xf32>
    %133 = arith.addf %131, %132 : vector<8x8xf32>
    %134 = math.tanh %133 : vector<8x8xf32>
    %135 = arith.mulf %128, %134 : vector<8x8xf32>
    %c32 = arith.constant 32 : index
    %c0_36 = arith.constant 0 : index
    %136 = vector.load %arg22[%c32, %c0_36] : memref<64x8xf32, #tpu.memory_space<vmem>>, vector<8x8xf32>
    tpu.vector_store %arg22[%c32, %c0_36], %135 {strides = array<i32>} : memref<64x8xf32, #tpu.memory_space<vmem>>, vector<8x8xf32>,
    %137 = vector.extract_strided_slice %33 {offsets = [80, 0], sizes = [8, 32], strides = [1, 1]} : vector<128x32xf32> to vector<8x32xf32>
    %cst_37 = arith.constant dense<0.000000e+00> : vector<8x32xf32>
    %138 = tpu.matmul %135, %34, %cst_37 {dimension_numbers = #tpu.dot_dimension_numbers<[1], [0], [0], [1], [0, 0, 1, 1], [], []>} : vector<8x8xf32>, vector<8x32xf32>, vector<8x32xf32> -> vector<8x32xf32>
    %139 = arith.addf %137, %138 : vector<8x32xf32>
    %140 = vector.extract_strided_slice %139 {offsets = [0, 0], sizes = [8, 24], strides = [1, 1]} : vector<8x32xf32> to vector<8x24xf32>
    %141 = arith.negf %140 : vector<8x24xf32>
    %142 = math.exp %141 : vector<8x24xf32>
    %cst_38 = arith.constant 1.000000e+00 : f32
    %143 = vector.broadcast %cst_38 : f32 to vector<8x24xf32>
    %144 = arith.addf %143, %142 : vector<8x24xf32>
    %145 = arith.divf %143, %144 : vector<8x24xf32>
    %146 = vector.extract_strided_slice %145 {offsets = [0, 0], sizes = [8, 8], strides = [1, 1]} : vector<8x24xf32> to vector<8x8xf32>
    %147 = vector.extract_strided_slice %145 {offsets = [0, 8], sizes = [8, 8], strides = [1, 1]} : vector<8x24xf32> to vector<8x8xf32>
    %148 = vector.extract_strided_slice %145 {offsets = [0, 16], sizes = [8, 8], strides = [1, 1]} : vector<8x24xf32> to vector<8x8xf32>
    %149 = vector.extract_strided_slice %139 {offsets = [0, 24], sizes = [8, 8], strides = [1, 1]} : vector<8x32xf32> to vector<8x8xf32>
    %150 = math.tanh %149 : vector<8x8xf32>
    %151 = arith.mulf %147, %133 : vector<8x8xf32>
    %152 = arith.mulf %146, %150 : vector<8x8xf32>
    %153 = arith.addf %151, %152 : vector<8x8xf32>
    %154 = math.tanh %153 : vector<8x8xf32>
    %155 = arith.mulf %148, %154 : vector<8x8xf32>
    %c40 = arith.constant 40 : index
    %c0_39 = arith.constant 0 : index
    %156 = vector.load %arg22[%c40, %c0_39] : memref<64x8xf32, #tpu.memory_space<vmem>>, vector<8x8xf32>
    tpu.vector_store %arg22[%c40, %c0_39], %155 {strides = array<i32>} : memref<64x8xf32, #tpu.memory_space<vmem>>, vector<8x8xf32>,
    %157 = vector.extract_strided_slice %33 {offsets = [96, 0], sizes = [8, 32], strides = [1, 1]} : vector<128x32xf32> to vector<8x32xf32>
    %cst_40 = arith.constant dense<0.000000e+00> : vector<8x32xf32>
    %158 = tpu.matmul %155, %34, %cst_40 {dimension_numbers = #tpu.dot_dimension_numbers<[1], [0], [0], [1], [0, 0, 1, 1], [], []>} : vector<8x8xf32>, vector<8x32xf32>, vector<8x32xf32> -> vector<8x32xf32>
    %159 = arith.addf %157, %158 : vector<8x32xf32>
    %160 = vector.extract_strided_slice %159 {offsets = [0, 0], sizes = [8, 24], strides = [1, 1]} : vector<8x32xf32> to vector<8x24xf32>
    %161 = arith.negf %160 : vector<8x24xf32>
    %162 = math.exp %161 : vector<8x24xf32>
    %cst_41 = arith.constant 1.000000e+00 : f32
    %163 = vector.broadcast %cst_41 : f32 to vector<8x24xf32>
    %164 = arith.addf %163, %162 : vector<8x24xf32>
    %165 = arith.divf %163, %164 : vector<8x24xf32>
    %166 = vector.extract_strided_slice %165 {offsets = [0, 0], sizes = [8, 8], strides = [1, 1]} : vector<8x24xf32> to vector<8x8xf32>
    %167 = vector.extract_strided_slice %165 {offsets = [0, 8], sizes = [8, 8], strides = [1, 1]} : vector<8x24xf32> to vector<8x8xf32>
    %168 = vector.extract_strided_slice %165 {offsets = [0, 16], sizes = [8, 8], strides = [1, 1]} : vector<8x24xf32> to vector<8x8xf32>
    %169 = vector.extract_strided_slice %159 {offsets = [0, 24], sizes = [8, 8], strides = [1, 1]} : vector<8x32xf32> to vector<8x8xf32>
    %170 = math.tanh %169 : vector<8x8xf32>
    %171 = arith.mulf %167, %153 : vector<8x8xf32>
    %172 = arith.mulf %166, %170 : vector<8x8xf32>
    %173 = arith.addf %171, %172 : vector<8x8xf32>
    %174 = math.tanh %173 : vector<8x8xf32>
    %175 = arith.mulf %168, %174 : vector<8x8xf32>
    %c48 = arith.constant 48 : index
    %c0_42 = arith.constant 0 : index
    %176 = vector.load %arg22[%c48, %c0_42] : memref<64x8xf32, #tpu.memory_space<vmem>>, vector<8x8xf32>
    tpu.vector_store %arg22[%c48, %c0_42], %175 {strides = array<i32>} : memref<64x8xf32, #tpu.memory_space<vmem>>, vector<8x8xf32>,
    %177 = vector.extract_strided_slice %33 {offsets = [112, 0], sizes = [8, 32], strides = [1, 1]} : vector<128x32xf32> to vector<8x32xf32>
    %cst_43 = arith.constant dense<0.000000e+00> : vector<8x32xf32>
    %178 = tpu.matmul %175, %34, %cst_43 {dimension_numbers = #tpu.dot_dimension_numbers<[1], [0], [0], [1], [0, 0, 1, 1], [], []>} : vector<8x8xf32>, vector<8x32xf32>, vector<8x32xf32> -> vector<8x32xf32>
    %179 = arith.addf %177, %178 : vector<8x32xf32>
    %180 = vector.extract_strided_slice %179 {offsets = [0, 0], sizes = [8, 24], strides = [1, 1]} : vector<8x32xf32> to vector<8x24xf32>
    %181 = arith.negf %180 : vector<8x24xf32>
    %182 = math.exp %181 : vector<8x24xf32>
    %cst_44 = arith.constant 1.000000e+00 : f32
    %183 = vector.broadcast %cst_44 : f32 to vector<8x24xf32>
    %184 = arith.addf %183, %182 : vector<8x24xf32>
    %185 = arith.divf %183, %184 : vector<8x24xf32>
    %186 = vector.extract_strided_slice %185 {offsets = [0, 0], sizes = [8, 8], strides = [1, 1]} : vector<8x24xf32> to vector<8x8xf32>
    %187 = vector.extract_strided_slice %185 {offsets = [0, 8], sizes = [8, 8], strides = [1, 1]} : vector<8x24xf32> to vector<8x8xf32>
    %188 = vector.extract_strided_slice %185 {offsets = [0, 16], sizes = [8, 8], strides = [1, 1]} : vector<8x24xf32> to vector<8x8xf32>
    %189 = vector.extract_strided_slice %179 {offsets = [0, 24], sizes = [8, 8], strides = [1, 1]} : vector<8x32xf32> to vector<8x8xf32>
    %190 = math.tanh %189 : vector<8x8xf32>
    %191 = arith.mulf %187, %173 : vector<8x8xf32>
    %192 = arith.mulf %186, %190 : vector<8x8xf32>
    %193 = arith.addf %191, %192 : vector<8x8xf32>
    %194 = math.tanh %193 : vector<8x8xf32>
    %195 = arith.mulf %188, %194 : vector<8x8xf32>
    %c56 = arith.constant 56 : index
    %c0_45 = arith.constant 0 : index
    %196 = vector.load %arg22[%c56, %c0_45] : memref<64x8xf32, #tpu.memory_space<vmem>>, vector<8x8xf32>
    tpu.vector_store %arg22[%c56, %c0_45], %195 {strides = array<i32>} : memref<64x8xf32, #tpu.memory_space<vmem>>, vector<8x8xf32>,
    %c0_46 = arith.constant 0 : index
    %c0_47 = arith.constant 0 : index
    %197 = vector.load %arg22[%c0_46, %c0_47] : memref<64x8xf32, #tpu.memory_space<vmem>>, vector<64x8xf32>
    %c0_48 = arith.constant 0 : index
    %c0_49 = arith.constant 0 : index
    %198 = vector.load %arg6[%c0_48, %c0_49] : memref<8x32xf32, #tpu.memory_space<vmem>>, vector<8x32xf32>
    %cst_50 = arith.constant dense<0.000000e+00> : vector<64x32xf32>
    %199 = tpu.matmul %197, %198, %cst_50 {dimension_numbers = #tpu.dot_dimension_numbers<[1], [0], [0], [1], [0, 0, 1, 1], [], []>} : vector<64x8xf32>, vector<8x32xf32>, vector<64x32xf32> -> vector<64x32xf32>
    %c0_51 = arith.constant 0 : index
    %c0_52 = arith.constant 0 : index
    %200 = vector.load %arg8[%c0_51, %c0_52] : memref<1x32xf32, #tpu.memory_space<vmem>>, vector<1x32xf32>
    %201 = vector.broadcast %200 : vector<1x32xf32> to vector<64x32xf32>
    %202 = arith.addf %199, %201 : vector<64x32xf32>
    %c0_53 = arith.constant 0 : index
    %c0_54 = arith.constant 0 : index
    %203 = vector.load %arg7[%c0_53, %c0_54] : memref<8x32xf32, #tpu.memory_space<vmem>>, vector<8x32xf32>
    %cst_55 = arith.constant 0.000000e+00 : f32
    %204 = vector.broadcast %cst_55 : f32 to vector<8x8xf32>
    %cst_56 = arith.constant 0.000000e+00 : f32
    %205 = vector.broadcast %cst_56 : f32 to vector<8x8xf32>
    %206 = vector.extract_strided_slice %202 {offsets = [0, 0], sizes = [8, 32], strides = [1, 1]} : vector<64x32xf32> to vector<8x32xf32>
    %cst_57 = arith.constant dense<0.000000e+00> : vector<8x32xf32>
    %207 = tpu.matmul %204, %203, %cst_57 {dimension_numbers = #tpu.dot_dimension_numbers<[1], [0], [0], [1], [0, 0, 1, 1], [], []>} : vector<8x8xf32>, vector<8x32xf32>, vector<8x32xf32> -> vector<8x32xf32>
    %208 = arith.addf %206, %207 : vector<8x32xf32>
    %209 = vector.extract_strided_slice %208 {offsets = [0, 0], sizes = [8, 24], strides = [1, 1]} : vector<8x32xf32> to vector<8x24xf32>
    %210 = arith.negf %209 : vector<8x24xf32>
    %211 = math.exp %210 : vector<8x24xf32>
    %cst_58 = arith.constant 1.000000e+00 : f32
    %212 = vector.broadcast %cst_58 : f32 to vector<8x24xf32>
    %213 = arith.addf %212, %211 : vector<8x24xf32>
    %214 = arith.divf %212, %213 : vector<8x24xf32>
    %215 = vector.extract_strided_slice %214 {offsets = [0, 0], sizes = [8, 8], strides = [1, 1]} : vector<8x24xf32> to vector<8x8xf32>
    %216 = vector.extract_strided_slice %214 {offsets = [0, 8], sizes = [8, 8], strides = [1, 1]} : vector<8x24xf32> to vector<8x8xf32>
    %217 = vector.extract_strided_slice %214 {offsets = [0, 16], sizes = [8, 8], strides = [1, 1]} : vector<8x24xf32> to vector<8x8xf32>
    %218 = vector.extract_strided_slice %208 {offsets = [0, 24], sizes = [8, 8], strides = [1, 1]} : vector<8x32xf32> to vector<8x8xf32>
    %219 = math.tanh %218 : vector<8x8xf32>
    %220 = arith.mulf %216, %205 : vector<8x8xf32>
    %221 = arith.mulf %215, %219 : vector<8x8xf32>
    %222 = arith.addf %220, %221 : vector<8x8xf32>
    %223 = math.tanh %222 : vector<8x8xf32>
    %224 = arith.mulf %217, %223 : vector<8x8xf32>
    %c0_59 = arith.constant 0 : index
    %c0_60 = arith.constant 0 : index
    %225 = vector.load %arg24[%c0_59, %c0_60] : memref<8x64xf32, #tpu.memory_space<vmem>>, vector<8x8xf32>
    tpu.vector_store %arg24[%c0_59, %c0_60], %224 {strides = array<i32>} : memref<8x64xf32, #tpu.memory_space<vmem>>, vector<8x8xf32>,
    %226 = vector.extract_strided_slice %202 {offsets = [8, 0], sizes = [8, 32], strides = [1, 1]} : vector<64x32xf32> to vector<8x32xf32>
    %cst_61 = arith.constant dense<0.000000e+00> : vector<8x32xf32>
    %227 = tpu.matmul %224, %203, %cst_61 {dimension_numbers = #tpu.dot_dimension_numbers<[1], [0], [0], [1], [0, 0, 1, 1], [], []>} : vector<8x8xf32>, vector<8x32xf32>, vector<8x32xf32> -> vector<8x32xf32>
    %228 = arith.addf %226, %227 : vector<8x32xf32>
    %229 = vector.extract_strided_slice %228 {offsets = [0, 0], sizes = [8, 24], strides = [1, 1]} : vector<8x32xf32> to vector<8x24xf32>
    %230 = arith.negf %229 : vector<8x24xf32>
    %231 = math.exp %230 : vector<8x24xf32>
    %cst_62 = arith.constant 1.000000e+00 : f32
    %232 = vector.broadcast %cst_62 : f32 to vector<8x24xf32>
    %233 = arith.addf %232, %231 : vector<8x24xf32>
    %234 = arith.divf %232, %233 : vector<8x24xf32>
    %235 = vector.extract_strided_slice %234 {offsets = [0, 0], sizes = [8, 8], strides = [1, 1]} : vector<8x24xf32> to vector<8x8xf32>
    %236 = vector.extract_strided_slice %234 {offsets = [0, 8], sizes = [8, 8], strides = [1, 1]} : vector<8x24xf32> to vector<8x8xf32>
    %237 = vector.extract_strided_slice %234 {offsets = [0, 16], sizes = [8, 8], strides = [1, 1]} : vector<8x24xf32> to vector<8x8xf32>
    %238 = vector.extract_strided_slice %228 {offsets = [0, 24], sizes = [8, 8], strides = [1, 1]} : vector<8x32xf32> to vector<8x8xf32>
    %239 = math.tanh %238 : vector<8x8xf32>
    %240 = arith.mulf %236, %222 : vector<8x8xf32>
    %241 = arith.mulf %235, %239 : vector<8x8xf32>
    %242 = arith.addf %240, %241 : vector<8x8xf32>
    %243 = math.tanh %242 : vector<8x8xf32>
    %244 = arith.mulf %237, %243 : vector<8x8xf32>
    %c0_63 = arith.constant 0 : index
    %c8_64 = arith.constant 8 : index
    %245 = vector.load %arg24[%c0_63, %c8_64] : memref<8x64xf32, #tpu.memory_space<vmem>>, vector<8x8xf32>
    tpu.vector_store %arg24[%c0_63, %c8_64], %244 {strides = array<i32>} : memref<8x64xf32, #tpu.memory_space<vmem>>, vector<8x8xf32>,
    %246 = vector.extract_strided_slice %202 {offsets = [16, 0], sizes = [8, 32], strides = [1, 1]} : vector<64x32xf32> to vector<8x32xf32>
    %cst_65 = arith.constant dense<0.000000e+00> : vector<8x32xf32>
    %247 = tpu.matmul %244, %203, %cst_65 {dimension_numbers = #tpu.dot_dimension_numbers<[1], [0], [0], [1], [0, 0, 1, 1], [], []>} : vector<8x8xf32>, vector<8x32xf32>, vector<8x32xf32> -> vector<8x32xf32>
    %248 = arith.addf %246, %247 : vector<8x32xf32>
    %249 = vector.extract_strided_slice %248 {offsets = [0, 0], sizes = [8, 24], strides = [1, 1]} : vector<8x32xf32> to vector<8x24xf32>
    %250 = arith.negf %249 : vector<8x24xf32>
    %251 = math.exp %250 : vector<8x24xf32>
    %cst_66 = arith.constant 1.000000e+00 : f32
    %252 = vector.broadcast %cst_66 : f32 to vector<8x24xf32>
    %253 = arith.addf %252, %251 : vector<8x24xf32>
    %254 = arith.divf %252, %253 : vector<8x24xf32>
    %255 = vector.extract_strided_slice %254 {offsets = [0, 0], sizes = [8, 8], strides = [1, 1]} : vector<8x24xf32> to vector<8x8xf32>
    %256 = vector.extract_strided_slice %254 {offsets = [0, 8], sizes = [8, 8], strides = [1, 1]} : vector<8x24xf32> to vector<8x8xf32>
    %257 = vector.extract_strided_slice %254 {offsets = [0, 16], sizes = [8, 8], strides = [1, 1]} : vector<8x24xf32> to vector<8x8xf32>
    %258 = vector.extract_strided_slice %248 {offsets = [0, 24], sizes = [8, 8], strides = [1, 1]} : vector<8x32xf32> to vector<8x8xf32>
    %259 = math.tanh %258 : vector<8x8xf32>
    %260 = arith.mulf %256, %242 : vector<8x8xf32>
    %261 = arith.mulf %255, %259 : vector<8x8xf32>
    %262 = arith.addf %260, %261 : vector<8x8xf32>
    %263 = math.tanh %262 : vector<8x8xf32>
    %264 = arith.mulf %257, %263 : vector<8x8xf32>
    %c0_67 = arith.constant 0 : index
    %c16_68 = arith.constant 16 : index
    %265 = vector.load %arg24[%c0_67, %c16_68] : memref<8x64xf32, #tpu.memory_space<vmem>>, vector<8x8xf32>
    tpu.vector_store %arg24[%c0_67, %c16_68], %264 {strides = array<i32>} : memref<8x64xf32, #tpu.memory_space<vmem>>, vector<8x8xf32>,
    %266 = vector.extract_strided_slice %202 {offsets = [24, 0], sizes = [8, 32], strides = [1, 1]} : vector<64x32xf32> to vector<8x32xf32>
    %cst_69 = arith.constant dense<0.000000e+00> : vector<8x32xf32>
    %267 = tpu.matmul %264, %203, %cst_69 {dimension_numbers = #tpu.dot_dimension_numbers<[1], [0], [0], [1], [0, 0, 1, 1], [], []>} : vector<8x8xf32>, vector<8x32xf32>, vector<8x32xf32> -> vector<8x32xf32>
    %268 = arith.addf %266, %267 : vector<8x32xf32>
    %269 = vector.extract_strided_slice %268 {offsets = [0, 0], sizes = [8, 24], strides = [1, 1]} : vector<8x32xf32> to vector<8x24xf32>
    %270 = arith.negf %269 : vector<8x24xf32>
    %271 = math.exp %270 : vector<8x24xf32>
    %cst_70 = arith.constant 1.000000e+00 : f32
    %272 = vector.broadcast %cst_70 : f32 to vector<8x24xf32>
    %273 = arith.addf %272, %271 : vector<8x24xf32>
    %274 = arith.divf %272, %273 : vector<8x24xf32>
    %275 = vector.extract_strided_slice %274 {offsets = [0, 0], sizes = [8, 8], strides = [1, 1]} : vector<8x24xf32> to vector<8x8xf32>
    %276 = vector.extract_strided_slice %274 {offsets = [0, 8], sizes = [8, 8], strides = [1, 1]} : vector<8x24xf32> to vector<8x8xf32>
    %277 = vector.extract_strided_slice %274 {offsets = [0, 16], sizes = [8, 8], strides = [1, 1]} : vector<8x24xf32> to vector<8x8xf32>
    %278 = vector.extract_strided_slice %268 {offsets = [0, 24], sizes = [8, 8], strides = [1, 1]} : vector<8x32xf32> to vector<8x8xf32>
    %279 = math.tanh %278 : vector<8x8xf32>
    %280 = arith.mulf %276, %262 : vector<8x8xf32>
    %281 = arith.mulf %275, %279 : vector<8x8xf32>
    %282 = arith.addf %280, %281 : vector<8x8xf32>
    %283 = math.tanh %282 : vector<8x8xf32>
    %284 = arith.mulf %277, %283 : vector<8x8xf32>
    %c0_71 = arith.constant 0 : index
    %c24_72 = arith.constant 24 : index
    %285 = vector.load %arg24[%c0_71, %c24_72] : memref<8x64xf32, #tpu.memory_space<vmem>>, vector<8x8xf32>
    tpu.vector_store %arg24[%c0_71, %c24_72], %284 {strides = array<i32>} : memref<8x64xf32, #tpu.memory_space<vmem>>, vector<8x8xf32>,
    %286 = vector.extract_strided_slice %202 {offsets = [32, 0], sizes = [8, 32], strides = [1, 1]} : vector<64x32xf32> to vector<8x32xf32>
    %cst_73 = arith.constant dense<0.000000e+00> : vector<8x32xf32>
    %287 = tpu.matmul %284, %203, %cst_73 {dimension_numbers = #tpu.dot_dimension_numbers<[1], [0], [0], [1], [0, 0, 1, 1], [], []>} : vector<8x8xf32>, vector<8x32xf32>, vector<8x32xf32> -> vector<8x32xf32>
    %288 = arith.addf %286, %287 : vector<8x32xf32>
    %289 = vector.extract_strided_slice %288 {offsets = [0, 0], sizes = [8, 24], strides = [1, 1]} : vector<8x32xf32> to vector<8x24xf32>
    %290 = arith.negf %289 : vector<8x24xf32>
    %291 = math.exp %290 : vector<8x24xf32>
    %cst_74 = arith.constant 1.000000e+00 : f32
    %292 = vector.broadcast %cst_74 : f32 to vector<8x24xf32>
    %293 = arith.addf %292, %291 : vector<8x24xf32>
    %294 = arith.divf %292, %293 : vector<8x24xf32>
    %295 = vector.extract_strided_slice %294 {offsets = [0, 0], sizes = [8, 8], strides = [1, 1]} : vector<8x24xf32> to vector<8x8xf32>
    %296 = vector.extract_strided_slice %294 {offsets = [0, 8], sizes = [8, 8], strides = [1, 1]} : vector<8x24xf32> to vector<8x8xf32>
    %297 = vector.extract_strided_slice %294 {offsets = [0, 16], sizes = [8, 8], strides = [1, 1]} : vector<8x24xf32> to vector<8x8xf32>
    %298 = vector.extract_strided_slice %288 {offsets = [0, 24], sizes = [8, 8], strides = [1, 1]} : vector<8x32xf32> to vector<8x8xf32>
    %299 = math.tanh %298 : vector<8x8xf32>
    %300 = arith.mulf %296, %282 : vector<8x8xf32>
    %301 = arith.mulf %295, %299 : vector<8x8xf32>
    %302 = arith.addf %300, %301 : vector<8x8xf32>
    %303 = math.tanh %302 : vector<8x8xf32>
    %304 = arith.mulf %297, %303 : vector<8x8xf32>
    %c0_75 = arith.constant 0 : index
    %c32_76 = arith.constant 32 : index
    %305 = vector.load %arg24[%c0_75, %c32_76] : memref<8x64xf32, #tpu.memory_space<vmem>>, vector<8x8xf32>
    tpu.vector_store %arg24[%c0_75, %c32_76], %304 {strides = array<i32>} : memref<8x64xf32, #tpu.memory_space<vmem>>, vector<8x8xf32>,
    %306 = vector.extract_strided_slice %202 {offsets = [40, 0], sizes = [8, 32], strides = [1, 1]} : vector<64x32xf32> to vector<8x32xf32>
    %cst_77 = arith.constant dense<0.000000e+00> : vector<8x32xf32>
    %307 = tpu.matmul %304, %203, %cst_77 {dimension_numbers = #tpu.dot_dimension_numbers<[1], [0], [0], [1], [0, 0, 1, 1], [], []>} : vector<8x8xf32>, vector<8x32xf32>, vector<8x32xf32> -> vector<8x32xf32>
    %308 = arith.addf %306, %307 : vector<8x32xf32>
    %309 = vector.extract_strided_slice %308 {offsets = [0, 0], sizes = [8, 24], strides = [1, 1]} : vector<8x32xf32> to vector<8x24xf32>
    %310 = arith.negf %309 : vector<8x24xf32>
    %311 = math.exp %310 : vector<8x24xf32>
    %cst_78 = arith.constant 1.000000e+00 : f32
    %312 = vector.broadcast %cst_78 : f32 to vector<8x24xf32>
    %313 = arith.addf %312, %311 : vector<8x24xf32>
    %314 = arith.divf %312, %313 : vector<8x24xf32>
    %315 = vector.extract_strided_slice %314 {offsets = [0, 0], sizes = [8, 8], strides = [1, 1]} : vector<8x24xf32> to vector<8x8xf32>
    %316 = vector.extract_strided_slice %314 {offsets = [0, 8], sizes = [8, 8], strides = [1, 1]} : vector<8x24xf32> to vector<8x8xf32>
    %317 = vector.extract_strided_slice %314 {offsets = [0, 16], sizes = [8, 8], strides = [1, 1]} : vector<8x24xf32> to vector<8x8xf32>
    %318 = vector.extract_strided_slice %308 {offsets = [0, 24], sizes = [8, 8], strides = [1, 1]} : vector<8x32xf32> to vector<8x8xf32>
    %319 = math.tanh %318 : vector<8x8xf32>
    %320 = arith.mulf %316, %302 : vector<8x8xf32>
    %321 = arith.mulf %315, %319 : vector<8x8xf32>
    %322 = arith.addf %320, %321 : vector<8x8xf32>
    %323 = math.tanh %322 : vector<8x8xf32>
    %324 = arith.mulf %317, %323 : vector<8x8xf32>
    %c0_79 = arith.constant 0 : index
    %c40_80 = arith.constant 40 : index
    %325 = vector.load %arg24[%c0_79, %c40_80] : memref<8x64xf32, #tpu.memory_space<vmem>>, vector<8x8xf32>
    tpu.vector_store %arg24[%c0_79, %c40_80], %324 {strides = array<i32>} : memref<8x64xf32, #tpu.memory_space<vmem>>, vector<8x8xf32>,
    %326 = vector.extract_strided_slice %202 {offsets = [48, 0], sizes = [8, 32], strides = [1, 1]} : vector<64x32xf32> to vector<8x32xf32>
    %cst_81 = arith.constant dense<0.000000e+00> : vector<8x32xf32>
    %327 = tpu.matmul %324, %203, %cst_81 {dimension_numbers = #tpu.dot_dimension_numbers<[1], [0], [0], [1], [0, 0, 1, 1], [], []>} : vector<8x8xf32>, vector<8x32xf32>, vector<8x32xf32> -> vector<8x32xf32>
    %328 = arith.addf %326, %327 : vector<8x32xf32>
    %329 = vector.extract_strided_slice %328 {offsets = [0, 0], sizes = [8, 24], strides = [1, 1]} : vector<8x32xf32> to vector<8x24xf32>
    %330 = arith.negf %329 : vector<8x24xf32>
    %331 = math.exp %330 : vector<8x24xf32>
    %cst_82 = arith.constant 1.000000e+00 : f32
    %332 = vector.broadcast %cst_82 : f32 to vector<8x24xf32>
    %333 = arith.addf %332, %331 : vector<8x24xf32>
    %334 = arith.divf %332, %333 : vector<8x24xf32>
    %335 = vector.extract_strided_slice %334 {offsets = [0, 0], sizes = [8, 8], strides = [1, 1]} : vector<8x24xf32> to vector<8x8xf32>
    %336 = vector.extract_strided_slice %334 {offsets = [0, 8], sizes = [8, 8], strides = [1, 1]} : vector<8x24xf32> to vector<8x8xf32>
    %337 = vector.extract_strided_slice %334 {offsets = [0, 16], sizes = [8, 8], strides = [1, 1]} : vector<8x24xf32> to vector<8x8xf32>
    %338 = vector.extract_strided_slice %328 {offsets = [0, 24], sizes = [8, 8], strides = [1, 1]} : vector<8x32xf32> to vector<8x8xf32>
    %339 = math.tanh %338 : vector<8x8xf32>
    %340 = arith.mulf %336, %322 : vector<8x8xf32>
    %341 = arith.mulf %335, %339 : vector<8x8xf32>
    %342 = arith.addf %340, %341 : vector<8x8xf32>
    %343 = math.tanh %342 : vector<8x8xf32>
    %344 = arith.mulf %337, %343 : vector<8x8xf32>
    %c0_83 = arith.constant 0 : index
    %c48_84 = arith.constant 48 : index
    %345 = vector.load %arg24[%c0_83, %c48_84] : memref<8x64xf32, #tpu.memory_space<vmem>>, vector<8x8xf32>
    tpu.vector_store %arg24[%c0_83, %c48_84], %344 {strides = array<i32>} : memref<8x64xf32, #tpu.memory_space<vmem>>, vector<8x8xf32>,
    %346 = vector.extract_strided_slice %202 {offsets = [56, 0], sizes = [8, 32], strides = [1, 1]} : vector<64x32xf32> to vector<8x32xf32>
    %cst_85 = arith.constant dense<0.000000e+00> : vector<8x32xf32>
    %347 = tpu.matmul %344, %203, %cst_85 {dimension_numbers = #tpu.dot_dimension_numbers<[1], [0], [0], [1], [0, 0, 1, 1], [], []>} : vector<8x8xf32>, vector<8x32xf32>, vector<8x32xf32> -> vector<8x32xf32>
    %348 = arith.addf %346, %347 : vector<8x32xf32>
    %349 = vector.extract_strided_slice %348 {offsets = [0, 0], sizes = [8, 24], strides = [1, 1]} : vector<8x32xf32> to vector<8x24xf32>
    %350 = arith.negf %349 : vector<8x24xf32>
    %351 = math.exp %350 : vector<8x24xf32>
    %cst_86 = arith.constant 1.000000e+00 : f32
    %352 = vector.broadcast %cst_86 : f32 to vector<8x24xf32>
    %353 = arith.addf %352, %351 : vector<8x24xf32>
    %354 = arith.divf %352, %353 : vector<8x24xf32>
    %355 = vector.extract_strided_slice %354 {offsets = [0, 0], sizes = [8, 8], strides = [1, 1]} : vector<8x24xf32> to vector<8x8xf32>
    %356 = vector.extract_strided_slice %354 {offsets = [0, 8], sizes = [8, 8], strides = [1, 1]} : vector<8x24xf32> to vector<8x8xf32>
    %357 = vector.extract_strided_slice %354 {offsets = [0, 16], sizes = [8, 8], strides = [1, 1]} : vector<8x24xf32> to vector<8x8xf32>
    %358 = vector.extract_strided_slice %348 {offsets = [0, 24], sizes = [8, 8], strides = [1, 1]} : vector<8x32xf32> to vector<8x8xf32>
    %359 = math.tanh %358 : vector<8x8xf32>
    %360 = arith.mulf %356, %342 : vector<8x8xf32>
    %361 = arith.mulf %355, %359 : vector<8x8xf32>
    %362 = arith.addf %360, %361 : vector<8x8xf32>
    %363 = math.tanh %362 : vector<8x8xf32>
    %364 = arith.mulf %357, %363 : vector<8x8xf32>
    %c0_87 = arith.constant 0 : index
    %c56_88 = arith.constant 56 : index
    %365 = vector.load %arg24[%c0_87, %c56_88] : memref<8x64xf32, #tpu.memory_space<vmem>>, vector<8x8xf32>
    tpu.vector_store %arg24[%c0_87, %c56_88], %364 {strides = array<i32>} : memref<8x64xf32, #tpu.memory_space<vmem>>, vector<8x8xf32>,
    %c0_89 = arith.constant 0 : index
    %c0_90 = arith.constant 0 : index
    %366 = vector.load %arg24[%c0_89, %c0_90] : memref<8x64xf32, #tpu.memory_space<vmem>>, vector<8x64xf32>
    %c0_91 = arith.constant 0 : index
    %c0_92 = arith.constant 0 : index
    %367 = vector.load %arg9[%c0_91, %c0_92] : memref<64x8xf32, #tpu.memory_space<vmem>>, vector<64x8xf32>
    %cst_93 = arith.constant dense<0.000000e+00> : vector<8x8xf32>
    %368 = tpu.matmul %366, %367, %cst_93 {dimension_numbers = #tpu.dot_dimension_numbers<[1], [0], [0], [1], [0, 0, 1, 1], [], []>} : vector<8x64xf32>, vector<64x8xf32>, vector<8x8xf32> -> vector<8x8xf32>
    %c0_94 = arith.constant 0 : index
    %c0_95 = arith.constant 0 : index
    %369 = vector.load %arg10[%c0_94, %c0_95] : memref<1x8xf32, #tpu.memory_space<vmem>>, vector<1x8xf32>
    %370 = vector.broadcast %369 : vector<1x8xf32> to vector<8x8xf32>
    %371 = arith.addf %368, %370 : vector<8x8xf32>
    %cst_96 = arith.constant 0.000000e+00 : f32
    %372 = vector.broadcast %cst_96 : f32 to vector<8x8xf32>
    %373 = arith.cmpf ogt, %371, %372 : vector<8x8xf32>
    %cst_97 = arith.constant 0.899999976 : f32
    %374 = vector.broadcast %cst_97 : f32 to vector<8x8xf32>
    %375 = arith.mulf %374, %371 : vector<8x8xf32>
    %376 = arith.select %373, %371, %375 : vector<8x8xi1>, vector<8x8xf32>
    %c0_98 = arith.constant 0 : index
    %c0_99 = arith.constant 0 : index
    %377 = vector.load %arg11[%c0_98, %c0_99] : memref<8x64xf32, #tpu.memory_space<vmem>>, vector<8x64xf32>
    %cst_100 = arith.constant dense<0.000000e+00> : vector<8x64xf32>
    %378 = tpu.matmul %376, %377, %cst_100 {dimension_numbers = #tpu.dot_dimension_numbers<[1], [0], [0], [1], [0, 0, 1, 1], [], []>} : vector<8x8xf32>, vector<8x64xf32>, vector<8x64xf32> -> vector<8x64xf32>
    %c0_101 = arith.constant 0 : index
    %c0_102 = arith.constant 0 : index
    %379 = vector.load %arg12[%c0_101, %c0_102] : memref<1x64xf32, #tpu.memory_space<vmem>>, vector<1x64xf32>
    %380 = vector.broadcast %379 : vector<1x64xf32> to vector<8x64xf32>
    %381 = arith.addf %378, %380 : vector<8x64xf32>
    %cst_103 = arith.constant 0.000000e+00 : f32
    %382 = vector.broadcast %cst_103 : f32 to vector<8x64xf32>
    %383 = arith.cmpf ogt, %381, %382 : vector<8x64xf32>
    %cst_104 = arith.constant 0.899999976 : f32
    %384 = vector.broadcast %cst_104 : f32 to vector<8x64xf32>
    %385 = arith.mulf %384, %381 : vector<8x64xf32>
    %386 = arith.select %383, %381, %385 : vector<8x64xi1>, vector<8x64xf32>
    %c0_105 = arith.constant 0 : index
    %c0_106 = arith.constant 0 : index
    %387 = vector.load %arg13[%c0_105, %c0_106] : memref<64x512xf32, #tpu.memory_space<vmem>>, vector<64x512xf32>
    %cst_107 = arith.constant dense<0.000000e+00> : vector<8x512xf32>
    %388 = tpu.matmul %386, %387, %cst_107 {dimension_numbers = #tpu.dot_dimension_numbers<[1], [0], [0], [1], [0, 0, 1, 1], [], []>} : vector<8x64xf32>, vector<64x512xf32>, vector<8x512xf32> -> vector<8x512xf32>
    %c0_108 = arith.constant 0 : index
    %c0_109 = arith.constant 0 : index
    %389 = vector.load %arg15[%c0_108, %c0_109] : memref<1x512xf32, #tpu.memory_space<vmem>>, vector<1x512xf32>
    %390 = vector.broadcast %389 : vector<1x512xf32> to vector<8x512xf32>
    %391 = arith.addf %388, %390 : vector<8x512xf32>
    %c0_110 = arith.constant 0 : index
    %c0_111 = arith.constant 0 : index
    %392 = vector.load %arg14[%c0_110, %c0_111] : memref<16x64xf32, #tpu.memory_space<vmem>>, vector<16x64xf32>
    %cst_112 = arith.constant 0.000000e+00 : f32
    %393 = vector.broadcast %cst_112 : f32 to vector<8x16xf32>
    %cst_113 = arith.constant 0.000000e+00 : f32
    %394 = vector.broadcast %cst_113 : f32 to vector<8x16xf32>
    %395 = vector.extract_strided_slice %391 {offsets = [0, 0], sizes = [8, 64], strides = [1, 1]} : vector<8x512xf32> to vector<8x64xf32>
    %cst_114 = arith.constant dense<0.000000e+00> : vector<8x64xf32>
    %396 = tpu.matmul %393, %392, %cst_114 {dimension_numbers = #tpu.dot_dimension_numbers<[1], [0], [0], [1], [0, 0, 1, 1], [], []>} : vector<8x16xf32>, vector<16x64xf32>, vector<8x64xf32> -> vector<8x64xf32>
    %397 = arith.addf %395, %396 : vector<8x64xf32>
    %398 = vector.extract_strided_slice %397 {offsets = [0, 0], sizes = [8, 48], strides = [1, 1]} : vector<8x64xf32> to vector<8x48xf32>
    %399 = arith.negf %398 : vector<8x48xf32>
    %400 = math.exp %399 : vector<8x48xf32>
    %cst_115 = arith.constant 1.000000e+00 : f32
    %401 = vector.broadcast %cst_115 : f32 to vector<8x48xf32>
    %402 = arith.addf %401, %400 : vector<8x48xf32>
    %403 = arith.divf %401, %402 : vector<8x48xf32>
    %404 = vector.extract_strided_slice %403 {offsets = [0, 0], sizes = [8, 16], strides = [1, 1]} : vector<8x48xf32> to vector<8x16xf32>
    %405 = vector.extract_strided_slice %403 {offsets = [0, 16], sizes = [8, 16], strides = [1, 1]} : vector<8x48xf32> to vector<8x16xf32>
    %406 = vector.extract_strided_slice %403 {offsets = [0, 32], sizes = [8, 16], strides = [1, 1]} : vector<8x48xf32> to vector<8x16xf32>
    %407 = vector.extract_strided_slice %397 {offsets = [0, 48], sizes = [8, 16], strides = [1, 1]} : vector<8x64xf32> to vector<8x16xf32>
    %408 = math.tanh %407 : vector<8x16xf32>
    %409 = arith.mulf %405, %394 : vector<8x16xf32>
    %410 = arith.mulf %404, %408 : vector<8x16xf32>
    %411 = arith.addf %409, %410 : vector<8x16xf32>
    %412 = math.tanh %411 : vector<8x16xf32>
    %413 = arith.mulf %406, %412 : vector<8x16xf32>
    %c0_116 = arith.constant 0 : index
    %c0_117 = arith.constant 0 : index
    %414 = vector.load %arg23[%c0_116, %c0_117] : memref<64x16xf32, #tpu.memory_space<vmem>>, vector<8x16xf32>
    tpu.vector_store %arg23[%c0_116, %c0_117], %413 {strides = array<i32>} : memref<64x16xf32, #tpu.memory_space<vmem>>, vector<8x16xf32>,
    %415 = vector.extract_strided_slice %391 {offsets = [0, 64], sizes = [8, 64], strides = [1, 1]} : vector<8x512xf32> to vector<8x64xf32>
    %cst_118 = arith.constant dense<0.000000e+00> : vector<8x64xf32>
    %416 = tpu.matmul %413, %392, %cst_118 {dimension_numbers = #tpu.dot_dimension_numbers<[1], [0], [0], [1], [0, 0, 1, 1], [], []>} : vector<8x16xf32>, vector<16x64xf32>, vector<8x64xf32> -> vector<8x64xf32>
    %417 = arith.addf %415, %416 : vector<8x64xf32>
    %418 = vector.extract_strided_slice %417 {offsets = [0, 0], sizes = [8, 48], strides = [1, 1]} : vector<8x64xf32> to vector<8x48xf32>
    %419 = arith.negf %418 : vector<8x48xf32>
    %420 = math.exp %419 : vector<8x48xf32>
    %cst_119 = arith.constant 1.000000e+00 : f32
    %421 = vector.broadcast %cst_119 : f32 to vector<8x48xf32>
    %422 = arith.addf %421, %420 : vector<8x48xf32>
    %423 = arith.divf %421, %422 : vector<8x48xf32>
    %424 = vector.extract_strided_slice %423 {offsets = [0, 0], sizes = [8, 16], strides = [1, 1]} : vector<8x48xf32> to vector<8x16xf32>
    %425 = vector.extract_strided_slice %423 {offsets = [0, 16], sizes = [8, 16], strides = [1, 1]} : vector<8x48xf32> to vector<8x16xf32>
    %426 = vector.extract_strided_slice %423 {offsets = [0, 32], sizes = [8, 16], strides = [1, 1]} : vector<8x48xf32> to vector<8x16xf32>
    %427 = vector.extract_strided_slice %417 {offsets = [0, 48], sizes = [8, 16], strides = [1, 1]} : vector<8x64xf32> to vector<8x16xf32>
    %428 = math.tanh %427 : vector<8x16xf32>
    %429 = arith.mulf %425, %411 : vector<8x16xf32>
    %430 = arith.mulf %424, %428 : vector<8x16xf32>
    %431 = arith.addf %429, %430 : vector<8x16xf32>
    %432 = math.tanh %431 : vector<8x16xf32>
    %433 = arith.mulf %426, %432 : vector<8x16xf32>
    %c8_120 = arith.constant 8 : index
    %c0_121 = arith.constant 0 : index
    %434 = vector.load %arg23[%c8_120, %c0_121] : memref<64x16xf32, #tpu.memory_space<vmem>>, vector<8x16xf32>
    tpu.vector_store %arg23[%c8_120, %c0_121], %433 {strides = array<i32>} : memref<64x16xf32, #tpu.memory_space<vmem>>, vector<8x16xf32>,
    %435 = vector.extract_strided_slice %391 {offsets = [0, 128], sizes = [8, 64], strides = [1, 1]} : vector<8x512xf32> to vector<8x64xf32>
    %cst_122 = arith.constant dense<0.000000e+00> : vector<8x64xf32>
    %436 = tpu.matmul %433, %392, %cst_122 {dimension_numbers = #tpu.dot_dimension_numbers<[1], [0], [0], [1], [0, 0, 1, 1], [], []>} : vector<8x16xf32>, vector<16x64xf32>, vector<8x64xf32> -> vector<8x64xf32>
    %437 = arith.addf %435, %436 : vector<8x64xf32>
    %438 = vector.extract_strided_slice %437 {offsets = [0, 0], sizes = [8, 48], strides = [1, 1]} : vector<8x64xf32> to vector<8x48xf32>
    %439 = arith.negf %438 : vector<8x48xf32>
    %440 = math.exp %439 : vector<8x48xf32>
    %cst_123 = arith.constant 1.000000e+00 : f32
    %441 = vector.broadcast %cst_123 : f32 to vector<8x48xf32>
    %442 = arith.addf %441, %440 : vector<8x48xf32>
    %443 = arith.divf %441, %442 : vector<8x48xf32>
    %444 = vector.extract_strided_slice %443 {offsets = [0, 0], sizes = [8, 16], strides = [1, 1]} : vector<8x48xf32> to vector<8x16xf32>
    %445 = vector.extract_strided_slice %443 {offsets = [0, 16], sizes = [8, 16], strides = [1, 1]} : vector<8x48xf32> to vector<8x16xf32>
    %446 = vector.extract_strided_slice %443 {offsets = [0, 32], sizes = [8, 16], strides = [1, 1]} : vector<8x48xf32> to vector<8x16xf32>
    %447 = vector.extract_strided_slice %437 {offsets = [0, 48], sizes = [8, 16], strides = [1, 1]} : vector<8x64xf32> to vector<8x16xf32>
    %448 = math.tanh %447 : vector<8x16xf32>
    %449 = arith.mulf %445, %431 : vector<8x16xf32>
    %450 = arith.mulf %444, %448 : vector<8x16xf32>
    %451 = arith.addf %449, %450 : vector<8x16xf32>
    %452 = math.tanh %451 : vector<8x16xf32>
    %453 = arith.mulf %446, %452 : vector<8x16xf32>
    %c16_124 = arith.constant 16 : index
    %c0_125 = arith.constant 0 : index
    %454 = vector.load %arg23[%c16_124, %c0_125] : memref<64x16xf32, #tpu.memory_space<vmem>>, vector<8x16xf32>
    tpu.vector_store %arg23[%c16_124, %c0_125], %453 {strides = array<i32>} : memref<64x16xf32, #tpu.memory_space<vmem>>, vector<8x16xf32>,
    %455 = vector.extract_strided_slice %391 {offsets = [0, 192], sizes = [8, 64], strides = [1, 1]} : vector<8x512xf32> to vector<8x64xf32>
    %cst_126 = arith.constant dense<0.000000e+00> : vector<8x64xf32>
    %456 = tpu.matmul %453, %392, %cst_126 {dimension_numbers = #tpu.dot_dimension_numbers<[1], [0], [0], [1], [0, 0, 1, 1], [], []>} : vector<8x16xf32>, vector<16x64xf32>, vector<8x64xf32> -> vector<8x64xf32>
    %457 = arith.addf %455, %456 : vector<8x64xf32>
    %458 = vector.extract_strided_slice %457 {offsets = [0, 0], sizes = [8, 48], strides = [1, 1]} : vector<8x64xf32> to vector<8x48xf32>
    %459 = arith.negf %458 : vector<8x48xf32>
    %460 = math.exp %459 : vector<8x48xf32>
    %cst_127 = arith.constant 1.000000e+00 : f32
    %461 = vector.broadcast %cst_127 : f32 to vector<8x48xf32>
    %462 = arith.addf %461, %460 : vector<8x48xf32>
    %463 = arith.divf %461, %462 : vector<8x48xf32>
    %464 = vector.extract_strided_slice %463 {offsets = [0, 0], sizes = [8, 16], strides = [1, 1]} : vector<8x48xf32> to vector<8x16xf32>
    %465 = vector.extract_strided_slice %463 {offsets = [0, 16], sizes = [8, 16], strides = [1, 1]} : vector<8x48xf32> to vector<8x16xf32>
    %466 = vector.extract_strided_slice %463 {offsets = [0, 32], sizes = [8, 16], strides = [1, 1]} : vector<8x48xf32> to vector<8x16xf32>
    %467 = vector.extract_strided_slice %457 {offsets = [0, 48], sizes = [8, 16], strides = [1, 1]} : vector<8x64xf32> to vector<8x16xf32>
    %468 = math.tanh %467 : vector<8x16xf32>
    %469 = arith.mulf %465, %451 : vector<8x16xf32>
    %470 = arith.mulf %464, %468 : vector<8x16xf32>
    %471 = arith.addf %469, %470 : vector<8x16xf32>
    %472 = math.tanh %471 : vector<8x16xf32>
    %473 = arith.mulf %466, %472 : vector<8x16xf32>
    %c24_128 = arith.constant 24 : index
    %c0_129 = arith.constant 0 : index
    %474 = vector.load %arg23[%c24_128, %c0_129] : memref<64x16xf32, #tpu.memory_space<vmem>>, vector<8x16xf32>
    tpu.vector_store %arg23[%c24_128, %c0_129], %473 {strides = array<i32>} : memref<64x16xf32, #tpu.memory_space<vmem>>, vector<8x16xf32>,
    %475 = vector.extract_strided_slice %391 {offsets = [0, 256], sizes = [8, 64], strides = [1, 1]} : vector<8x512xf32> to vector<8x64xf32>
    %cst_130 = arith.constant dense<0.000000e+00> : vector<8x64xf32>
    %476 = tpu.matmul %473, %392, %cst_130 {dimension_numbers = #tpu.dot_dimension_numbers<[1], [0], [0], [1], [0, 0, 1, 1], [], []>} : vector<8x16xf32>, vector<16x64xf32>, vector<8x64xf32> -> vector<8x64xf32>
    %477 = arith.addf %475, %476 : vector<8x64xf32>
    %478 = vector.extract_strided_slice %477 {offsets = [0, 0], sizes = [8, 48], strides = [1, 1]} : vector<8x64xf32> to vector<8x48xf32>
    %479 = arith.negf %478 : vector<8x48xf32>
    %480 = math.exp %479 : vector<8x48xf32>
    %cst_131 = arith.constant 1.000000e+00 : f32
    %481 = vector.broadcast %cst_131 : f32 to vector<8x48xf32>
    %482 = arith.addf %481, %480 : vector<8x48xf32>
    %483 = arith.divf %481, %482 : vector<8x48xf32>
    %484 = vector.extract_strided_slice %483 {offsets = [0, 0], sizes = [8, 16], strides = [1, 1]} : vector<8x48xf32> to vector<8x16xf32>
    %485 = vector.extract_strided_slice %483 {offsets = [0, 16], sizes = [8, 16], strides = [1, 1]} : vector<8x48xf32> to vector<8x16xf32>
    %486 = vector.extract_strided_slice %483 {offsets = [0, 32], sizes = [8, 16], strides = [1, 1]} : vector<8x48xf32> to vector<8x16xf32>
    %487 = vector.extract_strided_slice %477 {offsets = [0, 48], sizes = [8, 16], strides = [1, 1]} : vector<8x64xf32> to vector<8x16xf32>
    %488 = math.tanh %487 : vector<8x16xf32>
    %489 = arith.mulf %485, %471 : vector<8x16xf32>
    %490 = arith.mulf %484, %488 : vector<8x16xf32>
    %491 = arith.addf %489, %490 : vector<8x16xf32>
    %492 = math.tanh %491 : vector<8x16xf32>
    %493 = arith.mulf %486, %492 : vector<8x16xf32>
    %c32_132 = arith.constant 32 : index
    %c0_133 = arith.constant 0 : index
    %494 = vector.load %arg23[%c32_132, %c0_133] : memref<64x16xf32, #tpu.memory_space<vmem>>, vector<8x16xf32>
    tpu.vector_store %arg23[%c32_132, %c0_133], %493 {strides = array<i32>} : memref<64x16xf32, #tpu.memory_space<vmem>>, vector<8x16xf32>,
    %495 = vector.extract_strided_slice %391 {offsets = [0, 320], sizes = [8, 64], strides = [1, 1]} : vector<8x512xf32> to vector<8x64xf32>
    %cst_134 = arith.constant dense<0.000000e+00> : vector<8x64xf32>
    %496 = tpu.matmul %493, %392, %cst_134 {dimension_numbers = #tpu.dot_dimension_numbers<[1], [0], [0], [1], [0, 0, 1, 1], [], []>} : vector<8x16xf32>, vector<16x64xf32>, vector<8x64xf32> -> vector<8x64xf32>
    %497 = arith.addf %495, %496 : vector<8x64xf32>
    %498 = vector.extract_strided_slice %497 {offsets = [0, 0], sizes = [8, 48], strides = [1, 1]} : vector<8x64xf32> to vector<8x48xf32>
    %499 = arith.negf %498 : vector<8x48xf32>
    %500 = math.exp %499 : vector<8x48xf32>
    %cst_135 = arith.constant 1.000000e+00 : f32
    %501 = vector.broadcast %cst_135 : f32 to vector<8x48xf32>
    %502 = arith.addf %501, %500 : vector<8x48xf32>
    %503 = arith.divf %501, %502 : vector<8x48xf32>
    %504 = vector.extract_strided_slice %503 {offsets = [0, 0], sizes = [8, 16], strides = [1, 1]} : vector<8x48xf32> to vector<8x16xf32>
    %505 = vector.extract_strided_slice %503 {offsets = [0, 16], sizes = [8, 16], strides = [1, 1]} : vector<8x48xf32> to vector<8x16xf32>
    %506 = vector.extract_strided_slice %503 {offsets = [0, 32], sizes = [8, 16], strides = [1, 1]} : vector<8x48xf32> to vector<8x16xf32>
    %507 = vector.extract_strided_slice %497 {offsets = [0, 48], sizes = [8, 16], strides = [1, 1]} : vector<8x64xf32> to vector<8x16xf32>
    %508 = math.tanh %507 : vector<8x16xf32>
    %509 = arith.mulf %505, %491 : vector<8x16xf32>
    %510 = arith.mulf %504, %508 : vector<8x16xf32>
    %511 = arith.addf %509, %510 : vector<8x16xf32>
    %512 = math.tanh %511 : vector<8x16xf32>
    %513 = arith.mulf %506, %512 : vector<8x16xf32>
    %c40_136 = arith.constant 40 : index
    %c0_137 = arith.constant 0 : index
    %514 = vector.load %arg23[%c40_136, %c0_137] : memref<64x16xf32, #tpu.memory_space<vmem>>, vector<8x16xf32>
    tpu.vector_store %arg23[%c40_136, %c0_137], %513 {strides = array<i32>} : memref<64x16xf32, #tpu.memory_space<vmem>>, vector<8x16xf32>,
    %515 = vector.extract_strided_slice %391 {offsets = [0, 384], sizes = [8, 64], strides = [1, 1]} : vector<8x512xf32> to vector<8x64xf32>
    %cst_138 = arith.constant dense<0.000000e+00> : vector<8x64xf32>
    %516 = tpu.matmul %513, %392, %cst_138 {dimension_numbers = #tpu.dot_dimension_numbers<[1], [0], [0], [1], [0, 0, 1, 1], [], []>} : vector<8x16xf32>, vector<16x64xf32>, vector<8x64xf32> -> vector<8x64xf32>
    %517 = arith.addf %515, %516 : vector<8x64xf32>
    %518 = vector.extract_strided_slice %517 {offsets = [0, 0], sizes = [8, 48], strides = [1, 1]} : vector<8x64xf32> to vector<8x48xf32>
    %519 = arith.negf %518 : vector<8x48xf32>
    %520 = math.exp %519 : vector<8x48xf32>
    %cst_139 = arith.constant 1.000000e+00 : f32
    %521 = vector.broadcast %cst_139 : f32 to vector<8x48xf32>
    %522 = arith.addf %521, %520 : vector<8x48xf32>
    %523 = arith.divf %521, %522 : vector<8x48xf32>
    %524 = vector.extract_strided_slice %523 {offsets = [0, 0], sizes = [8, 16], strides = [1, 1]} : vector<8x48xf32> to vector<8x16xf32>
    %525 = vector.extract_strided_slice %523 {offsets = [0, 16], sizes = [8, 16], strides = [1, 1]} : vector<8x48xf32> to vector<8x16xf32>
    %526 = vector.extract_strided_slice %523 {offsets = [0, 32], sizes = [8, 16], strides = [1, 1]} : vector<8x48xf32> to vector<8x16xf32>
    %527 = vector.extract_strided_slice %517 {offsets = [0, 48], sizes = [8, 16], strides = [1, 1]} : vector<8x64xf32> to vector<8x16xf32>
    %528 = math.tanh %527 : vector<8x16xf32>
    %529 = arith.mulf %525, %511 : vector<8x16xf32>
    %530 = arith.mulf %524, %528 : vector<8x16xf32>
    %531 = arith.addf %529, %530 : vector<8x16xf32>
    %532 = math.tanh %531 : vector<8x16xf32>
    %533 = arith.mulf %526, %532 : vector<8x16xf32>
    %c48_140 = arith.constant 48 : index
    %c0_141 = arith.constant 0 : index
    %534 = vector.load %arg23[%c48_140, %c0_141] : memref<64x16xf32, #tpu.memory_space<vmem>>, vector<8x16xf32>
    tpu.vector_store %arg23[%c48_140, %c0_141], %533 {strides = array<i32>} : memref<64x16xf32, #tpu.memory_space<vmem>>, vector<8x16xf32>,
    %535 = vector.extract_strided_slice %391 {offsets = [0, 448], sizes = [8, 64], strides = [1, 1]} : vector<8x512xf32> to vector<8x64xf32>
    %cst_142 = arith.constant dense<0.000000e+00> : vector<8x64xf32>
    %536 = tpu.matmul %533, %392, %cst_142 {dimension_numbers = #tpu.dot_dimension_numbers<[1], [0], [0], [1], [0, 0, 1, 1], [], []>} : vector<8x16xf32>, vector<16x64xf32>, vector<8x64xf32> -> vector<8x64xf32>
    %537 = arith.addf %535, %536 : vector<8x64xf32>
    %538 = vector.extract_strided_slice %537 {offsets = [0, 0], sizes = [8, 48], strides = [1, 1]} : vector<8x64xf32> to vector<8x48xf32>
    %539 = arith.negf %538 : vector<8x48xf32>
    %540 = math.exp %539 : vector<8x48xf32>
    %cst_143 = arith.constant 1.000000e+00 : f32
    %541 = vector.broadcast %cst_143 : f32 to vector<8x48xf32>
    %542 = arith.addf %541, %540 : vector<8x48xf32>
    %543 = arith.divf %541, %542 : vector<8x48xf32>
    %544 = vector.extract_strided_slice %543 {offsets = [0, 0], sizes = [8, 16], strides = [1, 1]} : vector<8x48xf32> to vector<8x16xf32>
    %545 = vector.extract_strided_slice %543 {offsets = [0, 16], sizes = [8, 16], strides = [1, 1]} : vector<8x48xf32> to vector<8x16xf32>
    %546 = vector.extract_strided_slice %543 {offsets = [0, 32], sizes = [8, 16], strides = [1, 1]} : vector<8x48xf32> to vector<8x16xf32>
    %547 = vector.extract_strided_slice %537 {offsets = [0, 48], sizes = [8, 16], strides = [1, 1]} : vector<8x64xf32> to vector<8x16xf32>
    %548 = math.tanh %547 : vector<8x16xf32>
    %549 = arith.mulf %545, %531 : vector<8x16xf32>
    %550 = arith.mulf %544, %548 : vector<8x16xf32>
    %551 = arith.addf %549, %550 : vector<8x16xf32>
    %552 = math.tanh %551 : vector<8x16xf32>
    %553 = arith.mulf %546, %552 : vector<8x16xf32>
    %c56_144 = arith.constant 56 : index
    %c0_145 = arith.constant 0 : index
    %554 = vector.load %arg23[%c56_144, %c0_145] : memref<64x16xf32, #tpu.memory_space<vmem>>, vector<8x16xf32>
    tpu.vector_store %arg23[%c56_144, %c0_145], %553 {strides = array<i32>} : memref<64x16xf32, #tpu.memory_space<vmem>>, vector<8x16xf32>,
    %c0_146 = arith.constant 0 : index
    %c0_147 = arith.constant 0 : index
    %555 = vector.load %arg23[%c0_146, %c0_147] : memref<64x16xf32, #tpu.memory_space<vmem>>, vector<64x16xf32>
    %c0_148 = arith.constant 0 : index
    %c0_149 = arith.constant 0 : index
    %556 = vector.load %arg16[%c0_148, %c0_149] : memref<16x64xf32, #tpu.memory_space<vmem>>, vector<16x64xf32>
    %cst_150 = arith.constant dense<0.000000e+00> : vector<64x64xf32>
    %557 = tpu.matmul %555, %556, %cst_150 {dimension_numbers = #tpu.dot_dimension_numbers<[1], [0], [0], [1], [0, 0, 1, 1], [], []>} : vector<64x16xf32>, vector<16x64xf32>, vector<64x64xf32> -> vector<64x64xf32>
    %c0_151 = arith.constant 0 : index
    %c0_152 = arith.constant 0 : index
    %558 = vector.load %arg18[%c0_151, %c0_152] : memref<1x64xf32, #tpu.memory_space<vmem>>, vector<1x64xf32>
    %559 = vector.broadcast %558 : vector<1x64xf32> to vector<64x64xf32>
    %560 = arith.addf %557, %559 : vector<64x64xf32>
    %c0_153 = arith.constant 0 : index
    %c0_154 = arith.constant 0 : index
    %561 = vector.load %arg17[%c0_153, %c0_154] : memref<16x64xf32, #tpu.memory_space<vmem>>, vector<16x64xf32>
    %cst_155 = arith.constant 0.000000e+00 : f32
    %562 = vector.broadcast %cst_155 : f32 to vector<8x16xf32>
    %cst_156 = arith.constant 0.000000e+00 : f32
    %563 = vector.broadcast %cst_156 : f32 to vector<8x16xf32>
    %564 = vector.extract_strided_slice %560 {offsets = [0, 0], sizes = [8, 64], strides = [1, 1]} : vector<64x64xf32> to vector<8x64xf32>
    %cst_157 = arith.constant dense<0.000000e+00> : vector<8x64xf32>
    %565 = tpu.matmul %562, %561, %cst_157 {dimension_numbers = #tpu.dot_dimension_numbers<[1], [0], [0], [1], [0, 0, 1, 1], [], []>} : vector<8x16xf32>, vector<16x64xf32>, vector<8x64xf32> -> vector<8x64xf32>
    %566 = arith.addf %564, %565 : vector<8x64xf32>
    %567 = vector.extract_strided_slice %566 {offsets = [0, 0], sizes = [8, 48], strides = [1, 1]} : vector<8x64xf32> to vector<8x48xf32>
    %568 = arith.negf %567 : vector<8x48xf32>
    %569 = math.exp %568 : vector<8x48xf32>
    %cst_158 = arith.constant 1.000000e+00 : f32
    %570 = vector.broadcast %cst_158 : f32 to vector<8x48xf32>
    %571 = arith.addf %570, %569 : vector<8x48xf32>
    %572 = arith.divf %570, %571 : vector<8x48xf32>
    %573 = vector.extract_strided_slice %572 {offsets = [0, 0], sizes = [8, 16], strides = [1, 1]} : vector<8x48xf32> to vector<8x16xf32>
    %574 = vector.extract_strided_slice %572 {offsets = [0, 16], sizes = [8, 16], strides = [1, 1]} : vector<8x48xf32> to vector<8x16xf32>
    %575 = vector.extract_strided_slice %572 {offsets = [0, 32], sizes = [8, 16], strides = [1, 1]} : vector<8x48xf32> to vector<8x16xf32>
    %576 = vector.extract_strided_slice %566 {offsets = [0, 48], sizes = [8, 16], strides = [1, 1]} : vector<8x64xf32> to vector<8x16xf32>
    %577 = math.tanh %576 : vector<8x16xf32>
    %578 = arith.mulf %574, %563 : vector<8x16xf32>
    %579 = arith.mulf %573, %577 : vector<8x16xf32>
    %580 = arith.addf %578, %579 : vector<8x16xf32>
    %581 = math.tanh %580 : vector<8x16xf32>
    %582 = arith.mulf %575, %581 : vector<8x16xf32>
    %c0_159 = arith.constant 0 : index
    %c0_160 = arith.constant 0 : index
    %583 = vector.load %arg23[%c0_159, %c0_160] : memref<64x16xf32, #tpu.memory_space<vmem>>, vector<8x16xf32>
    tpu.vector_store %arg23[%c0_159, %c0_160], %582 {strides = array<i32>} : memref<64x16xf32, #tpu.memory_space<vmem>>, vector<8x16xf32>,
    %584 = vector.extract_strided_slice %560 {offsets = [8, 0], sizes = [8, 64], strides = [1, 1]} : vector<64x64xf32> to vector<8x64xf32>
    %cst_161 = arith.constant dense<0.000000e+00> : vector<8x64xf32>
    %585 = tpu.matmul %582, %561, %cst_161 {dimension_numbers = #tpu.dot_dimension_numbers<[1], [0], [0], [1], [0, 0, 1, 1], [], []>} : vector<8x16xf32>, vector<16x64xf32>, vector<8x64xf32> -> vector<8x64xf32>
    %586 = arith.addf %584, %585 : vector<8x64xf32>
    %587 = vector.extract_strided_slice %586 {offsets = [0, 0], sizes = [8, 48], strides = [1, 1]} : vector<8x64xf32> to vector<8x48xf32>
    %588 = arith.negf %587 : vector<8x48xf32>
    %589 = math.exp %588 : vector<8x48xf32>
    %cst_162 = arith.constant 1.000000e+00 : f32
    %590 = vector.broadcast %cst_162 : f32 to vector<8x48xf32>
    %591 = arith.addf %590, %589 : vector<8x48xf32>
    %592 = arith.divf %590, %591 : vector<8x48xf32>
    %593 = vector.extract_strided_slice %592 {offsets = [0, 0], sizes = [8, 16], strides = [1, 1]} : vector<8x48xf32> to vector<8x16xf32>
    %594 = vector.extract_strided_slice %592 {offsets = [0, 16], sizes = [8, 16], strides = [1, 1]} : vector<8x48xf32> to vector<8x16xf32>
    %595 = vector.extract_strided_slice %592 {offsets = [0, 32], sizes = [8, 16], strides = [1, 1]} : vector<8x48xf32> to vector<8x16xf32>
    %596 = vector.extract_strided_slice %586 {offsets = [0, 48], sizes = [8, 16], strides = [1, 1]} : vector<8x64xf32> to vector<8x16xf32>
    %597 = math.tanh %596 : vector<8x16xf32>
    %598 = arith.mulf %594, %580 : vector<8x16xf32>
    %599 = arith.mulf %593, %597 : vector<8x16xf32>
    %600 = arith.addf %598, %599 : vector<8x16xf32>
    %601 = math.tanh %600 : vector<8x16xf32>
    %602 = arith.mulf %595, %601 : vector<8x16xf32>
    %c8_163 = arith.constant 8 : index
    %c0_164 = arith.constant 0 : index
    %603 = vector.load %arg23[%c8_163, %c0_164] : memref<64x16xf32, #tpu.memory_space<vmem>>, vector<8x16xf32>
    tpu.vector_store %arg23[%c8_163, %c0_164], %602 {strides = array<i32>} : memref<64x16xf32, #tpu.memory_space<vmem>>, vector<8x16xf32>,
    %604 = vector.extract_strided_slice %560 {offsets = [16, 0], sizes = [8, 64], strides = [1, 1]} : vector<64x64xf32> to vector<8x64xf32>
    %cst_165 = arith.constant dense<0.000000e+00> : vector<8x64xf32>
    %605 = tpu.matmul %602, %561, %cst_165 {dimension_numbers = #tpu.dot_dimension_numbers<[1], [0], [0], [1], [0, 0, 1, 1], [], []>} : vector<8x16xf32>, vector<16x64xf32>, vector<8x64xf32> -> vector<8x64xf32>
    %606 = arith.addf %604, %605 : vector<8x64xf32>
    %607 = vector.extract_strided_slice %606 {offsets = [0, 0], sizes = [8, 48], strides = [1, 1]} : vector<8x64xf32> to vector<8x48xf32>
    %608 = arith.negf %607 : vector<8x48xf32>
    %609 = math.exp %608 : vector<8x48xf32>
    %cst_166 = arith.constant 1.000000e+00 : f32
    %610 = vector.broadcast %cst_166 : f32 to vector<8x48xf32>
    %611 = arith.addf %610, %609 : vector<8x48xf32>
    %612 = arith.divf %610, %611 : vector<8x48xf32>
    %613 = vector.extract_strided_slice %612 {offsets = [0, 0], sizes = [8, 16], strides = [1, 1]} : vector<8x48xf32> to vector<8x16xf32>
    %614 = vector.extract_strided_slice %612 {offsets = [0, 16], sizes = [8, 16], strides = [1, 1]} : vector<8x48xf32> to vector<8x16xf32>
    %615 = vector.extract_strided_slice %612 {offsets = [0, 32], sizes = [8, 16], strides = [1, 1]} : vector<8x48xf32> to vector<8x16xf32>
    %616 = vector.extract_strided_slice %606 {offsets = [0, 48], sizes = [8, 16], strides = [1, 1]} : vector<8x64xf32> to vector<8x16xf32>
    %617 = math.tanh %616 : vector<8x16xf32>
    %618 = arith.mulf %614, %600 : vector<8x16xf32>
    %619 = arith.mulf %613, %617 : vector<8x16xf32>
    %620 = arith.addf %618, %619 : vector<8x16xf32>
    %621 = math.tanh %620 : vector<8x16xf32>
    %622 = arith.mulf %615, %621 : vector<8x16xf32>
    %c16_167 = arith.constant 16 : index
    %c0_168 = arith.constant 0 : index
    %623 = vector.load %arg23[%c16_167, %c0_168] : memref<64x16xf32, #tpu.memory_space<vmem>>, vector<8x16xf32>
    tpu.vector_store %arg23[%c16_167, %c0_168], %622 {strides = array<i32>} : memref<64x16xf32, #tpu.memory_space<vmem>>, vector<8x16xf32>,
    %624 = vector.extract_strided_slice %560 {offsets = [24, 0], sizes = [8, 64], strides = [1, 1]} : vector<64x64xf32> to vector<8x64xf32>
    %cst_169 = arith.constant dense<0.000000e+00> : vector<8x64xf32>
    %625 = tpu.matmul %622, %561, %cst_169 {dimension_numbers = #tpu.dot_dimension_numbers<[1], [0], [0], [1], [0, 0, 1, 1], [], []>} : vector<8x16xf32>, vector<16x64xf32>, vector<8x64xf32> -> vector<8x64xf32>
    %626 = arith.addf %624, %625 : vector<8x64xf32>
    %627 = vector.extract_strided_slice %626 {offsets = [0, 0], sizes = [8, 48], strides = [1, 1]} : vector<8x64xf32> to vector<8x48xf32>
    %628 = arith.negf %627 : vector<8x48xf32>
    %629 = math.exp %628 : vector<8x48xf32>
    %cst_170 = arith.constant 1.000000e+00 : f32
    %630 = vector.broadcast %cst_170 : f32 to vector<8x48xf32>
    %631 = arith.addf %630, %629 : vector<8x48xf32>
    %632 = arith.divf %630, %631 : vector<8x48xf32>
    %633 = vector.extract_strided_slice %632 {offsets = [0, 0], sizes = [8, 16], strides = [1, 1]} : vector<8x48xf32> to vector<8x16xf32>
    %634 = vector.extract_strided_slice %632 {offsets = [0, 16], sizes = [8, 16], strides = [1, 1]} : vector<8x48xf32> to vector<8x16xf32>
    %635 = vector.extract_strided_slice %632 {offsets = [0, 32], sizes = [8, 16], strides = [1, 1]} : vector<8x48xf32> to vector<8x16xf32>
    %636 = vector.extract_strided_slice %626 {offsets = [0, 48], sizes = [8, 16], strides = [1, 1]} : vector<8x64xf32> to vector<8x16xf32>
    %637 = math.tanh %636 : vector<8x16xf32>
    %638 = arith.mulf %634, %620 : vector<8x16xf32>
    %639 = arith.mulf %633, %637 : vector<8x16xf32>
    %640 = arith.addf %638, %639 : vector<8x16xf32>
    %641 = math.tanh %640 : vector<8x16xf32>
    %642 = arith.mulf %635, %641 : vector<8x16xf32>
    %c24_171 = arith.constant 24 : index
    %c0_172 = arith.constant 0 : index
    %643 = vector.load %arg23[%c24_171, %c0_172] : memref<64x16xf32, #tpu.memory_space<vmem>>, vector<8x16xf32>
    tpu.vector_store %arg23[%c24_171, %c0_172], %642 {strides = array<i32>} : memref<64x16xf32, #tpu.memory_space<vmem>>, vector<8x16xf32>,
    %644 = vector.extract_strided_slice %560 {offsets = [32, 0], sizes = [8, 64], strides = [1, 1]} : vector<64x64xf32> to vector<8x64xf32>
    %cst_173 = arith.constant dense<0.000000e+00> : vector<8x64xf32>
    %645 = tpu.matmul %642, %561, %cst_173 {dimension_numbers = #tpu.dot_dimension_numbers<[1], [0], [0], [1], [0, 0, 1, 1], [], []>} : vector<8x16xf32>, vector<16x64xf32>, vector<8x64xf32> -> vector<8x64xf32>
    %646 = arith.addf %644, %645 : vector<8x64xf32>
    %647 = vector.extract_strided_slice %646 {offsets = [0, 0], sizes = [8, 48], strides = [1, 1]} : vector<8x64xf32> to vector<8x48xf32>
    %648 = arith.negf %647 : vector<8x48xf32>
    %649 = math.exp %648 : vector<8x48xf32>
    %cst_174 = arith.constant 1.000000e+00 : f32
    %650 = vector.broadcast %cst_174 : f32 to vector<8x48xf32>
    %651 = arith.addf %650, %649 : vector<8x48xf32>
    %652 = arith.divf %650, %651 : vector<8x48xf32>
    %653 = vector.extract_strided_slice %652 {offsets = [0, 0], sizes = [8, 16], strides = [1, 1]} : vector<8x48xf32> to vector<8x16xf32>
    %654 = vector.extract_strided_slice %652 {offsets = [0, 16], sizes = [8, 16], strides = [1, 1]} : vector<8x48xf32> to vector<8x16xf32>
    %655 = vector.extract_strided_slice %652 {offsets = [0, 32], sizes = [8, 16], strides = [1, 1]} : vector<8x48xf32> to vector<8x16xf32>
    %656 = vector.extract_strided_slice %646 {offsets = [0, 48], sizes = [8, 16], strides = [1, 1]} : vector<8x64xf32> to vector<8x16xf32>
    %657 = math.tanh %656 : vector<8x16xf32>
    %658 = arith.mulf %654, %640 : vector<8x16xf32>
    %659 = arith.mulf %653, %657 : vector<8x16xf32>
    %660 = arith.addf %658, %659 : vector<8x16xf32>
    %661 = math.tanh %660 : vector<8x16xf32>
    %662 = arith.mulf %655, %661 : vector<8x16xf32>
    %c32_175 = arith.constant 32 : index
    %c0_176 = arith.constant 0 : index
    %663 = vector.load %arg23[%c32_175, %c0_176] : memref<64x16xf32, #tpu.memory_space<vmem>>, vector<8x16xf32>
    tpu.vector_store %arg23[%c32_175, %c0_176], %662 {strides = array<i32>} : memref<64x16xf32, #tpu.memory_space<vmem>>, vector<8x16xf32>,
    %664 = vector.extract_strided_slice %560 {offsets = [40, 0], sizes = [8, 64], strides = [1, 1]} : vector<64x64xf32> to vector<8x64xf32>
    %cst_177 = arith.constant dense<0.000000e+00> : vector<8x64xf32>
    %665 = tpu.matmul %662, %561, %cst_177 {dimension_numbers = #tpu.dot_dimension_numbers<[1], [0], [0], [1], [0, 0, 1, 1], [], []>} : vector<8x16xf32>, vector<16x64xf32>, vector<8x64xf32> -> vector<8x64xf32>
    %666 = arith.addf %664, %665 : vector<8x64xf32>
    %667 = vector.extract_strided_slice %666 {offsets = [0, 0], sizes = [8, 48], strides = [1, 1]} : vector<8x64xf32> to vector<8x48xf32>
    %668 = arith.negf %667 : vector<8x48xf32>
    %669 = math.exp %668 : vector<8x48xf32>
    %cst_178 = arith.constant 1.000000e+00 : f32
    %670 = vector.broadcast %cst_178 : f32 to vector<8x48xf32>
    %671 = arith.addf %670, %669 : vector<8x48xf32>
    %672 = arith.divf %670, %671 : vector<8x48xf32>
    %673 = vector.extract_strided_slice %672 {offsets = [0, 0], sizes = [8, 16], strides = [1, 1]} : vector<8x48xf32> to vector<8x16xf32>
    %674 = vector.extract_strided_slice %672 {offsets = [0, 16], sizes = [8, 16], strides = [1, 1]} : vector<8x48xf32> to vector<8x16xf32>
    %675 = vector.extract_strided_slice %672 {offsets = [0, 32], sizes = [8, 16], strides = [1, 1]} : vector<8x48xf32> to vector<8x16xf32>
    %676 = vector.extract_strided_slice %666 {offsets = [0, 48], sizes = [8, 16], strides = [1, 1]} : vector<8x64xf32> to vector<8x16xf32>
    %677 = math.tanh %676 : vector<8x16xf32>
    %678 = arith.mulf %674, %660 : vector<8x16xf32>
    %679 = arith.mulf %673, %677 : vector<8x16xf32>
    %680 = arith.addf %678, %679 : vector<8x16xf32>
    %681 = math.tanh %680 : vector<8x16xf32>
    %682 = arith.mulf %675, %681 : vector<8x16xf32>
    %c40_179 = arith.constant 40 : index
    %c0_180 = arith.constant 0 : index
    %683 = vector.load %arg23[%c40_179, %c0_180] : memref<64x16xf32, #tpu.memory_space<vmem>>, vector<8x16xf32>
    tpu.vector_store %arg23[%c40_179, %c0_180], %682 {strides = array<i32>} : memref<64x16xf32, #tpu.memory_space<vmem>>, vector<8x16xf32>,
    %684 = vector.extract_strided_slice %560 {offsets = [48, 0], sizes = [8, 64], strides = [1, 1]} : vector<64x64xf32> to vector<8x64xf32>
    %cst_181 = arith.constant dense<0.000000e+00> : vector<8x64xf32>
    %685 = tpu.matmul %682, %561, %cst_181 {dimension_numbers = #tpu.dot_dimension_numbers<[1], [0], [0], [1], [0, 0, 1, 1], [], []>} : vector<8x16xf32>, vector<16x64xf32>, vector<8x64xf32> -> vector<8x64xf32>
    %686 = arith.addf %684, %685 : vector<8x64xf32>
    %687 = vector.extract_strided_slice %686 {offsets = [0, 0], sizes = [8, 48], strides = [1, 1]} : vector<8x64xf32> to vector<8x48xf32>
    %688 = arith.negf %687 : vector<8x48xf32>
    %689 = math.exp %688 : vector<8x48xf32>
    %cst_182 = arith.constant 1.000000e+00 : f32
    %690 = vector.broadcast %cst_182 : f32 to vector<8x48xf32>
    %691 = arith.addf %690, %689 : vector<8x48xf32>
    %692 = arith.divf %690, %691 : vector<8x48xf32>
    %693 = vector.extract_strided_slice %692 {offsets = [0, 0], sizes = [8, 16], strides = [1, 1]} : vector<8x48xf32> to vector<8x16xf32>
    %694 = vector.extract_strided_slice %692 {offsets = [0, 16], sizes = [8, 16], strides = [1, 1]} : vector<8x48xf32> to vector<8x16xf32>
    %695 = vector.extract_strided_slice %692 {offsets = [0, 32], sizes = [8, 16], strides = [1, 1]} : vector<8x48xf32> to vector<8x16xf32>
    %696 = vector.extract_strided_slice %686 {offsets = [0, 48], sizes = [8, 16], strides = [1, 1]} : vector<8x64xf32> to vector<8x16xf32>
    %697 = math.tanh %696 : vector<8x16xf32>
    %698 = arith.mulf %694, %680 : vector<8x16xf32>
    %699 = arith.mulf %693, %697 : vector<8x16xf32>
    %700 = arith.addf %698, %699 : vector<8x16xf32>
    %701 = math.tanh %700 : vector<8x16xf32>
    %702 = arith.mulf %695, %701 : vector<8x16xf32>
    %c48_183 = arith.constant 48 : index
    %c0_184 = arith.constant 0 : index
    %703 = vector.load %arg23[%c48_183, %c0_184] : memref<64x16xf32, #tpu.memory_space<vmem>>, vector<8x16xf32>
    tpu.vector_store %arg23[%c48_183, %c0_184], %702 {strides = array<i32>} : memref<64x16xf32, #tpu.memory_space<vmem>>, vector<8x16xf32>,
    %704 = vector.extract_strided_slice %560 {offsets = [56, 0], sizes = [8, 64], strides = [1, 1]} : vector<64x64xf32> to vector<8x64xf32>
    %cst_185 = arith.constant dense<0.000000e+00> : vector<8x64xf32>
    %705 = tpu.matmul %702, %561, %cst_185 {dimension_numbers = #tpu.dot_dimension_numbers<[1], [0], [0], [1], [0, 0, 1, 1], [], []>} : vector<8x16xf32>, vector<16x64xf32>, vector<8x64xf32> -> vector<8x64xf32>
    %706 = arith.addf %704, %705 : vector<8x64xf32>
    %707 = vector.extract_strided_slice %706 {offsets = [0, 0], sizes = [8, 48], strides = [1, 1]} : vector<8x64xf32> to vector<8x48xf32>
    %708 = arith.negf %707 : vector<8x48xf32>
    %709 = math.exp %708 : vector<8x48xf32>
    %cst_186 = arith.constant 1.000000e+00 : f32
    %710 = vector.broadcast %cst_186 : f32 to vector<8x48xf32>
    %711 = arith.addf %710, %709 : vector<8x48xf32>
    %712 = arith.divf %710, %711 : vector<8x48xf32>
    %713 = vector.extract_strided_slice %712 {offsets = [0, 0], sizes = [8, 16], strides = [1, 1]} : vector<8x48xf32> to vector<8x16xf32>
    %714 = vector.extract_strided_slice %712 {offsets = [0, 16], sizes = [8, 16], strides = [1, 1]} : vector<8x48xf32> to vector<8x16xf32>
    %715 = vector.extract_strided_slice %712 {offsets = [0, 32], sizes = [8, 16], strides = [1, 1]} : vector<8x48xf32> to vector<8x16xf32>
    %716 = vector.extract_strided_slice %706 {offsets = [0, 48], sizes = [8, 16], strides = [1, 1]} : vector<8x64xf32> to vector<8x16xf32>
    %717 = math.tanh %716 : vector<8x16xf32>
    %718 = arith.mulf %714, %700 : vector<8x16xf32>
    %719 = arith.mulf %713, %717 : vector<8x16xf32>
    %720 = arith.addf %718, %719 : vector<8x16xf32>
    %721 = math.tanh %720 : vector<8x16xf32>
    %722 = arith.mulf %715, %721 : vector<8x16xf32>
    %c56_187 = arith.constant 56 : index
    %c0_188 = arith.constant 0 : index
    %723 = vector.load %arg23[%c56_187, %c0_188] : memref<64x16xf32, #tpu.memory_space<vmem>>, vector<8x16xf32>
    tpu.vector_store %arg23[%c56_187, %c0_188], %722 {strides = array<i32>} : memref<64x16xf32, #tpu.memory_space<vmem>>, vector<8x16xf32>,
    %c0_189 = arith.constant 0 : index
    %c0_190 = arith.constant 0 : index
    %724 = vector.load %arg23[%c0_189, %c0_190] : memref<64x16xf32, #tpu.memory_space<vmem>>, vector<64x16xf32>
    %c0_191 = arith.constant 0 : index
    %c0_192 = arith.constant 0 : index
    %725 = vector.load %arg19[%c0_191, %c0_192] : memref<16x128xf32, #tpu.memory_space<vmem>>, vector<16x128xf32>
    %cst_193 = arith.constant dense<0.000000e+00> : vector<64x128xf32>
    %726 = tpu.matmul %724, %725, %cst_193 {dimension_numbers = #tpu.dot_dimension_numbers<[1], [0], [0], [1], [0, 0, 1, 1], [], []>} : vector<64x16xf32>, vector<16x128xf32>, vector<64x128xf32> -> vector<64x128xf32>
    %c0_194 = arith.constant 0 : index
    %c0_195 = arith.constant 0 : index
    %727 = vector.load %arg20[%c0_194, %c0_195] : memref<1x128xf32, #tpu.memory_space<vmem>>, vector<1x128xf32>
    %728 = vector.broadcast %727 : vector<1x128xf32> to vector<64x128xf32>
    %729 = arith.addf %726, %728 : vector<64x128xf32>
    %cst_196 = arith.constant 0.000000e+00 : f32
    %730 = vector.broadcast %cst_196 : f32 to vector<64x128xf32>
    %731 = arith.cmpf ogt, %729, %730 : vector<64x128xf32>
    %cst_197 = arith.constant 0.899999976 : f32
    %732 = vector.broadcast %cst_197 : f32 to vector<64x128xf32>
    %733 = arith.mulf %732, %729 : vector<64x128xf32>
    %734 = arith.select %731, %729, %733 : vector<64x128xi1>, vector<64x128xf32>
    %c0_198 = arith.constant 0 : index
    %c0_199 = arith.constant 0 : index
    %735 = vector.load %arg21[%c0_198, %c0_199] : memref<64x128xf32, #tpu.memory_space<vmem>>, vector<64x128xf32>
    tpu.vector_store %arg21[%c0_198, %c0_199], %734 {strides = array<i32>} : memref<64x128xf32, #tpu.memory_space<vmem>>, vector<64x128xf32>,
    return
  }
}

</mosaic_0001>

<bundles_post_ra>
// kernel: crae2_forward.1
= control target key start
LH: loop header
LB: loop body
LE: loop exit
PB: predicated region body
PF: predicated region fallthrough
CT: control target
= control target key end

     0   :  { %vm134_vm0 = vcmask 1043456   ;;  %vm85_vm1 = vcmask 31744   ;;  %s5942_s22 = smov 96   ;;  %s5943_s23 = smov 112   ;;  %v5944_v24 = vmov 0.0   ;;  %vm604_vm5 = vcmask 130048   ;;  %s7017_s1 = inlined_call_operand.vmem [shape: f32[4,48], index: 1, kind: input, shape index: {}]   ;;  %s7018_s0 = inlined_call_operand.vmem [shape: f32[128,4], index: 0, kind: input, shape index: {}]   ;;  %s7019_s3 = inlined_call_operand.vmem [shape: f32[16,32], index: 3, kind: input, shape index: {}]   ;;  %s7020_s2 = inlined_call_operand.vmem [shape: f32[1,16], index: 2, kind: input, shape index: {}]   ;;  %s7021_s4 = inlined_call_operand.vmem [shape: f32[8,32], index: 4, kind: input, shape index: {}]   ;;  %s7022_s5 = inlined_call_operand.vmem [shape: f32[1,32], index: 5, kind: input, shape index: {}]   ;;  %s7023_s6 = inlined_call_operand.vmem [shape: f32[8,32], index: 6, kind: input, shape index: {}]   ;;  %s7024_s7 = inlined_call_operand.vmem [shape: f32[8,32], index: 7, kind: input, shape index: {}]   ;;  %s7025_s8 = inlined_call_operand.vmem [shape: f32[1,32], index: 8, kind: input, shape index: {}]   ;;  %s7026_s9 = inlined_call_operand.vmem [shape: f32[64,8], index: 9, kind: input, shape index: {}]   ;;  %s7027_s11 = inlined_call_operand.vmem [shape: f32[8,64], index: 11, kind: input, shape index: {}]   ;;  %s7028_s13 = inlined_call_operand.vmem [shape: f32[64,512], index: 13, kind: input, shape index: {}]   ;;  %s7029_s10 = inlined_call_operand.vmem [shape: f32[1,8], index: 10, kind: input, shape index: {}]   ;;  %s7030_s12 = inlined_call_operand.vmem [shape: f32[1,64], index: 12, kind: input, shape index: {}]   ;;  %s7031_s14 = inlined_call_operand.vmem [shape: f32[16,64], index: 14, kind: input, shape index: {}]   ;;  %s7032_s15 = inlined_call_operand.vmem [shape: f32[1,512], index: 15, kind: input, shape index: {}]   ;;  %s7033_s16 = inlined_call_operand.vmem [shape: f32[16,64], index: 16, kind: input, shape index: {}]   ;;  %s7034_s17 = inlined_call_operand.vmem [shape: f32[16,64], index: 17, kind: input, shape index: {}]   ;;  %s7035_s18 = inlined_call_operand.vmem [shape: f32[1,64], index: 18, kind: input, shape index: {}]   ;;  %s7036_s19 = inlined_call_operand.vmem [shape: f32[16,128], index: 19, kind: input, shape index: {}]   ;;  %s7037_s20 = inlined_call_operand.vmem [shape: f32[1,128], index: 20, kind: input, shape index: {}]   ;;  %s7038_s21 = inlined_call_operand.vmem [shape: f32[64,128], index: 21, kind: output, shape index: {}]  }
   0x1   :  { %7041 = sst [smem:[#allocation5_spill]] %s7017_s1  ;;  %vm5945_vm6 = vmmov 0   ;;  %s5946_s30 = smov 104   ;;  %vm791_vm9 = vcmask 64512  }
   0x2   :  { %7042 = sst [smem:[#allocation6_spill]] %s7018_s0  ;;  %s7047_s26 = sld [smem:[#allocation5_spill]] }
   0x3   :  { %7043 = sst [smem:[#allocation7_spill]] %s7019_s3  ;;  %s7048_s28 = sld [smem:[#allocation6_spill]] }
   0x4   :  { %7044 = sst [smem:[#allocation8_spill]] %s7020_s2  ;;  %s7049_s29 = sld [smem:[#allocation7_spill]] }
   0x5   :  { %7045 = sst [smem:[#allocation9_spill]] %s7021_s4  ;;  %s7050_s25 = sld [smem:[#allocation8_spill]] }
   0x6   :  { %7046 = sst [smem:[#allocation10_spill]] %s7022_s5  ;;  %s7051_s2 = sld [smem:[#allocation9_spill]] }
   0x7   :  { %s7052_s4 = sld [smem:[#allocation10_spill]]  ;;  %s5947_s5 = smov 8  }
   0x8   :  { %v84_v0 = vld [vmem:[%s7047_s26] sm:$0xf]  ;;  %s5952_s24 = smov 24  }
   0x9   :  { %v68_v1 = vld [vmem:[%s7048_s28] sm:$0xff]  ;;  %v69_v2 = vld [vmem:[%s7048_s28 + $0x8] sm:$0xff]  ;;  %5250 = vmatprep.subr.msk.mxu0 %vm134_vm0, %v84_v0  ;;  %v70_v3 = vld [vmem:[%s7048_s28 + $0x10] sm:$0xff] }
   0xa   :  { %5252 = vmatprep.mubr.msk.f32.mxu0 %vm85_vm1, %v68_v1  ;;  %5251 = vmatpush3.msk.msra.mxu0 %vm134_vm0, %v84_v0  ;;  %v71_v4 = vld [vmem:[%s7048_s28 + $0x18] sm:$0xff]  ;;  %v72_v5 = vld [vmem:[%s7048_s28 + $0x20] sm:$0xff]  ;;  %v73_v6 = vld [vmem:[%s7048_s28 + $0x28] sm:$0xff] }
   0xb   :  { %5253 = vmatmul.mubr.msk.f32.vlgmr.msra.gmra.mrb[0].mxu0 %vm85_vm1, %v69_v2  ;;  %v74_v7 = vld [vmem:[%s7048_s28 + $0x30] sm:$0xff]  ;;  %v595_v8 = vld [vmem:[%s7049_s29] sm:$0xff]  ;;  %v596_v9 = vld [vmem:[%s7049_s29 + $0x8] sm:$0xff] }
   0xc   :  { %5255 = vmatprep.mubr.msk.f32.mxu0 %vm85_vm1, %v70_v3  ;;  %v5566_v10 = vpack.c.bf16 %v596_v9, %v595_v8  ;;  %v75_v11 = vld [vmem:[%s7048_s28 + $0x38] sm:$0xff]  ;;  %v76_v12 = vld [vmem:[%s7048_s28 + $0x40] sm:$0xff]  ;;  %v77_v13 = vld [vmem:[%s7048_s28 + $0x48] sm:$0xff] }
   0xd   :  { %v78_v14 = vld [vmem:[%s7048_s28 + $0x50] sm:$0xff]  ;;  %v79_v15 = vld [vmem:[%s7048_s28 + $0x58] sm:$0xff]  ;;  %v80_v16 = vld [vmem:[%s7048_s28 + $0x60] sm:$0xff] }
   0xe   :  { %5567 = vmatprep.subr.bf16.mxu0 %v5566_v10  ;;  %5670 = vmatprep.subr.bf16.mxu1 %v5566_v10  ;;  %v81_v17 = vld [vmem:[%s7048_s28 + $0x68] sm:$0xff]  ;;  %v82_v19 = vld [vmem:[%s7048_s28 + $0x70] sm:$0xff]  ;;  %v83_v21 = vld [vmem:[%s7048_s28 + $0x78] sm:$0xff] }
   0xf   :  { %5256 = vmatmul.mubr.msk.f32.gmra.mrb[2].mxu0 %vm85_vm1, %v71_v4  ;;  %5671 = vmatpush3.bf16.msra.mxu1 %v5566_v10  ;;  %v6165_v32 = vld [vmem:[%s7050_s25] ss:$0 sm:$0xff]  ;;  %s5950_s25 = smov 32  }
  0x10   :  { %5258 = vmatprep.mubr.msk.f32.mxu0 %vm85_vm1, %v72_v5  ;;  %5569 = vmatpush3.bf16.msra.mxu0 %v5566_v10  ;;  %v6179_v52 = vld [vmem:[%s7051_s2] sm:$0xff]  ;;  %s5953_s2 = smov 40  }
  0x11   :  { %5304 = vmatprep.subr.mxu0 %v5944_v24  ;;  %5319 = vmatprep.subr.mxu1 %v5944_v24  ;;  %v6211_v61 = vld [vmem:[%s7052_s4] ss:$0 sm:$0xff]  ;;  %s5954_s4 = smov 80  }
  0x13   :  { %5259 = vmatmul.mubr.msk.f32.gmra.mrb[4].mxu0 %vm85_vm1, %v73_v6 }
  0x14   :  { %5261 = vmatprep.mubr.msk.f32.mxu0 %vm85_vm1, %v74_v7 }
  0x17   :  { %5262 = vmatmul.mubr.msk.f32.gmra.mrb[6].mxu0 %vm85_vm1, %v75_v11 }
  0x18   :  { %5264 = vmatprep.mubr.msk.f32.mxu0 %vm85_vm1, %v76_v12 }
  0x1b   :  { %5265 = vmatmul.mubr.msk.f32.gmra.mrb[8].mxu0 %vm85_vm1, %v77_v13 }
  0x1c   :  { %5267 = vmatprep.mubr.msk.f32.mxu0 %vm85_vm1, %v78_v14 }
  0x1f   :  { %5268 = vmatmul.mubr.msk.f32.gmra.mrb[10].mxu0 %vm85_vm1, %v79_v15 }
  0x20   :  { %5270 = vmatprep.mubr.msk.f32.mxu0 %vm85_vm1, %v80_v16 }
  0x23   :  { %5271 = vmatmul.mubr.msk.f32.gmra.mrb[12].mxu0 %vm85_vm1, %v81_v17 }
  0x24   :  { %5273 = vmatprep.mubr.msk.f32.mxu0 %vm85_vm1, %v82_v19 }
  0x27   :  { %5274 = vmatmul.mubr.msk.f32.gmra.mrb[14].mxu0 %vm85_vm1, %v83_v21 }
  0xde   :  { %v5254_v18 = vpop.f32.mrb[0].mxu0 }
  0xdf   :  { %366 = vrot.lane.b32.xlu1 %v5254_v18, %s5942_s22  ;;  %430 = vrot.lane.b32.xlu0 %v5254_v18, %s5943_s23  ;;  %v204_v20 = vpop.f32.mrb[1].mxu0 }
  0xe2   :  { %v6141_v22 = vpop.f32.mrb[2].mxu0 }
  0xe3   :  { %v6143_v23 = vpop.f32.mrb[3].mxu0 }
  0xe4   :  { %368 = vrot.lane.b32.xlu1 %v6143_v23, %s5942_s22  ;;  %432 = vrot.lane.b32.xlu0 %v6143_v23, %s5943_s23 }
  0xe6   :  { %v6154_v25 = vpop.f32.mrb[4].mxu0 }
  0xe7   :  { %v6156_v26 = vpop.f32.mrb[5].mxu0 }
  0xe8   :  { %370 = vrot.lane.b32.xlu1 %v6141_v22, %s5942_s22  ;;  %428 = vrot.lane.b32.xlu0 %v204_v20, %s5943_s23 }
  0xea   :  { %v6158_v27 = vpop.f32.mrb[6].mxu0 }
  0xeb   :  { %v6160_v28 = vpop.f32.mrb[7].mxu0 }
  0xee   :  { %v6192_v53 = vpop.f32.mrb[8].mxu0 }
  0xef   :  { %v6194_v54 = vpop.f32.mrb[9].mxu0 }
  0xf2   :  { %v6196_v55 = vpop.f32.mrb[10].mxu0 }
  0xf3   :  { %v6198_v56 = vpop.f32.mrb[11].mxu0 }
  0xf6   :  { %v6200_v57 = vpop.f32.mrb[12].mxu0 }
  0xf7   :  { %v6202_v58 = vpop.f32.mrb[13].mxu0 }
  0xfa   :  { %v6204_v59 = vpop.f32.mrb[14].mxu0 }
  0xfb   :  { %v6206_v60 = vpop.f32.mrb[15].mxu0 }
 0x151   :  { %v367_v29 = vpop.permute.xlu1 %366  ;;  %v431_v30 = vpop.permute.xlu0 %430 }
 0x152   :  { %v477_v31 = vadd.f32 %v431_v30, %v204_v20 }
 0x156   :  { %v369_v33 = vpop.permute.xlu1 %368  ;;  %v433_v34 = vpop.permute.xlu0 %432 }
 0x157   :  { %v493_v35 = vadd.f32 %v477_v31, %v369_v33  ;;  %v478_v37 = vadd.f32 %v5254_v18, %v433_v34 }
 0x159   :  { %v516_v36 = vadd.f32 %v6165_v32, %v493_v35 }
 0x15a   :  { %v371_v38 = vpop.permute.xlu1 %370  ;;  %v429_v39 = vpop.permute.xlu0 %428 }
 0x15b   :  { %v494_v40 = vadd.f32 %v478_v37, %v371_v38  ;;  %v492_v41 = vadd.f32 %v429_v39, %v367_v29  ;;  %v548_v42 = vmul.f32 0.9, %v516_v36  ;;  %vm532_vm2 = vcmp.gt.f32.partialorder %v516_v36, 0.0 }
 0x15d   :  { %v517_v43 = vadd.f32 %v6165_v32, %v494_v40  ;;  %v515_v44 = vadd.f32 %v6165_v32, %v492_v41  ;;  %v564_v47 = vsel %vm532_vm2, %v516_v36, %v548_v42 }
 0x15f   :  { %vm533_vm3 = vcmp.gt.f32.partialorder %v517_v43, 0.0  ;;  %v549_v45 = vmul.f32 0.9, %v517_v43  ;;  %vm531_vm4 = vcmp.gt.f32.partialorder %v515_v44, 0.0  ;;  %v547_v46 = vmul.f32 0.9, %v515_v44 }
 0x161   :  { %v6170_v48 = vsel %vm533_vm3, %v517_v43, %v549_v45  ;;  %v6172_v49 = vsel %vm531_vm4, %v515_v44, %v547_v46 }
 0x162   :  { %v580_v50 = vmax.f32 %v564_v47, %v6170_v48  ;;  %v579_v51 = vmax.f32 %v6172_v49, %v564_v47 }
 0x164   :  { %5280 = vmatprep.mubr.msk.f32.mxu0 %vm604_vm5, %v579_v51 }
 0x165   :  { %5281 = vmatmul.mubr.msk.f32.vlgmr.msra.gmra.mrb[16].mxu0 %vm604_vm5, %v580_v50 }
 0x166   :  { %5305 = vmatpush3.msra.mxu0 %v6179_v52  ;;  %5306 = vmatprep.mubr.msk.f32.mxu0 %vm5945_vm6, %v5944_v24 }
 0x167   :  { %5309 = vmatprep.subr.mxu0 %v5944_v24 }
 0x169   :  { %5307 = vmatmul.mubr.f32.vlgmr.msra.gmra.mrb[18].mxu0 %v5944_v24 }
 0x16a   :  { %5310 = vmatpush3.msra.mxu0 %v6179_v52  ;;  %5311 = vmatprep.mubr.msk.f32.mxu0 %vm5945_vm6, %v5944_v24 }
 0x16b   :  { %5314 = vmatprep.subr.mxu0 %v5944_v24 }
 0x238   :  { %v5282_v62 = vpop.f32.mrb[16].mxu0 }
 0x239   :  { %v719_v63 = vpop.f32.mrb[17].mxu0 }
 0x23a   :  { %v720_v0 = vadd.f32 %v6211_v61, %v719_v63 }
 0x23c   :  { %v861_v1 = vpop.f32.mrb[18].mxu0 }
 0x23d   :  { %v865_v2 = vadd.f32 %v861_v1, %v720_v0  ;;  %v5308_v3 = vpop.f32.mrb[19].mxu0 }
 0x23f   :  { %5686 = vtanh.f32 %v865_v2  ;;  %v5002_v5 = vmul.f32 -1.442695, %v865_v2 }
 0x241   :  { %5688 = vpow2.f32 %v5002_v5 }
 0x249   :  { %v5687_v4 = vpop.eup %5686 }
 0x24a   :  { %875 = vrot.lane.b32.xlu0 %v5687_v4, %s5946_s30 }
 0x24b   :  { %v5689_v6 = vpop.eup %5688 }
 0x24c   :  { %v869_v7 = vadd.f32 1.0, %v5689_v6 }
 0x24e   :  { %5690 = vrcp.f32 %v869_v7 }
 0x258   :  { %v5691_v8 = vpop.eup %5690 }
 0x259   :  { %v873_v11 = vmul.f32 0.0, %v5691_v8 }
 0x2bc   :  { %v876_v9 = vpop.permute.xlu0 %875 }
 0x2bd   :  { %v878_v10 = vmul.f32 %v5691_v8, %v876_v9 }
 0x2bf   :  { %880 = vrot.lane.b32.xlu1 %v878_v10, %s5947_s5 }
 0x2c3   :  { %434 = vrot.lane.b32.xlu1 %v6141_v22, %s5943_s23 }
 0x2c7   :  { %372 = vrot.lane.b32.xlu1 %v6156_v26, %s5942_s22 }
 0x331   :  { %v881_v12 = vpop.permute.xlu1 %880 }
 0x332   :  { %v883_v13 = vadd.f32 %v881_v12, %v873_v11 }
 0x334   :  { %5692 = vtanh.f32 %v883_v13 }
 0x335   :  { %v435_v14 = vpop.permute.xlu1 %434 }
 0x336   :  { %v479_v15 = vadd.f32 %v435_v14, %v6143_v23 }
 0x339   :  { %v373_v16 = vpop.permute.xlu1 %372 }
 0x33a   :  { %v495_v17 = vadd.f32 %v479_v15, %v373_v16 }
 0x33c   :  { %v518_v18 = vadd.f32 %v6165_v32, %v495_v17 }
 0x33e   :  { %v5693_v19 = vpop.eup %5692  ;;  %vm534_vm7 = vcmp.gt.f32.partialorder %v518_v18, 0.0  ;;  %v550_v20 = vmul.f32 0.9, %v518_v18 }
 0x33f   :  { %886 = vrot.lane.b32.xlu0 %v5693_v19, %s5947_s5 }
 0x340   :  { %v566_v21 = vsel %vm534_vm7, %v518_v18, %v550_v20  ;;  %vm1956_vm7 = vcmask 130112  }
 0x341   :  { %v581_v29 = vmax.f32 %v6170_v48, %v566_v21 }
 0x343   :  { %5283 = vmatprep.mubr.msk.f32.mxu1 %vm604_vm5, %v581_v29  ;;  %436 = vrot.lane.b32.xlu0 %v6156_v26, %s5943_s23 }
 0x347   :  { %374 = vrot.lane.b32.xlu0 %v6154_v25, %s5942_s22 }
 0x3b1   :  { %v887_v23 = vpop.permute.xlu0 %886 }
 0x3b2   :  { %v889_v30 = vmul.f32 %v5691_v8, %v887_v23 }
 0x3b4   :  { %891 = vrot.lane.b32.xlu1 %v889_v30, %s5943_s23 }
 0x3b5   :  { %v437_v31 = vpop.permute.xlu0 %436 }
 0x3b6   :  { %v480_v33 = vadd.f32 %v6141_v22, %v437_v31 }
 0x3b9   :  { %v375_v34 = vpop.permute.xlu0 %374 }
 0x3ba   :  { %v496_v35 = vadd.f32 %v480_v33, %v375_v34 }
 0x3bc   :  { %v519_v36 = vadd.f32 %v6165_v32, %v496_v35 }
 0x3be   :  { %vm535_vm8 = vcmp.gt.f32.partialorder %v519_v36, 0.0  ;;  %v551_v37 = vmul.f32 0.9, %v519_v36 }
 0x3c0   :  { %v567_v38 = vsel %vm535_vm8, %v519_v36, %v551_v37  ;;  %vm2057_vm8 = vcmask 195712  }
 0x3c1   :  { %v582_v39 = vmax.f32 %v566_v21, %v567_v38 }
 0x3c3   :  { %5284 = vmatmul.mubr.msk.f32.vlgmr.msra.gmra.mrb[0].mxu1 %vm604_vm5, %v582_v39 }
 0x3c4   :  { %5320 = vmatpush3.msra.mxu1 %v6179_v52 }
 0x3c5   :  { %5329 = vmatprep.subr.mxu1 %v5944_v24 }
 0x426   :  { %v892_v40 = vpop.permute.xlu1 %891 }
 0x427   :  { %894 = vst.msk [vmem:[#allocation2] sm:$0xff] %vm791_vm9, %v892_v40  ;;  %5312 = vmatmul.mubr.msk.f32.vlgmr.msra.gmra.mrb[20].mxu0 %vm791_vm9, %v892_v40 }
 0x428   :  { %5315 = vmatpush3.msra.mxu0 %v6179_v52  ;;  %5316 = vmatprep.mubr.msk.f32.mxu0 %vm5945_vm6, %v5944_v24 }
 0x429   :  { %5324 = vmatprep.subr.mxu0 %v5944_v24 }
 0x496   :  { %v5285_v22 = vpop.f32.mrb[0].mxu1 }
 0x497   :  { %v728_v41 = vpop.f32.mrb[1].mxu1 }
 0x498   :  { %v729_v42 = vadd.f32 %v6211_v61, %v728_v41 }
 0x4fa   :  { %v963_v43 = vpop.f32.mrb[20].mxu0 }
 0x4fb   :  { %v967_v44 = vadd.f32 %v963_v43, %v729_v42  ;;  %v5313_v45 = vpop.f32.mrb[21].mxu0 }
 0x4fd   :  { %5694 = vtanh.f32 %v967_v44  ;;  %v5004_v47 = vmul.f32 -1.442695, %v967_v44 }
 0x4ff   :  { %5696 = vpow2.f32 %v5004_v47 }
 0x507   :  { %v5695_v46 = vpop.eup %5694 }
 0x508   :  { %977 = vrot.lane.b32.xlu0 %v5695_v46, %s5946_s30 }
 0x509   :  { %v5697_v48 = vpop.eup %5696 }
 0x50a   :  { %v971_v50 = vadd.f32 1.0, %v5697_v48 }
 0x50c   :  { %5698 = vrcp.f32 %v971_v50 }
 0x516   :  { %v5699_v51 = vpop.eup %5698 }
 0x517   :  { %v975_v0 = vmul.f32 %v5699_v51, %v883_v13 }
 0x57a   :  { %v978_v62 = vpop.permute.xlu0 %977 }
 0x57b   :  { %v980_v63 = vmul.f32 %v5699_v51, %v978_v62 }
 0x57d   :  { %982 = vrot.lane.b32.xlu1 %v980_v63, %s5947_s5 }
 0x581   :  { %438 = vrot.lane.b32.xlu1 %v6154_v25, %s5943_s23 }
 0x585   :  { %376 = vrot.lane.b32.xlu1 %v6160_v28, %s5942_s22 }
 0x5ef   :  { %v983_v1 = vpop.permute.xlu1 %982 }
 0x5f0   :  { %v985_v2 = vadd.f32 %v983_v1, %v975_v0 }
 0x5f2   :  { %5700 = vtanh.f32 %v985_v2 }
 0x5f3   :  { %v439_v3 = vpop.permute.xlu1 %438 }
 0x5f4   :  { %v481_v4 = vadd.f32 %v439_v3, %v6156_v26 }
 0x5f7   :  { %v377_v5 = vpop.permute.xlu1 %376 }
 0x5f8   :  { %v497_v6 = vadd.f32 %v481_v4, %v377_v5 }
 0x5fa   :  { %v520_v7 = vadd.f32 %v6165_v32, %v497_v6 }
 0x5fc   :  { %v5701_v8 = vpop.eup %5700  ;;  %vm536_vm10 = vcmp.gt.f32.partialorder %v520_v7, 0.0  ;;  %v552_v9 = vmul.f32 0.9, %v520_v7 }
 0x5fd   :  { %988 = vrot.lane.b32.xlu0 %v5701_v8, %s5947_s5 }
 0x5fe   :  { %v568_v10 = vsel %vm536_vm10, %v520_v7, %v552_v9  ;;  %vm2163_vm10 = vcmask 261312  }
 0x5ff   :  { %v583_v11 = vmax.f32 %v567_v38, %v568_v10 }
 0x601   :  { %5286 = vmatprep.mubr.msk.f32.mxu1 %vm604_vm5, %v583_v11  ;;  %440 = vrot.lane.b32.xlu0 %v6160_v28, %s5943_s23 }
 0x605   :  { %378 = vrot.lane.b32.xlu0 %v6158_v27, %s5942_s22 }
 0x66f   :  { %v989_v26 = vpop.permute.xlu0 %988 }
 0x670   :  { %v991_v12 = vmul.f32 %v5699_v51, %v989_v26 }
 0x672   :  { %993 = vrot.lane.b32.xlu1 %v991_v12, %s5943_s23 }
 0x673   :  { %v441_v13 = vpop.permute.xlu0 %440 }
 0x674   :  { %v482_v14 = vadd.f32 %v6154_v25, %v441_v13 }
 0x677   :  { %v379_v15 = vpop.permute.xlu0 %378 }
 0x678   :  { %v498_v16 = vadd.f32 %v482_v14, %v379_v15 }
 0x67a   :  { %v521_v17 = vadd.f32 %v6165_v32, %v498_v16 }
 0x67c   :  { %vm537_vm11 = vcmp.gt.f32.partialorder %v521_v17, 0.0  ;;  %v553_v18 = vmul.f32 0.9, %v521_v17 }
 0x67e   :  { %v569_v19 = vsel %vm537_vm11, %v521_v17, %v553_v18  ;;  %vm2268_vm11 = vcmask 326912  }
 0x67f   :  { %v584_v20 = vmax.f32 %v568_v10, %v569_v19 }
 0x681   :  { %5287 = vmatmul.mubr.msk.f32.gmra.mrb[2].mxu1 %vm604_vm5, %v584_v20 }
 0x6e4   :  { %v994_v21 = vpop.permute.xlu1 %993 }
 0x6e5   :  { %996 = vst.msk [vmem:[#allocation2 + $0x8] sm:$0xff] %vm791_vm9, %v994_v21  ;;  %5317 = vmatmul.mubr.msk.f32.vlgmr.msra.gmra.mrb[22].mxu0 %vm791_vm9, %v994_v21 }
 0x6e6   :  { %5325 = vmatpush3.msra.mxu0 %v6179_v52  ;;  %5326 = vmatprep.mubr.msk.f32.mxu0 %vm5945_vm6, %v5944_v24 }
 0x6e7   :  { %5334 = vmatprep.subr.mxu0 %v5944_v24 }
 0x754   :  { %v5288_v25 = vpop.f32.mrb[2].mxu1 }
 0x755   :  { %v737_v29 = vpop.f32.mrb[3].mxu1 }
 0x756   :  { %v738_v23 = vadd.f32 %v6211_v61, %v737_v29 }
 0x7b8   :  { %v1065_v30 = vpop.f32.mrb[22].mxu0 }
 0x7b9   :  { %v1069_v31 = vadd.f32 %v1065_v30, %v738_v23  ;;  %v5318_v33 = vpop.f32.mrb[23].mxu0 }
 0x7bb   :  { %5702 = vtanh.f32 %v1069_v31  ;;  %v5006_v35 = vmul.f32 -1.442695, %v1069_v31 }
 0x7bd   :  { %5704 = vpow2.f32 %v5006_v35 }
 0x7c5   :  { %v5703_v34 = vpop.eup %5702 }
 0x7c6   :  { %1079 = vrot.lane.b32.xlu0 %v5703_v34, %s5946_s30 }
 0x7c7   :  { %v5705_v36 = vpop.eup %5704 }
 0x7c8   :  { %v1073_v37 = vadd.f32 1.0, %v5705_v36 }
 0x7ca   :  { %5706 = vrcp.f32 %v1073_v37 }
 0x7d4   :  { %v5707_v38 = vpop.eup %5706 }
 0x7d5   :  { %v1077_v22 = vmul.f32 %v5707_v38, %v985_v2 }
 0x838   :  { %v1080_v39 = vpop.permute.xlu0 %1079 }
 0x839   :  { %v1082_v40 = vmul.f32 %v5707_v38, %v1080_v39 }
 0x83b   :  { %1084 = vrot.lane.b32.xlu1 %v1082_v40, %s5947_s5 }
 0x83f   :  { %442 = vrot.lane.b32.xlu1 %v6158_v27, %s5943_s23 }
 0x843   :  { %380 = vrot.lane.b32.xlu1 %v6194_v54, %s5942_s22 }
 0x847   :  { %446 = vrot.lane.b32.xlu1 %v6192_v53, %s5943_s23 }
 0x84b   :  { %384 = vrot.lane.b32.xlu1 %v6198_v56, %s5942_s22 }
 0x84f   :  { %450 = vrot.lane.b32.xlu1 %v6196_v55, %s5943_s23 }
 0x853   :  { %388 = vrot.lane.b32.xlu1 %v6202_v58, %s5942_s22 }
 0x857   :  { %454 = vrot.lane.b32.xlu1 %v6200_v57, %s5943_s23 }
 0x85b   :  { %392 = vrot.lane.b32.xlu1 %v6206_v60, %s5942_s22 }
 0x85f   :  { %458 = vrot.lane.b32.xlu1 %v6204_v59, %s5943_s23 }
 0x8ad   :  { %v1085_v41 = vpop.permute.xlu1 %1084 }
 0x8ae   :  { %v6287_v42 = vadd.f32 %v1085_v41, %v1077_v22 }
 0x8b0   :  { %5708 = vtanh.f32 %v6287_v42 }
 0x8b1   :  { %v443_v43 = vpop.permute.xlu1 %442 }
 0x8b2   :  { %v483_v44 = vadd.f32 %v443_v43, %v6160_v28 }
 0x8b5   :  { %v381_v45 = vpop.permute.xlu1 %380 }
 0x8b6   :  { %v499_v46 = vadd.f32 %v483_v44, %v381_v45 }
 0x8b8   :  { %v522_v47 = vadd.f32 %v6165_v32, %v499_v46 }
 0x8b9   :  { %v447_v28 = vpop.permute.xlu1 %446 }
 0x8ba   :  { %v5709_v48 = vpop.eup %5708  ;;  %vm538_vm12 = vcmp.gt.f32.partialorder %v522_v47, 0.0  ;;  %v554_v50 = vmul.f32 0.9, %v522_v47  ;;  %v485_v2 = vadd.f32 %v447_v28, %v6194_v54 }
 0x8bb   :  { %1090 = vrot.lane.b32.xlu0 %v5709_v48, %s5947_s5 }
 0x8bc   :  { %v570_v51 = vsel %vm538_vm12, %v522_v47, %v554_v50  ;;  %vm2373_vm12 = vcmask 392512  }
 0x8bd   :  { %v585_v62 = vmax.f32 %v569_v19, %v570_v51  ;;  %v385_v63 = vpop.permute.xlu1 %384 }
 0x8be   :  { %v501_v4 = vadd.f32 %v485_v2, %v385_v63 }
 0x8bf   :  { %5289 = vmatprep.mubr.msk.f32.mxu1 %vm604_vm5, %v585_v62  ;;  %444 = vrot.lane.b32.xlu0 %v6194_v54, %s5943_s23 }
 0x8c0   :  { %v524_v7 = vadd.f32 %v6165_v32, %v501_v4 }
 0x8c1   :  { %v451_v0 = vpop.permute.xlu1 %450 }
 0x8c2   :  { %v487_v10 = vadd.f32 %v451_v0, %v6198_v56  ;;  %v556_v26 = vmul.f32 0.9, %v524_v7  ;;  %vm540_vm13 = vcmp.gt.f32.partialorder %v524_v7, 0.0 }
 0x8c3   :  { %382 = vrot.lane.b32.xlu0 %v6192_v53, %s5942_s22 }
 0x8c4   :  { %v572_v15 = vsel %vm540_vm13, %v524_v7, %v556_v26  ;;  %vm2478_vm13 = vcmask 458112  }
 0x8c5   :  { %v389_v5 = vpop.permute.xlu1 %388 }
 0x8c6   :  { %v503_v12 = vadd.f32 %v487_v10, %v389_v5 }
 0x8c7   :  { %448 = vrot.lane.b32.xlu0 %v6198_v56, %s5943_s23 }
 0x8c8   :  { %v526_v16 = vadd.f32 %v6165_v32, %v503_v12 }
 0x8c9   :  { %v455_v11 = vpop.permute.xlu1 %454 }
 0x8ca   :  { %v489_v21 = vadd.f32 %v455_v11, %v6202_v58  ;;  %v558_v29 = vmul.f32 0.9, %v526_v16  ;;  %vm542_vm15 = vcmp.gt.f32.partialorder %v526_v16, 0.0 }
 0x8cb   :  { %386 = vrot.lane.b32.xlu0 %v6196_v55, %s5942_s22 }
 0x8cf   :  { %452 = vrot.lane.b32.xlu0 %v6202_v58, %s5943_s23 }
 0x8d3   :  { %390 = vrot.lane.b32.xlu0 %v6200_v57, %s5942_s22 }
 0x8d7   :  { %456 = vrot.lane.b32.xlu0 %v6206_v60, %s5943_s23 }
 0x8db   :  { %394 = vrot.lane.b32.xlu0 %v6204_v59, %s5942_s22 }
 0x92d   :  { %v1091_v1 = vpop.permute.xlu0 %1090 }
 0x92e   :  { %v1093_v3 = vmul.f32 %v5707_v38, %v1091_v1 }
 0x930   :  { %1095 = vrot.lane.b32.xlu0 %v1093_v3, %s5943_s23 }
 0x931   :  { %v445_v6 = vpop.permute.xlu0 %444 }
 0x932   :  { %v484_v8 = vadd.f32 %v6158_v27, %v445_v6  ;;  %v393_v27 = vpop.permute.xlu1 %392 }
 0x933   :  { %v505_v23 = vadd.f32 %v489_v21, %v393_v27 }
 0x935   :  { %v383_v9 = vpop.permute.xlu0 %382  ;;  %v528_v34 = vadd.f32 %v6165_v32, %v505_v23 }
 0x936   :  { %v500_v59 = vadd.f32 %v484_v8, %v383_v9  ;;  %v459_v58 = vpop.permute.xlu1 %458 }
 0x937   :  { %v560_v22 = vmul.f32 0.9, %v528_v34  ;;  %v491_v41 = vadd.f32 %v459_v58, %v6206_v60  ;;  %vm544_vm1 = vcmp.gt.f32.partialorder %v528_v34, 0.0 }
 0x938   :  { %v523_v13 = vadd.f32 %v6165_v32, %v500_v59 }
 0x939   :  { %v449_v54 = vpop.permute.xlu0 %448  ;;  %v576_v46 = vsel %vm544_vm1, %v528_v34, %v560_v22 }
 0x93a   :  { %vm539_vm14 = vcmp.gt.f32.partialorder %v523_v13, 0.0  ;;  %v555_v14 = vmul.f32 0.9, %v523_v13  ;;  %v486_v18 = vadd.f32 %v6192_v53, %v449_v54  ;;  %v574_v53 = vsel %vm542_vm15, %v526_v16, %v558_v29 }
 0x93b   :  { %vm2601_vm15 = vcmask 523264  }
 0x93c   :  { %v571_v17 = vsel %vm539_vm14, %v523_v13, %v555_v14  ;;  %vm2583_vm14 = vcmask 523712  }
 0x93d   :  { %v387_v19 = vpop.permute.xlu0 %386  ;;  %v586_v20 = vmax.f32 %v570_v51, %v571_v17  ;;  %v587_v56 = vmax.f32 %v571_v17, %v572_v15 }
 0x93e   :  { %v502_v25 = vadd.f32 %v486_v18, %v387_v19 }
 0x93f   :  { %5290 = vmatmul.mubr.msk.f32.gmra.mrb[4].mxu1 %vm604_vm5, %v586_v20 }
 0x940   :  { %v525_v30 = vadd.f32 %v6165_v32, %v502_v25  ;;  %5292 = vmatprep.mubr.msk.f32.mxu1 %vm604_vm5, %v587_v56 }
 0x941   :  { %v453_v31 = vpop.permute.xlu0 %452 }
 0x942   :  { %vm541_vm0 = vcmp.gt.f32.partialorder %v525_v30, 0.0  ;;  %v557_v33 = vmul.f32 0.9, %v525_v30  ;;  %v488_v36 = vadd.f32 %v6196_v55, %v453_v31  ;;  %v530_v55 = vadd.f32 %v6165_v32, %v491_v41 }
 0x944   :  { %v573_v35 = vsel %vm541_vm0, %v525_v30, %v557_v33  ;;  %v562_v60 = vmul.f32 0.9, %v530_v55  ;;  %vm546_vm3 = vcmp.gt.f32.partialorder %v530_v55, 0.0 }
 0x945   :  { %v391_v37 = vpop.permute.xlu0 %390  ;;  %v588_v38 = vmax.f32 %v572_v15, %v573_v35  ;;  %v589_v39 = vmax.f32 %v573_v35, %v574_v53 }
 0x946   :  { %v504_v40 = vadd.f32 %v488_v36, %v391_v37  ;;  %v578_v1 = vsel %vm546_vm3, %v530_v55, %v562_v60 }
 0x947   :  { %5293 = vmatmul.mubr.msk.f32.gmra.mrb[6].mxu1 %vm604_vm5, %v588_v38 }
 0x948   :  { %v527_v43 = vadd.f32 %v6165_v32, %v504_v40  ;;  %5295 = vmatprep.mubr.msk.f32.mxu1 %vm604_vm5, %v589_v39 }
 0x949   :  { %v457_v44 = vpop.permute.xlu0 %456 }
 0x94a   :  { %vm543_vm2 = vcmp.gt.f32.partialorder %v527_v43, 0.0  ;;  %v559_v45 = vmul.f32 0.9, %v527_v43  ;;  %v490_v48 = vadd.f32 %v6200_v57, %v457_v44  ;;  %v594_v57 = vmax.f32 %v578_v1, %v6172_v49 }
 0x94c   :  { %v575_v47 = vsel %vm543_vm2, %v527_v43, %v559_v45 }
 0x94d   :  { %v395_v50 = vpop.permute.xlu0 %394  ;;  %v590_v51 = vmax.f32 %v574_v53, %v575_v47  ;;  %v591_v62 = vmax.f32 %v575_v47, %v576_v46 }
 0x94e   :  { %v506_v28 = vadd.f32 %v490_v48, %v395_v50 }
 0x94f   :  { %5296 = vmatmul.mubr.msk.f32.gmra.mrb[8].mxu1 %vm604_vm5, %v590_v51 }
 0x950   :  { %v529_v63 = vadd.f32 %v6165_v32, %v506_v28  ;;  %5298 = vmatprep.mubr.msk.f32.mxu1 %vm604_vm5, %v591_v62 }
 0x952   :  { %vm545_vm4 = vcmp.gt.f32.partialorder %v529_v63, 0.0  ;;  %v561_v0 = vmul.f32 0.9, %v529_v63 }
 0x954   :  { %v577_v2 = vsel %vm545_vm4, %v529_v63, %v561_v0 }
 0x955   :  { %v592_v3 = vmax.f32 %v576_v46, %v577_v2  ;;  %v593_v4 = vmax.f32 %v577_v2, %v578_v1 }
 0x957   :  { %5299 = vmatmul.mubr.msk.f32.gmra.mrb[10].mxu1 %vm604_vm5, %v592_v3 }
 0x958   :  { %5301 = vmatprep.mubr.msk.f32.mxu1 %vm604_vm5, %v593_v4 }
 0x95b   :  { %5302 = vmatmul.mubr.msk.f32.gmra.mrb[12].mxu1 %vm604_vm5, %v594_v57 }
 0x95c   :  { %5321 = vmatprep.mubr.msk.f32.mxu1 %vm5945_vm6, %v5944_v24 }
 0x9a2   :  { %v1096_v32 = vpop.permute.xlu0 %1095 }
 0x9a3   :  { %1098 = vst.msk [vmem:[#allocation2 + $0x10] sm:$0xff] %vm791_vm9, %v1096_v32  ;;  %5322 = vmatmul.mubr.msk.f32.vlgmr.msra.gmra.mrb[14].mxu1 %vm791_vm9, %v1096_v32  ;;  %v1617_v32 = vld [vmem:[%s7023_s6] sm:$0xff] }
 0x9a4   :  { %5330 = vmatpush3.msra.mxu1 %v6179_v52  ;;  %5331 = vmatprep.mubr.msk.f32.mxu1 %vm5945_vm6, %v5944_v24 }
 0x9a5   :  { %5339 = vmatprep.subr.mxu1 %v5944_v24 }
 0xa12   :  { %v5291_v5 = vpop.f32.mrb[4].mxu1 }
 0xa13   :  { %v746_v6 = vpop.f32.mrb[5].mxu1 }
 0xa14   :  { %v747_v12 = vadd.f32 %v6211_v61, %v746_v6 }
 0xa1a   :  { %v5294_v49 = vpop.f32.mrb[6].mxu1 }
 0xa1b   :  { %v755_v7 = vpop.f32.mrb[7].mxu1 }
 0xa22   :  { %v5297_v8 = vpop.f32.mrb[8].mxu1 }
 0xa23   :  { %v6345_v9 = vpop.f32.mrb[9].mxu1  ;;  %v1610_v8 = vld [vmem:[#allocation2 + $0x8] sm:$0xff] }
 0xa24   :  { %v765_v47 = vadd.f32 %v6211_v61, %v6345_v9  ;;  %v1611_v9 = vld [vmem:[#allocation2 + $0x10] sm:$0xff] }
 0xa2a   :  { %v5300_v10 = vpop.f32.mrb[10].mxu1 }
 0xa2b   :  { %v6347_v59 = vpop.f32.mrb[11].mxu1 }
 0xa2e   :  { %v5303_v11 = vpop.f32.mrb[12].mxu1 }
 0xa2f   :  { %v6349_v26 = vpop.f32.mrb[13].mxu1 }
 0xa76   :  { %v1167_v13 = vpop.f32.mrb[14].mxu1 }
 0xa77   :  { %v1171_v54 = vadd.f32 %v1167_v13, %v747_v12  ;;  %v5323_v14 = vpop.f32.mrb[15].mxu1  ;;  %v774_v13 = vadd.f32 %v6211_v61, %v6347_v59 }
 0xa79   :  { %5710 = vtanh.f32 %v1171_v54  ;;  %v5008_v16 = vmul.f32 -1.442695, %v1171_v54 }
 0xa7b   :  { %5712 = vpow2.f32 %v5008_v16 }
 0xa83   :  { %v5711_v15 = vpop.eup %5710 }
 0xa84   :  { %1181 = vrot.lane.b32.xlu1 %v5711_v15, %s5946_s30 }
 0xa85   :  { %v5713_v17 = vpop.eup %5712 }
 0xa86   :  { %v1175_v18 = vadd.f32 1.0, %v5713_v17 }
 0xa88   :  { %5714 = vrcp.f32 %v1175_v18 }
 0xa92   :  { %v5715_v27 = vpop.eup %5714 }
 0xa93   :  { %v1179_v56 = vmul.f32 %v5715_v27, %v6287_v42  ;;  %v756_v42 = vadd.f32 %v6211_v61, %v755_v7  ;;  %v1609_v7 = vld [vmem:[#allocation2] sm:$0xff] }
 0xaf6   :  { %v1182_v19 = vpop.permute.xlu1 %1181 }
 0xaf7   :  { %v1184_v20 = vmul.f32 %v5715_v27, %v1182_v19 }
 0xaf9   :  { %1186 = vrot.lane.b32.xlu0 %v1184_v20, %s5947_s5 }
 0xb6b   :  { %v1187_v21 = vpop.permute.xlu0 %1186 }
 0xb6c   :  { %v1189_v25 = vadd.f32 %v1187_v21, %v1179_v56 }
 0xb6e   :  { %5716 = vtanh.f32 %v1189_v25 }
 0xb78   :  { %v5717_v29 = vpop.eup %5716 }
 0xb79   :  { %1192 = vrot.lane.b32.xlu1 %v5717_v29, %s5947_s5 }
 0xbeb   :  { %v1193_v23 = vpop.permute.xlu1 %1192 }
 0xbec   :  { %v1195_v30 = vmul.f32 %v5715_v27, %v1193_v23 }
 0xbee   :  { %1197 = vrot.lane.b32.xlu0 %v1195_v30, %s5943_s23 }
 0xc60   :  { %v1198_v31 = vpop.permute.xlu0 %1197 }
 0xc61   :  { %1200 = vst.msk [vmem:[#allocation2 + $0x18] sm:$0xff] %vm791_vm9, %v1198_v31  ;;  %5327 = vmatmul.mubr.msk.f32.vlgmr.msra.gmra.mrb[24].mxu0 %vm791_vm9, %v1198_v31 }
 0xc62   :  { %5335 = vmatpush3.msra.mxu0 %v6179_v52  ;;  %5336 = vmatprep.mubr.msk.f32.mxu0 %vm5945_vm6, %v5944_v24 }
 0xc63   :  { %5344 = vmatprep.subr.mxu0 %v1617_v32 }
 0xc68   :  { %v1612_v10 = vld [vmem:[#allocation2 + $0x18] sm:$0xff] }
 0xd34   :  { %v1269_v33 = vpop.f32.mrb[24].mxu0 }
 0xd35   :  { %v1273_v53 = vadd.f32 %v1269_v33, %v756_v42  ;;  %v5328_v34 = vpop.f32.mrb[25].mxu0 }
 0xd36   :  { %v6412_v34 = vld [vmem:[%s7024_s7] sm:$0xff] }
 0xd37   :  { %5718 = vtanh.f32 %v1273_v53  ;;  %v5010_v36 = vmul.f32 -1.442695, %v1273_v53 }
 0xd39   :  { %5720 = vpow2.f32 %v5010_v36 }
 0xd41   :  { %v5719_v35 = vpop.eup %5718 }
 0xd42   :  { %1283 = vrot.lane.b32.xlu1 %v5719_v35, %s5946_s30 }
 0xd43   :  { %v5721_v58 = vpop.eup %5720 }
 0xd44   :  { %v1277_v37 = vadd.f32 1.0, %v5721_v58 }
 0xd46   :  { %5722 = vrcp.f32 %v1277_v37 }
 0xd50   :  { %v5723_v38 = vpop.eup %5722 }
 0xd51   :  { %v1281_v22 = vmul.f32 %v5723_v38, %v1189_v25 }
 0xdb4   :  { %v1284_v39 = vpop.permute.xlu1 %1283 }
 0xdb5   :  { %v1286_v40 = vmul.f32 %v5723_v38, %v1284_v39  ;;  %v6434_v39 = vld [vmem:[%s7025_s8] ss:$0 sm:$0xff]  ;;  %s5948_s8 = smov 120  }
 0xdb7   :  { %1288 = vrot.lane.b32.xlu0 %v1286_v40, %s5947_s5 }
 0xe29   :  { %v1289_v41 = vpop.permute.xlu0 %1288 }
 0xe2a   :  { %v1291_v43 = vadd.f32 %v1289_v41, %v1281_v22 }
 0xe2c   :  { %5724 = vtanh.f32 %v1291_v43 }
 0xe36   :  { %v5725_v44 = vpop.eup %5724 }
 0xe37   :  { %1294 = vrot.lane.b32.xlu1 %v5725_v44, %s5947_s5 }
 0xea9   :  { %v1295_v45 = vpop.permute.xlu1 %1294 }
 0xeaa   :  { %v1297_v46 = vmul.f32 %v5723_v38, %v1295_v45  ;;  %v783_v38 = vadd.f32 %v6211_v61, %v6349_v26 }
 0xeac   :  { %1299 = vrot.lane.b32.xlu0 %v1297_v46, %s5943_s23 }
 0xf1e   :  { %v1300_v55 = vpop.permute.xlu0 %1299 }
 0xf1f   :  { %1302 = vst.msk [vmem:[#allocation2 + $0x20] sm:$0xff] %vm791_vm9, %v1300_v55  ;;  %5332 = vmatmul.mubr.msk.f32.vlgmr.msra.gmra.mrb[16].mxu1 %vm791_vm9, %v1300_v55 }
 0xf20   :  { %5340 = vmatpush3.msra.mxu1 %v6179_v52  ;;  %5341 = vmatprep.mubr.msk.f32.mxu1 %vm5945_vm6, %v5944_v24 }
 0xf21   :  { %5358 = vmatprep.subr.mxu1 %v5944_v24 }
 0xf26   :  { %v1613_v11 = vld [vmem:[#allocation2 + $0x20] sm:$0xff] }
 0xff2   :  { %v1371_v48 = vpop.f32.mrb[16].mxu1 }
 0xff3   :  { %v1375_v50 = vadd.f32 %v1371_v48, %v765_v47  ;;  %v5333_v51 = vpop.f32.mrb[17].mxu1 }
 0xff5   :  { %5726 = vtanh.f32 %v1375_v50  ;;  %v5012_v28 = vmul.f32 -1.442695, %v1375_v50 }
 0xff7   :  { %5728 = vpow2.f32 %v5012_v28 }
 0xfff   :  { %v5727_v62 = vpop.eup %5726 }
0x1000   :  { %1385 = vrot.lane.b32.xlu1 %v5727_v62, %s5946_s30 }
0x1001   :  { %v5729_v60 = vpop.eup %5728 }
0x1002   :  { %v1379_v63 = vadd.f32 1.0, %v5729_v60 }
0x1004   :  { %5730 = vrcp.f32 %v1379_v63 }
0x100e   :  { %v5731_v52 = vpop.eup %5730 }
0x100f   :  { %v1383_v2 = vmul.f32 %v5731_v52, %v1291_v43 }
0x1072   :  { %v1386_v0 = vpop.permute.xlu1 %1385 }
0x1073   :  { %v1388_v1 = vmul.f32 %v5731_v52, %v1386_v0 }
0x1075   :  { %1390 = vrot.lane.b32.xlu0 %v1388_v1, %s5947_s5 }
0x10e7   :  { %v1391_v3 = vpop.permute.xlu0 %1390 }
0x10e8   :  { %v1393_v4 = vadd.f32 %v1391_v3, %v1383_v2 }
0x10ea   :  { %5732 = vtanh.f32 %v1393_v4 }
0x10f4   :  { %v5733_v57 = vpop.eup %5732 }
0x10f5   :  { %1396 = vrot.lane.b32.xlu1 %v5733_v57, %s5947_s5 }
0x1167   :  { %v1397_v5 = vpop.permute.xlu1 %1396 }
0x1168   :  { %v1399_v6 = vmul.f32 %v5731_v52, %v1397_v5 }
0x116a   :  { %1401 = vrot.lane.b32.xlu0 %v1399_v6, %s5943_s23 }
0x11dc   :  { %v1402_v49 = vpop.permute.xlu0 %1401 }
0x11dd   :  { %1404 = vst.msk [vmem:[#allocation2 + $0x28] sm:$0xff] %vm791_vm9, %v1402_v49  ;;  %5337 = vmatmul.mubr.msk.f32.vlgmr.msra.gmra.mrb[26].mxu0 %vm791_vm9, %v1402_v49 }
0x11de   :  { %5346 = vmatprep.mubr.msk.f32.mxu0 %vm791_vm9, %v1609_v7  ;;  %5345 = vmatpush3.msra.mxu0 %v1617_v32 }
0x11df   :  { %5378 = vmatprep.subr.mxu0 %v5944_v24 }
0x11e1   :  { %5347 = vmatmul.mubr.msk.f32.vlgmr.msra.gmra.mrb[28].mxu0 %vm791_vm9, %v1610_v8 }
0x11e2   :  { %5349 = vmatprep.mubr.msk.f32.mxu0 %vm791_vm9, %v1611_v9  ;;  %5379 = vmatpush3.msra.mxu0 %v6412_v34 }
0x11e3   :  { %5388 = vmatprep.subr.mxu0 %v5944_v24 }
0x11e4   :  { %v1614_v12 = vld [vmem:[#allocation2 + $0x28] sm:$0xff] }
0x11e5   :  { %5350 = vmatmul.mubr.msk.f32.gmra.mrb[30].mxu0 %vm791_vm9, %v1612_v10 }
0x11e6   :  { %5352 = vmatprep.mubr.msk.f32.mxu0 %vm791_vm9, %v1613_v11 }
0x11e9   :  { %5353 = vmatmul.mubr.msk.f32.gmra.mrb[32].mxu0 %vm791_vm9, %v1614_v12 }
0x12b0   :  { %v1473_v54 = vpop.f32.mrb[26].mxu0 }
0x12b1   :  { %v1477_v14 = vadd.f32 %v1473_v54, %v774_v13  ;;  %v5338_v15 = vpop.f32.mrb[27].mxu0 }
0x12b3   :  { %5734 = vtanh.f32 %v1477_v14  ;;  %v5014_v21 = vmul.f32 -1.442695, %v1477_v14 }
0x12b4   :  { %v6393_v16 = vpop.f32.mrb[28].mxu0 }
0x12b5   :  { %v1715_v17 = vpop.f32.mrb[29].mxu0  ;;  %5736 = vpow2.f32 %v5014_v21  ;;  %v1721_v2 = vadd.f32 %v6393_v16, %v6434_v39 }
0x12b6   :  { %v1716_v43 = vadd.f32 %v6434_v39, %v1715_v17 }
0x12b8   :  { %v6395_v18 = vpop.f32.mrb[30].mxu0 }
0x12b9   :  { %v6397_v27 = vpop.f32.mrb[31].mxu0 }
0x12ba   :  { %v1726_v16 = vadd.f32 %v6434_v39, %v6397_v27 }
0x12bc   :  { %v6399_v19 = vpop.f32.mrb[32].mxu0 }
0x12bd   :  { %v5735_v20 = vpop.eup %5734  ;;  %v6401_v56 = vpop.f32.mrb[33].mxu0 }
0x12be   :  { %1487 = vrot.lane.b32.xlu1 %v5735_v20, %s5946_s30 }
0x12bf   :  { %v5737_v59 = vpop.eup %5736 }
0x12c0   :  { %v1481_v25 = vadd.f32 1.0, %v5737_v59 }
0x12c2   :  { %5738 = vrcp.f32 %v1481_v25 }
0x12cc   :  { %v5739_v29 = vpop.eup %5738 }
0x12cd   :  { %v1485_v31 = vmul.f32 %v5739_v29, %v1393_v4 }
0x1330   :  { %v1488_v23 = vpop.permute.xlu1 %1487 }
0x1331   :  { %v1490_v30 = vmul.f32 %v5739_v29, %v1488_v23 }
0x1333   :  { %1492 = vrot.lane.b32.xlu0 %v1490_v30, %s5947_s5 }
0x13a5   :  { %v1493_v42 = vpop.permute.xlu0 %1492 }
0x13a6   :  { %v6405_v33 = vadd.f32 %v1493_v42, %v1485_v31 }
0x13a8   :  { %5740 = vtanh.f32 %v6405_v33 }
0x13b2   :  { %v5741_v53 = vpop.eup %5740 }
0x13b3   :  { %1498 = vrot.lane.b32.xlu1 %v5741_v53, %s5947_s5 }
0x1425   :  { %v1499_v35 = vpop.permute.xlu1 %1498 }
0x1426   :  { %v1501_v36 = vmul.f32 %v5739_v29, %v1499_v35 }
0x1428   :  { %1503 = vrot.lane.b32.xlu0 %v1501_v36, %s5943_s23 }
0x149a   :  { %v1504_v58 = vpop.permute.xlu0 %1503 }
0x149b   :  { %1506 = vst.msk [vmem:[#allocation2 + $0x30] sm:$0xff] %vm791_vm9, %v1504_v58  ;;  %5342 = vmatmul.mubr.msk.f32.vlgmr.msra.gmra.mrb[18].mxu1 %vm791_vm9, %v1504_v58 }
0x149c   :  { %5359 = vmatpush3.msra.mxu1 %v6412_v34  ;;  %5360 = vmatprep.mubr.msk.f32.mxu1 %vm5945_vm6, %v5944_v24 }
0x149d   :  { %5363 = vmatprep.subr.mxu1 %v5944_v24 }
0x149f   :  { %5361 = vmatmul.mubr.f32.vlgmr.msra.gmra.mrb[20].mxu1 %v5944_v24 }
0x14a0   :  { %5364 = vmatpush3.msra.mxu1 %v6412_v34  ;;  %5365 = vmatprep.mubr.msk.f32.mxu1 %vm5945_vm6, %v5944_v24 }
0x14a1   :  { %5368 = vmatprep.subr.mxu1 %v5944_v24 }
0x14a2   :  { %v1615_v37 = vld [vmem:[#allocation2 + $0x30] sm:$0xff] }
0x14a3   :  { %5355 = vmatprep.mubr.msk.f32.mxu0 %vm791_vm9, %v1615_v37 }
0x156e   :  { %v1575_v40 = vpop.f32.mrb[18].mxu1 }
0x156f   :  { %v6436_v22 = vadd.f32 %v1575_v40, %v783_v38  ;;  %v5343_v41 = vpop.f32.mrb[19].mxu1 }
0x1571   :  { %v5016_v37 = vmul.f32 -1.442695, %v6436_v22 }
0x1572   :  { %v1821_v44 = vpop.f32.mrb[20].mxu1 }
0x1573   :  { %v1825_v45 = vadd.f32 %v1821_v44, %v1716_v43  ;;  %v5362_v46 = vpop.f32.mrb[21].mxu1 }
0x1575   :  { %5742 = vtanh.f32 %v1825_v45  ;;  %v5026_v47 = vmul.f32 -1.442695, %v1825_v45 }
0x1577   :  { %5744 = vpow2.f32 %v5026_v47 }
0x157f   :  { %v5743_v55 = vpop.eup %5742 }
0x1580   :  { %1835 = vrot.lane.b32.xlu1 %v5743_v55, %s5946_s30 }
0x1581   :  { %v5745_v61 = vpop.eup %5744 }
0x1582   :  { %v1829_v26 = vadd.f32 1.0, %v5745_v61 }
0x1584   :  { %5746 = vrcp.f32 %v1829_v26 }
0x158e   :  { %v5747_v48 = vpop.eup %5746 }
0x158f   :  { %v1833_v62 = vmul.f32 0.0, %v5747_v48 }
0x15f2   :  { %v1836_v50 = vpop.permute.xlu1 %1835 }
0x15f3   :  { %v1838_v51 = vmul.f32 %v5747_v48, %v1836_v50 }
0x15f5   :  { %1840 = vrot.lane.b32.xlu0 %v1838_v51, %s5947_s5  ;;  %v1731_v51 = vadd.f32 %v6395_v18, %v6434_v39 }
0x1667   :  { %v1841_v28 = vpop.permute.xlu0 %1840 }
0x1668   :  { %v1843_v60 = vadd.f32 %v1841_v28, %v1833_v62 }
0x166a   :  { %5748 = vtanh.f32 %v1843_v60 }
0x1674   :  { %v5749_v63 = vpop.eup %5748 }
0x1675   :  { %1846 = vrot.lane.b32.xlu1 %v5749_v63, %s5947_s5 }
0x16e7   :  { %v1847_v52 = vpop.permute.xlu1 %1846 }
0x16e8   :  { %v1849_v0 = vmul.f32 %v5747_v48, %v1847_v52 }
0x16ea   :  { %1851 = vrot.lane.b32.xlu0 %v1849_v0, %s5943_s23 }
0x175c   :  { %v1852_v1 = vpop.permute.xlu0 %1851 }
0x175d   :  { %1854 = vst.msk [vmem:[#allocation4] sm:$0xff] %vm791_vm9, %v1852_v1  ;;  %5366 = vmatmul.mubr.msk.f32.vlgmr.msra.gmra.mrb[22].mxu1 %vm791_vm9, %v1852_v1 }
0x175e   :  { %5369 = vmatpush3.msra.mxu1 %v6412_v34  ;;  %5370 = vmatprep.mubr.msk.f32.mxu1 %vm5945_vm6, %v5944_v24 }
0x175f   :  { %5373 = vmatprep.subr.mxu1 %v5944_v24 }
0x1830   :  { %v1923_v3 = vpop.f32.mrb[22].mxu1 }
0x1831   :  { %v1927_v4 = vadd.f32 %v1923_v3, %v1721_v2  ;;  %v5367_v57 = vpop.f32.mrb[23].mxu1 }
0x1833   :  { %5750 = vtanh.f32 %v1927_v4  ;;  %v5028_v5 = vmul.f32 -1.442695, %v1927_v4 }
0x1835   :  { %5752 = vpow2.f32 %v5028_v5 }
0x183d   :  { %v5751_v32 = vpop.eup %5750 }
0x183e   :  { %1937 = vrot.lane.b32.xlu1 %v5751_v32, %s5946_s30 }
0x183f   :  { %v5753_v6 = vpop.eup %5752 }
0x1840   :  { %v1931_v49 = vadd.f32 1.0, %v5753_v6 }
0x1842   :  { %5754 = vrcp.f32 %v1931_v49 }
0x184c   :  { %v5755_v7 = vpop.eup %5754 }
0x184d   :  { %v1935_v10 = vmul.f32 %v5755_v7, %v1843_v60 }
0x18b0   :  { %v1938_v8 = vpop.permute.xlu1 %1937 }
0x18b1   :  { %v1940_v9 = vmul.f32 %v5755_v7, %v1938_v8 }
0x18b3   :  { %1942 = vrot.lane.b32.xlu0 %v1940_v9, %s5947_s5 }
0x1925   :  { %v1943_v11 = vpop.permute.xlu0 %1942 }
0x1926   :  { %v1945_v12 = vadd.f32 %v1943_v11, %v1935_v10  ;;  %v1736_v11 = vadd.f32 %v6434_v39, %v6401_v56 }
0x1928   :  { %5756 = vtanh.f32 %v1945_v12 }
0x1932   :  { %v5757_v13 = vpop.eup %5756 }
0x1933   :  { %1948 = vrot.lane.b32.xlu1 %v5757_v13, %s5947_s5 }
0x19a5   :  { %v1949_v54 = vpop.permute.xlu1 %1948 }
0x19a6   :  { %v6454_v14 = vmul.f32 %v5755_v7, %v1949_v54 }
0x19a8   :  { %1958 = vrot.lane.b32.xlu0 %v6454_v14, %s5943_s23 }
0x1a1a   :  { %v1959_v15 = vpop.permute.xlu0 %1958 }
0x1a1b   :  { %5371 = vmatmul.mubr.msk.f32.vlgmr.msra.gmra.mrb[24].mxu1 %vm791_vm9, %v1959_v15 }
0x1a1c   :  { %5374 = vmatpush3.msra.mxu1 %v6412_v34  ;;  %5375 = vmatprep.mubr.msk.f32.mxu1 %vm5945_vm6, %v5944_v24 }
0x1a1d   :  { %5383 = vmatprep.subr.mxu1 %v5944_v24 }
0x1aee   :  { %v2028_v17 = vpop.f32.mrb[24].mxu1 }
0x1aef   :  { %v2032_v20 = vadd.f32 %v2028_v17, %v1726_v16  ;;  %v5372_v21 = vpop.f32.mrb[25].mxu1 }
0x1af1   :  { %5758 = vtanh.f32 %v2032_v20  ;;  %v5030_v25 = vmul.f32 -1.442695, %v2032_v20 }
0x1af3   :  { %5760 = vpow2.f32 %v5030_v25 }
0x1afb   :  { %v5759_v59 = vpop.eup %5758 }
0x1afc   :  { %2042 = vrot.lane.b32.xlu1 %v5759_v59, %s5946_s30 }
0x1afd   :  { %v5761_v29 = vpop.eup %5760 }
0x1afe   :  { %v2036_v23 = vadd.f32 1.0, %v5761_v29 }
0x1b00   :  { %5762 = vrcp.f32 %v2036_v23 }
0x1b0a   :  { %v5763_v30 = vpop.eup %5762 }
0x1b0b   :  { %v2040_v53 = vmul.f32 %v5763_v30, %v1945_v12 }
0x1b6e   :  { %v2043_v31 = vpop.permute.xlu1 %2042 }
0x1b6f   :  { %v2045_v42 = vmul.f32 %v5763_v30, %v2043_v31 }
0x1b71   :  { %2047 = vrot.lane.b32.xlu0 %v2045_v42, %s5947_s5 }
0x1be3   :  { %v2048_v35 = vpop.permute.xlu0 %2047 }
0x1be4   :  { %v2050_v27 = vadd.f32 %v2048_v35, %v2040_v53  ;;  %v1741_v35 = vadd.f32 %v6399_v19, %v6434_v39 }
0x1be6   :  { %5764 = vtanh.f32 %v2050_v27 }
0x1be7   :  { %5766 = vtanh.f32 %v6436_v22 }
0x1be8   :  { %5768 = vpow2.f32 %v5016_v37 }
0x1bf0   :  { %v5765_v36 = vpop.eup %5764 }
0x1bf1   :  { %2053 = vrot.lane.b32.xlu1 %v5765_v36, %s5947_s5  ;;  %v5767_v58 = vpop.eup %5766 }
0x1bf2   :  { %v5769_v38 = vpop.eup %5768 }
0x1bf3   :  { %v1583_v40 = vadd.f32 1.0, %v5769_v38 }
0x1bf5   :  { %1589 = vrot.lane.b32.xlu1 %v5767_v58, %s5946_s30  ;;  %5770 = vrcp.f32 %v1583_v40 }
0x1bff   :  { %v5771_v44 = vpop.eup %5770 }
0x1c00   :  { %v1587_v22 = vmul.f32 %v5771_v44, %v6405_v33 }
0x1c63   :  { %v2054_v41 = vpop.permute.xlu1 %2053 }
0x1c64   :  { %v6471_v43 = vmul.f32 %v5763_v30, %v2054_v41 }
0x1c66   :  { %2060 = vrot.lane.b32.xlu0 %v6471_v43, %s5943_s23 }
0x1c67   :  { %v1590_v45 = vpop.permute.xlu1 %1589 }
0x1c68   :  { %v1592_v46 = vmul.f32 %v5771_v44, %v1590_v45 }
0x1c6a   :  { %1594 = vrot.lane.b32.xlu1 %v1592_v46, %s5947_s5 }
0x1cd8   :  { %v2061_v55 = vpop.permute.xlu0 %2060 }
0x1cd9   :  { %5376 = vmatmul.mubr.msk.f32.vlgmr.msra.gmra.mrb[26].mxu1 %vm791_vm9, %v2061_v55 }
0x1cda   :  { %5384 = vmatpush3.msra.mxu1 %v6412_v34  ;;  %5385 = vmatprep.mubr.msk.f32.mxu1 %vm5945_vm6, %v5944_v24 }
0x1cdb   :  { %5393 = vmatprep.subr.mxu1 %v5944_v24 }
0x1cdc   :  { %v1595_v47 = vpop.permute.xlu1 %1594 }
0x1cdd   :  { %v1597_v61 = vadd.f32 %v1595_v47, %v1587_v22 }
0x1cdf   :  { %5772 = vtanh.f32 %v1597_v61 }
0x1ce9   :  { %v5773_v26 = vpop.eup %5772 }
0x1cea   :  { %1600 = vrot.lane.b32.xlu1 %v5773_v26, %s5947_s5 }
0x1d5c   :  { %v1601_v48 = vpop.permute.xlu1 %1600 }
0x1d5d   :  { %v1603_v50 = vmul.f32 %v5771_v44, %v1601_v48 }
0x1d5f   :  { %1605 = vrot.lane.b32.xlu1 %v1603_v50, %s5943_s23 }
0x1dac   :  { %v2130_v62 = vpop.f32.mrb[26].mxu1 }
0x1dad   :  { %v2134_v28 = vadd.f32 %v2130_v62, %v1731_v51  ;;  %v5377_v60 = vpop.f32.mrb[27].mxu1 }
0x1daf   :  { %5774 = vtanh.f32 %v2134_v28  ;;  %v5032_v0 = vmul.f32 -1.442695, %v2134_v28 }
0x1db1   :  { %5776 = vpow2.f32 %v5032_v0 }
0x1db9   :  { %v5775_v33 = vpop.eup %5774 }
0x1dba   :  { %2144 = vrot.lane.b32.xlu0 %v5775_v33, %s5946_s30 }
0x1dbb   :  { %v5777_v1 = vpop.eup %5776 }
0x1dbc   :  { %v2138_v18 = vadd.f32 1.0, %v5777_v1 }
0x1dbe   :  { %5778 = vrcp.f32 %v2138_v18 }
0x1dc8   :  { %v5779_v2 = vpop.eup %5778 }
0x1dc9   :  { %v2142_v57 = vmul.f32 %v5779_v2, %v2050_v27 }
0x1dd1   :  { %v1606_v63 = vpop.permute.xlu1 %1605 }
0x1dd2   :  { %1608 = vst.msk [vmem:[#allocation2 + $0x38] sm:$0xff] %vm791_vm9, %v1606_v63 }
0x1dd9   :  { %v1616_v52 = vld [vmem:[#allocation2 + $0x38] sm:$0xff] }
0x1dda   :  { %5356 = vmatmul.mubr.msk.f32.gmra.mrb[34].mxu0 %vm791_vm9, %v1616_v52 }
0x1ddb   :  { %5380 = vmatprep.mubr.msk.f32.mxu0 %vm5945_vm6, %v5944_v24 }
0x1e2c   :  { %v2145_v3 = vpop.permute.xlu0 %2144 }
0x1e2d   :  { %v2147_v4 = vmul.f32 %v5779_v2, %v2145_v3 }
0x1e2f   :  { %2149 = vrot.lane.b32.xlu0 %v2147_v4, %s5947_s5 }
0x1ea1   :  { %v2150_v32 = vpop.permute.xlu0 %2149 }
0x1ea2   :  { %v2152_v5 = vadd.f32 %v2150_v32, %v2142_v57 }
0x1ea4   :  { %5780 = vtanh.f32 %v2152_v5 }
0x1ead   :  { %v6492_v6 = vpop.f32.mrb[34].mxu0 }
0x1eae   :  { %v5781_v49 = vpop.eup %5780  ;;  %v6494_v7 = vpop.f32.mrb[35].mxu0 }
0x1eaf   :  { %2155 = vrot.lane.b32.xlu0 %v5781_v49, %s5947_s5  ;;  %v1746_v48 = vadd.f32 %v6434_v39, %v6494_v7  ;;  %v1751_v49 = vadd.f32 %v6492_v6, %v6434_v39 }
0x1f21   :  { %v2156_v8 = vpop.permute.xlu0 %2155 }
0x1f22   :  { %v6497_v9 = vmul.f32 %v5779_v2, %v2156_v8 }
0x1f24   :  { %2165 = vrot.lane.b32.xlu0 %v6497_v9, %s5943_s23 }
0x1f96   :  { %v2166_v10 = vpop.permute.xlu0 %2165 }
0x1f97   :  { %5381 = vmatmul.mubr.msk.f32.vlgmr.msra.gmra.mrb[36].mxu0 %vm791_vm9, %v2166_v10 }
0x1f98   :  { %5389 = vmatpush3.msra.mxu0 %v6412_v34  ;;  %5390 = vmatprep.mubr.msk.f32.mxu0 %vm5945_vm6, %v5944_v24 }
0x206a   :  { %v2235_v12 = vpop.f32.mrb[36].mxu0 }
0x206b   :  { %v2239_v13 = vadd.f32 %v2235_v12, %v1736_v11  ;;  %v5382_v54 = vpop.f32.mrb[37].mxu0 }
0x206d   :  { %5782 = vtanh.f32 %v2239_v13  ;;  %v5034_v16 = vmul.f32 -1.442695, %v2239_v13 }
0x206f   :  { %5784 = vpow2.f32 %v5034_v16 }
0x2077   :  { %v5783_v15 = vpop.eup %5782 }
0x2078   :  { %2249 = vrot.lane.b32.xlu1 %v5783_v15, %s5946_s30 }
0x2079   :  { %v5785_v17 = vpop.eup %5784 }
0x207a   :  { %v2243_v20 = vadd.f32 1.0, %v5785_v17 }
0x207c   :  { %5786 = vrcp.f32 %v2243_v20 }
0x2086   :  { %v5787_v21 = vpop.eup %5786 }
0x2087   :  { %v2247_v29 = vmul.f32 %v5787_v21, %v2152_v5 }
0x20ea   :  { %v2250_v59 = vpop.permute.xlu1 %2249 }
0x20eb   :  { %v2252_v25 = vmul.f32 %v5787_v21, %v2250_v59  ;;  %v5951_v59 = vmov 0.0|0.0  }
0x20ec   :  { %5570 = vmatprep.subr.bf16.mxu0 %v5951_v59 }
0x20ed   :  { %2254 = vrot.lane.b32.xlu0 %v2252_v25, %s5947_s5  ;;  %v2587_v25 = vld [vmem:[%s7026_s9 + $0x8] sm:$0xff] }
0x215f   :  { %v2255_v23 = vpop.permute.xlu0 %2254 }
0x2160   :  { %v2257_v56 = vadd.f32 %v2255_v23, %v2247_v29  ;;  %v2588_v29 = vld [vmem:[%s7026_s9 + $0x10] sm:$0xff] }
0x2162   :  { %5788 = vtanh.f32 %v2257_v56 }
0x216c   :  { %v5789_v30 = vpop.eup %5788 }
0x216d   :  { %2260 = vrot.lane.b32.xlu1 %v5789_v30, %s5947_s5 }
0x21df   :  { %v2261_v31 = vpop.permute.xlu1 %2260 }
0x21e0   :  { %v6510_v42 = vmul.f32 %v5787_v21, %v2261_v31  ;;  %v2590_v31 = vld [vmem:[%s7026_s9 + $0x20] sm:$0xff] }
0x21e2   :  { %2270 = vrot.lane.b32.xlu0 %v6510_v42, %s5943_s23 }
0x2254   :  { %v2271_v53 = vpop.permute.xlu0 %2270 }
0x2255   :  { %5386 = vmatmul.mubr.msk.f32.vlgmr.msra.gmra.mrb[28].mxu1 %vm791_vm9, %v2271_v53 }
0x2256   :  { %5394 = vmatpush3.msra.mxu1 %v6412_v34  ;;  %5395 = vmatprep.mubr.msk.f32.mxu1 %vm5945_vm6, %v5944_v24 }
0x2257   :  { %5417 = vmatprep.subr.mxu1 %v5944_v24 }
0x2328   :  { %v2340_v27 = vpop.f32.mrb[28].mxu1 }
0x2329   :  { %v2344_v36 = vadd.f32 %v2340_v27, %v1741_v35  ;;  %v5387_v58 = vpop.f32.mrb[29].mxu1  ;;  %v2592_v35 = vld [vmem:[%s7026_s9 + $0x30] sm:$0xff] }
0x232b   :  { %5790 = vtanh.f32 %v2344_v36  ;;  %v5036_v38 = vmul.f32 -1.442695, %v2344_v36 }
0x232d   :  { %5792 = vpow2.f32 %v5036_v38 }
0x2335   :  { %v5791_v37 = vpop.eup %5790 }
0x2336   :  { %2354 = vrot.lane.b32.xlu1 %v5791_v37, %s5946_s30 }
0x2337   :  { %v5793_v40 = vpop.eup %5792 }
0x2338   :  { %v2348_v41 = vadd.f32 1.0, %v5793_v40 }
0x233a   :  { %5794 = vrcp.f32 %v2348_v41 }
0x2344   :  { %v5795_v34 = vpop.eup %5794 }
0x2345   :  { %v2352_v46 = vmul.f32 %v5795_v34, %v2257_v56 }
0x23a8   :  { %v2355_v44 = vpop.permute.xlu1 %2354 }
0x23a9   :  { %v2357_v45 = vmul.f32 %v5795_v34, %v2355_v44 }
0x23ab   :  { %2359 = vrot.lane.b32.xlu0 %v2357_v45, %s5947_s5  ;;  %v2678_v45 = vld [vmem:[%s7027_s11] sm:$0xff] }
0x241d   :  { %v2360_v55 = vpop.permute.xlu0 %2359 }
0x241e   :  { %v2362_v19 = vadd.f32 %v2360_v55, %v2352_v46  ;;  %v2763_v46 = vld [vmem:[%s7028_s13 + $0x8] sm:$0xff] }
0x241f   :  { %v2767_v55 = vld [vmem:[%s7028_s13 + $0x28] sm:$0xff] }
0x2420   :  { %5796 = vtanh.f32 %v2362_v19 }
0x242a   :  { %v5797_v22 = vpop.eup %5796 }
0x242b   :  { %2365 = vrot.lane.b32.xlu1 %v5797_v22, %s5947_s5  ;;  %v2765_v22 = vld [vmem:[%s7028_s13 + $0x18] sm:$0xff] }
0x249d   :  { %v2366_v47 = vpop.permute.xlu1 %2365 }
0x249e   :  { %v6524_v61 = vmul.f32 %v5795_v34, %v2366_v47  ;;  %v2769_v47 = vld [vmem:[%s7028_s13 + $0x38] sm:$0xff] }
0x24a0   :  { %2375 = vrot.lane.b32.xlu0 %v6524_v61, %s5943_s23 }
0x2512   :  { %v2376_v26 = vpop.permute.xlu0 %2375 }
0x2513   :  { %5391 = vmatmul.mubr.msk.f32.vlgmr.msra.gmra.mrb[38].mxu0 %vm791_vm9, %v2376_v26  ;;  %v2764_v26 = vld [vmem:[%s7028_s13 + $0x10] sm:$0xff] }
0x2514   :  { %5414 = vmatprep.mubr.msk.f32.mxu0 %vm5945_vm6, %v5944_v24 }
0x25e6   :  { %v2445_v50 = vpop.f32.mrb[38].mxu0 }
0x25e7   :  { %v2449_v51 = vadd.f32 %v2445_v50, %v1746_v48  ;;  %v5392_v62 = vpop.f32.mrb[39].mxu0  ;;  %v2768_v48 = vld [vmem:[%s7028_s13 + $0x30] sm:$0xff] }
0x25e8   :  { %v5600_v50 = vpack.c.bf16 %v2768_v48, %v2764_v26  ;;  %v2777_v62 = vld [vmem:[%s7028_s13 + $0x78] sm:$0xff] }
0x25e9   :  { %5798 = vtanh.f32 %v2449_v51  ;;  %v5038_v60 = vmul.f32 -1.442695, %v2449_v51  ;;  %v2773_v51 = vld [vmem:[%s7028_s13 + $0x58] sm:$0xff] }
0x25eb   :  { %5800 = vpow2.f32 %v5038_v60  ;;  %v5602_v60 = vpack.c.bf16 %v2777_v62, %v2773_v51 }
0x25f3   :  { %v5799_v28 = vpop.eup %5798 }
0x25f4   :  { %2459 = vrot.lane.b32.xlu1 %v5799_v28, %s5946_s30  ;;  %v2772_v28 = vld [vmem:[%s7028_s13 + $0x50] sm:$0xff] }
0x25f5   :  { %v5801_v33 = vpop.eup %5800 }
0x25f6   :  { %v2453_v63 = vadd.f32 1.0, %v5801_v33  ;;  %v2776_v33 = vld [vmem:[%s7028_s13 + $0x70] sm:$0xff] }
0x25f8   :  { %5802 = vrcp.f32 %v2453_v63  ;;  %v5604_v63 = vpack.c.bf16 %v2776_v33, %v2772_v28 }
0x2602   :  { %v5803_v52 = vpop.eup %5802 }
0x2603   :  { %v2457_v18 = vmul.f32 %v5803_v52, %v2362_v19  ;;  %v5582_v19 = vpack.c.bf16 %v2767_v55, %v2763_v46  ;;  %v2796_v55 = vlaneseq }
0x2666   :  { %v2460_v0 = vpop.permute.xlu1 %2459 }
0x2667   :  { %v2462_v1 = vmul.f32 %v5803_v52, %v2460_v0  ;;  %v2785_v0 = vld [vmem:[%s7028_s13 + $0xb8] sm:$0xff] }
0x2669   :  { %2464 = vrot.lane.b32.xlu0 %v2462_v1, %s5947_s5  ;;  %v2780_v1 = vld [vmem:[%s7028_s13 + $0x90] sm:$0xff] }
0x26db   :  { %v2465_v2 = vpop.permute.xlu0 %2464 }
0x26dc   :  { %v2467_v3 = vadd.f32 %v2465_v2, %v2457_v18  ;;  %v2784_v2 = vld [vmem:[%s7028_s13 + $0xb0] sm:$0xff] }
0x26de   :  { %5804 = vtanh.f32 %v2467_v3 }
0x26e8   :  { %v5805_v4 = vpop.eup %5804 }
0x26e9   :  { %2470 = vrot.lane.b32.xlu1 %v5805_v4, %s5947_s5  ;;  %v5041_v4 = vld [vmem:[%s7029_s10] ss:$0 sm:$0xff] }
0x275b   :  { %v2471_v57 = vpop.permute.xlu1 %2470 }
0x275c   :  { %v2473_v32 = vmul.f32 %v5803_v52, %v2471_v57  ;;  %v2781_v52 = vld [vmem:[%s7028_s13 + $0x98] sm:$0xff] }
0x275d   :  { %v5606_v18 = vpack.c.bf16 %v2785_v0, %v2781_v52 }
0x275e   :  { %2480 = vrot.lane.b32.xlu0 %v2473_v32, %s5943_s23  ;;  %s5949_s23 = smov 16  }
0x27d0   :  { %v2481_v5 = vpop.permute.xlu0 %2480 }
0x27d1   :  { %5396 = vmatmul.mubr.msk.f32.vlgmr.msra.gmra.mrb[30].mxu1 %vm791_vm9, %v2481_v5  ;;  %v2766_v5 = vld [vmem:[%s7028_s13 + $0x20] sm:$0xff] }
0x27d2   :  { %5419 = vmatprep.mubr.msk.f32.mxu1 %vm5945_vm6, %v5944_v24  ;;  %5418 = vmatpush3.msra.mxu1 %v2678_v45 }
0x27d3   :  { %5583 = vmatprep.subr.bf16.mxu1 %v5582_v19  ;;  %v6715_v19 = vshrl.u32 %v2796_v55, 7 }
0x28a4   :  { %v2550_v7 = vpop.f32.mrb[30].mxu1 }
0x28a5   :  { %v2554_v8 = vadd.f32 %v2550_v7, %v1751_v49  ;;  %v5397_v10 = vpop.f32.mrb[31].mxu1 }
0x28a6   :  { %v2775_v10 = vld [vmem:[%s7028_s13 + $0x68] sm:$0xff] }
0x28a7   :  { %5806 = vtanh.f32 %v2554_v8  ;;  %v5040_v12 = vmul.f32 -1.442695, %v2554_v8  ;;  %v2771_v8 = vld [vmem:[%s7028_s13 + $0x48] sm:$0xff] }
0x28a9   :  { %5808 = vpow2.f32 %v5040_v12 }
0x28b1   :  { %v5807_v11 = vpop.eup %5806 }
0x28b2   :  { %2564 = vrot.lane.b32.xlu1 %v5807_v11, %s5946_s30 }
0x28b3   :  { %v5809_v13 = vpop.eup %5808 }
0x28b4   :  { %v2558_v54 = vadd.f32 1.0, %v5809_v13  ;;  %v5586_v13 = vpack.c.bf16 %v2775_v10, %v2771_v8 }
0x28b6   :  { %5810 = vrcp.f32 %v2558_v54  ;;  %v2770_v54 = vld [vmem:[%s7028_s13 + $0x40] sm:$0xff] }
0x28c0   :  { %v5811_v15 = vpop.eup %5810 }
0x28c1   :  { %v2562_v39 = vmul.f32 %v5811_v15, %v2467_v3  ;;  %v5608_v3 = vpack.c.bf16 %v2784_v2, %v2780_v1 }
0x2924   :  { %v2565_v16 = vpop.permute.xlu1 %2564 }
0x2925   :  { %v2567_v17 = vmul.f32 %v5811_v15, %v2565_v16 }
0x2927   :  { %2569 = vrot.lane.b32.xlu0 %v2567_v17, %s5947_s5  ;;  %v2779_v17 = vld [vmem:[%s7028_s13 + $0x88] sm:$0xff] }
0x292b   :  { %1953 = vrot.lane.b32.xlu0 %v6454_v14, %s5948_s8  ;;  %v2586_v14 = vld [vmem:[%s7026_s9] sm:$0xff] }
0x292c   :  { %v5571_v23 = vpack.c.bf16 %v2587_v25, %v2586_v14  ;;  %v2782_v14 = vld [vmem:[%s7028_s13 + $0xa0] sm:$0xff] }
0x292e   :  { %5572 = vmatpush3.bf16.msra.mxu0 %v5571_v23  ;;  %v2791_v23 = vld [vmem:[%s7028_s13 + $0xe8] sm:$0xff] }
0x292f   :  { %2265 = vrot.lane.b32.xlu0 %v6510_v42, %s5949_s23  ;;  %5573 = vmatprep.subr.bf16.mxu0 %v5951_v59  ;;  %v2591_v42 = vld [vmem:[%s7026_s9 + $0x28] sm:$0xff] }
0x2930   :  { %v5577_v53 = vpack.c.bf16 %v2591_v42, %v2590_v31  ;;  %v2790_v31 = vld [vmem:[%s7028_s13 + $0xe0] sm:$0xff]  ;;  %v2793_v42 = vld [vmem:[%s7028_s13 + $0xf8] sm:$0xff] }
0x2933   :  { %2475 = vrot.lane.b32.xlu0 %v2473_v32, %s5950_s25  ;;  %v2762_v32 = vld [vmem:[%s7028_s13] sm:$0xff] }
0x2934   :  { %v5584_v12 = vpack.c.bf16 %v2766_v5, %v2762_v32 }
0x2999   :  { %v2570_v6 = vpop.permute.xlu0 %2569 }
0x299a   :  { %v2572_v20 = vadd.f32 %v2570_v6, %v2562_v39  ;;  %v2783_v39 = vld [vmem:[%s7028_s13 + $0xa8] sm:$0xff] }
0x299c   :  { %5812 = vtanh.f32 %v2572_v20  ;;  %v5590_v20 = vpack.c.bf16 %v2783_v39, %v2779_v17 }
0x299d   :  { %v1954_v21 = vpop.permute.xlu0 %1953 }
0x299e   :  { %1957 = vst.msk [vmem:[#allocation4] sm:$0xff] %vm1956_vm7, %v1954_v21  ;;  %v2778_v21 = vld [vmem:[%s7028_s13 + $0x80] sm:$0xff] }
0x299f   :  { %2058 = vst.msk [vmem:[#allocation4] sm:$0xff] %vm2057_vm8, %v6471_v43  ;;  %v2589_v43 = vld [vmem:[%s7026_s9 + $0x18] sm:$0xff]  ;;  %v5592_v25 = vpack.c.bf16 %v2782_v14, %v2778_v21 }
0x29a0   :  { %v5574_v30 = vpack.c.bf16 %v2589_v43, %v2588_v29  ;;  %v2787_v29 = vld [vmem:[%s7028_s13 + $0xc8] sm:$0xff]  ;;  %v2789_v43 = vld [vmem:[%s7028_s13 + $0xd8] sm:$0xff] }
0x29a1   :  { %v2266_v37 = vpop.permute.xlu0 %2265 }
0x29a2   :  { %5575 = vmatpush3.bf16.msra.mxu0 %v5574_v30  ;;  %v2786_v30 = vld [vmem:[%s7028_s13 + $0xc0] sm:$0xff] }
0x29a3   :  { %5576 = vmatprep.subr.bf16.mxu0 %v5951_v59 }
0x29a5   :  { %v2476_v41 = vpop.permute.xlu0 %2475 }
0x29a6   :  { %v5813_v56 = vpop.eup %5812  ;;  %5578 = vmatpush3.bf16.msra.mxu0 %v5577_v53  ;;  %v5596_v53 = vpack.c.bf16 %v2790_v31, %v2786_v30  ;;  %v2802_v31 = vsub.s32 1, %v6715_v19 }
0x29a7   :  { %2575 = vrot.lane.b32.xlu1 %v5813_v56, %s5947_s5  ;;  %5579 = vmatprep.subr.bf16.mxu0 %v5951_v59  ;;  %v5594_v56 = vpack.c.bf16 %v2791_v23, %v2787_v29 }
0x29ab   :  { %2160 = vrot.lane.b32.xlu1 %v6497_v9, %s5947_s5  ;;  %v2593_v9 = vld [vmem:[%s7026_s9 + $0x38] sm:$0xff] }
0x29ac   :  { %v5580_v27 = vpack.c.bf16 %v2593_v9, %v2592_v35  ;;  %v5610_v35 = vpack.c.bf16 %v2793_v42, %v2789_v43  ;;  %v2788_v9 = vld [vmem:[%s7028_s13 + $0xd0] sm:$0xff] }
0x29ae   :  { %5581 = vmatpush3.bf16.msra.mxu0 %v5580_v27  ;;  %v2792_v27 = vld [vmem:[%s7028_s13 + $0xf0] sm:$0xff] }
0x29af   :  { %2370 = vrot.lane.b32.xlu1 %v6524_v61, %s5952_s24  ;;  %v5598_v61 = vpack.c.bf16 %v2769_v47, %v2765_v22  ;;  %v2798_v22 = vsub.s32 0, %v6715_v19  ;;  %v6721_v47 = vld [vmem:[%s7032_s15] sm:$0xf]  ;;  %s5955_s15 = smov 64  }
0x29b0   :  { %v2803_v42 = vrot.slane %v6721_v47, %v2802_v31 }
0x29b1   :  { %5599 = vmatprep.subr.bf16.mxu0 %v5598_v61  ;;  %v2799_v61 = vrot.slane %v6721_v47, %v2798_v22 }
0x2a19   :  { %v2576_v36 = vpop.permute.xlu1 %2575 }
0x2a1a   :  { %v2578_v58 = vmul.f32 %v5811_v15, %v2576_v36  ;;  %v2774_v15 = vld [vmem:[%s7028_s13 + $0x60] sm:$0xff]  ;;  %v5612_v36 = vpack.c.bf16 %v2792_v27, %v2788_v9 }
0x2a1b   :  { %v5588_v6 = vpack.c.bf16 %v2774_v15, %v2770_v54 }
0x2a1c   :  { %2580 = vrot.lane.b32.xlu1 %v2578_v58, %s5953_s2  ;;  %v5043_v58 = vld [vmem:[%s7030_s12] ss:$0 sm:$0xff] }
0x2a1d   :  { %v2161_v38 = vpop.permute.xlu1 %2160 }
0x2a1e   :  { %2164 = vst.msk [vmem:[#allocation4] sm:$0xff] %vm2163_vm10, %v2161_v38  ;;  %v2961_v38 = vld [vmem:[%s7031_s14] sm:$0xff] }
0x2a1f   :  { %2269 = vst.msk [vmem:[#allocation4] sm:$0xff] %vm2268_vm11, %v2266_v37 }
0x2a21   :  { %v2371_v40 = vpop.permute.xlu1 %2370 }
0x2a22   :  { %2374 = vst.msk [vmem:[#allocation4] sm:$0xff] %vm2373_vm12, %v2371_v40  ;;  %v2962_v40 = vld [vmem:[%s7031_s14 + $0x8] sm:$0xff] }
0x2a23   :  { %2479 = vst.msk [vmem:[#allocation4] sm:$0xff] %vm2478_vm13, %v2476_v41  ;;  %v6698_v45 = vpack.c.bf16 %v2962_v40, %v2961_v38 }
0x2a8e   :  { %v2581_v34 = vpop.permute.xlu1 %2580 }
0x2a8f   :  { %2584 = vst.msk [vmem:[#allocation4] sm:$0xff] %vm2583_vm14, %v2581_v34 }
0x2a96   :  { %v2585_v44 = vld [vmem:[#allocation4] sm:$0xff] }
0x2a97   :  { %5415 = vmatmul.mubr.msk.f32.vlgmr.msra.gmra.mrb[40].mxu0 %vm2601_vm15, %v2585_v44 }
0x2a98   :  { %2954 = vmatprep.mubr.f32.mxu0 %v5944_v24  ;;  %5601 = vmatpush1.bf16.msra.mxu0 %v5600_v50 }
0x2a99   :  { %5603 = vmatprep.subr.bf16.mxu0 %v5602_v60 }
0x2a9c   :  { %5605 = vmatpush1.bf16.msra.mxu0 %v5604_v63 }
0x2a9d   :  { %5607 = vmatprep.subr.bf16.mxu0 %v5606_v18 }
0x2aa0   :  { %5609 = vmatpush1.bf16.msra.mxu0 %v5608_v3 }
0x2aa1   :  { %5611 = vmatprep.subr.bf16.mxu0 %v5610_v35 }
0x2aa4   :  { %5613 = vmatpush1.bf16.msra.mxu0 %v5612_v36 }
0x2aa5   :  { %5623 = vmatprep.subr.bf16.mxu0 %v5951_v59 }
0x2b6a   :  { %v2671_v57 = vpop.f32.mrb[40].mxu0 }
0x2b6b   :  { %v2672_v49 = vadd.f32 %v5041_v4, %v2671_v57  ;;  %v5416_v7 = vpop.f32.mrb[41].mxu0 }
0x2b6d   :  { %vm2675_vm0 = vcmp.gt.f32.partialorder %v2672_v49, 0.0  ;;  %v2676_v11 = vmul.f32 0.9, %v2672_v49 }
0x2b6f   :  { %v2677_v16 = vsel %vm2675_vm0, %v2672_v49, %v2676_v11 }
0x2b70   :  { %5420 = vmatmul.mubr.msk.f32.vlgmr.msra.gmra.mrb[32].mxu1 %vm791_vm9, %v2677_v16 }
0x2b71   :  { %5585 = vmatpush1.bf16.msra.mxu1 %v5584_v12  ;;  %2883 = vmatprep.mubr.f32.mxu1 %v5944_v24 }
0x2b72   :  { %5587 = vmatprep.subr.bf16.mxu1 %v5586_v13 }
0x2b75   :  { %5589 = vmatpush1.bf16.msra.mxu1 %v5588_v6 }
0x2b76   :  { %5591 = vmatprep.subr.bf16.mxu1 %v5590_v20 }
0x2b79   :  { %5593 = vmatpush1.bf16.msra.mxu1 %v5592_v25 }
0x2b7a   :  { %5595 = vmatprep.subr.bf16.mxu1 %v5594_v56 }
0x2b7d   :  { %5597 = vmatpush1.bf16.msra.mxu1 %v5596_v53 }
0x2b7e   :  { %5614 = vmatprep.subr.bf16.mxu1 %v5951_v59 }
0x2c43   :  { %v2755_v37 = vpop.f32.mrb[32].mxu1 }
0x2c44   :  { %v2756_v41 = vadd.f32 %v5043_v58, %v2755_v37  ;;  %v5421_v34 = vpop.f32.mrb[33].mxu1 }
0x2c46   :  { %vm2759_vm9 = vcmp.gt.f32.partialorder %v2756_v41, 0.0  ;;  %v2760_v44 = vmul.f32 0.9, %v2756_v41 }
0x2c48   :  { %v2761_v46 = vsel %vm2759_vm9, %v2756_v41, %v2760_v44 }
0x2c49   :  { %5045 = vmatmul.mubr.msk.f32.vlgmr.msra.gmra.mrb[34].mxu1 %vm2601_vm15, %v2761_v46  ;;  %5046 = vmatmul.mubr.msk.f32.vlgmr.msra.gmra.mrb[42].mxu0 %vm2601_vm15, %v2761_v46 }
0x2c4a   :  { %5616 = vmatpush3.bf16.msra.mxu1 %v6698_v45  ;;  %5426 = vmatprep.mubr.msk.f32.mxu1 %vm5945_vm6, %v5944_v24 }
0x2c4b   :  { %5617 = vmatprep.subr.bf16.mxu1 %v5951_v59  ;;  %5625 = vmatpush3.bf16.msra.mxu0 %v6698_v45 }
0x2c4c   :  { %5447 = vmatprep.mubr.msk.f32.mxu0 %vm5945_vm6, %v5944_v24  ;;  %5629 = vmatprep.subr.bf16.mxu0 %v5951_v59 }
0x2c4d   :  { %5427 = vmatmul.mubr.f32.vlgmr.msra.gmra.mrb[36].mxu1 %v5944_v24 }
0x2c4e   :  { %5619 = vmatpush3.bf16.msra.mxu1 %v6698_v45  ;;  %5433 = vmatprep.mubr.msk.f32.mxu1 %vm5945_vm6, %v5944_v24 }
0x2c4f   :  { %5620 = vmatprep.subr.bf16.mxu1 %v5951_v59 }
0x2d1c   :  { %v2885_v26 = vpop.f32.mrb[34].mxu1  ;;  %v6724_v48 = vpop.f32.mrb[42].mxu0 }
0x2d1d   :  { %v6726_v50 = vpop.f32.mrb[35].mxu1  ;;  %v6728_v51 = vpop.f32.mrb[43].mxu0  ;;  %v2886_v62 = vadd.f32 %v2885_v26, %v2799_v61 }
0x2d1e   :  { %v2888_v53 = vadd.f32 %v6726_v50, %v2803_v42 }
0x2d20   :  { %v3031_v28 = vpop.f32.mrb[36].mxu1 }
0x2d21   :  { %v3035_v60 = vadd.f32 %v3031_v28, %v2886_v62  ;;  %v5428_v33 = vpop.f32.mrb[37].mxu1 }
0x2d23   :  { %5814 = vtanh.f32 %v3035_v60  ;;  %v5047_v52 = vmul.f32 -1.442695, %v3035_v60 }
0x2d25   :  { %5816 = vpow2.f32 %v5047_v52 }
0x2d2d   :  { %v5815_v63 = vpop.eup %5814 }
0x2d2e   :  { %3045 = vrot.lane.b32.xlu0 %v5815_v63, %s5954_s4 }
0x2d2f   :  { %v5817_v0 = vpop.eup %5816 }
0x2d30   :  { %v3039_v1 = vadd.f32 1.0, %v5817_v0 }
0x2d32   :  { %5818 = vrcp.f32 %v3039_v1 }
0x2d3c   :  { %v5819_v18 = vpop.eup %5818 }
0x2d3d   :  { %v3043_v4 = vmul.f32 0.0, %v5819_v18 }
0x2da0   :  { %v3046_v2 = vpop.permute.xlu0 %3045 }
0x2da1   :  { %v3048_v3 = vmul.f32 %v5819_v18, %v3046_v2 }
0x2da3   :  { %3050 = vrot.lane.b32.xlu1 %v3048_v3, %s5949_s23 }
0x2e15   :  { %v3051_v57 = vpop.permute.xlu1 %3050 }
0x2e16   :  { %v3053_v32 = vadd.f32 %v3051_v57, %v3043_v4 }
0x2e18   :  { %5820 = vtanh.f32 %v3053_v32 }
0x2e22   :  { %v5821_v5 = vpop.eup %5820 }
0x2e23   :  { %3056 = vrot.lane.b32.xlu0 %v5821_v5, %s5949_s23 }
0x2e95   :  { %v3057_v49 = vpop.permute.xlu0 %3056 }
0x2e96   :  { %v3059_v7 = vmul.f32 %v5819_v18, %v3057_v49 }
0x2e98   :  { %3061 = vrot.lane.b32.xlu1 %v3059_v7, %s5942_s22 }
0x2f0a   :  { %v3062_v8 = vpop.permute.xlu1 %3061 }
0x2f0b   :  { %3064 = vst.msk [vmem:[#allocation3] sm:$0xff] %vm604_vm5, %v3062_v8  ;;  %5434 = vmatmul.mubr.msk.f32.vlgmr.msra.gmra.mrb[38].mxu1 %vm604_vm5, %v3062_v8 }
0x2f0c   :  { %5622 = vmatpush3.bf16.msra.mxu1 %v6698_v45  ;;  %5440 = vmatprep.mubr.msk.f32.mxu1 %vm5945_vm6, %v5944_v24 }
0x2f0d   :  { %5626 = vmatprep.subr.bf16.mxu1 %v5951_v59 }
0x2fde   :  { %v3133_v10 = vpop.f32.mrb[38].mxu1 }
0x2fdf   :  { %3138 = vrot.lane.b32.xlu0 %v3133_v10, %s5955_s15  ;;  %v5435_v11 = vpop.f32.mrb[39].mxu1 }
0x2fe3   :  { %3150 = vrot.lane.b32.xlu0 %v3053_v32, %s5955_s15 }
0x3051   :  { %v3139_v12 = vpop.permute.xlu0 %3138 }
0x3052   :  { %v3141_v13 = vadd.f32 %v3139_v12, %v2886_v62  ;;  %v2806_v12 = vsub.s32 2, %v6715_v19 }
0x3054   :  { %5822 = vtanh.f32 %v3141_v13  ;;  %v5049_v15 = vmul.f32 -1.442695, %v3141_v13  ;;  %v2807_v13 = vrot.slane %v6721_v47, %v2806_v12 }
0x3055   :  { %v3151_v21 = vpop.permute.xlu0 %3150 }
0x3056   :  { %5824 = vpow2.f32 %v5049_v15 }
0x305e   :  { %v5823_v54 = vpop.eup %5822 }
0x305f   :  { %3155 = vrot.lane.b32.xlu1 %v5823_v54, %s5954_s4  ;;  %v2957_v54 = vadd.f32 %v6724_v48, %v2807_v13 }
0x3060   :  { %v5825_v16 = vpop.eup %5824 }
0x3061   :  { %v3145_v17 = vadd.f32 1.0, %v5825_v16 }
0x3063   :  { %5826 = vrcp.f32 %v3145_v17 }
0x306d   :  { %v5827_v39 = vpop.eup %5826 }
0x306e   :  { %v3153_v14 = vmul.f32 %v5827_v39, %v3151_v21 }
0x30d1   :  { %v3156_v6 = vpop.permute.xlu1 %3155 }
0x30d2   :  { %v3158_v20 = vmul.f32 %v5827_v39, %v3156_v6 }
0x30d4   :  { %3160 = vrot.lane.b32.xlu1 %v3158_v20, %s5949_s23 }
0x3146   :  { %v3161_v25 = vpop.permute.xlu1 %3160 }
0x3147   :  { %v3163_v29 = vadd.f32 %v3161_v25, %v3153_v14 }
0x3149   :  { %5828 = vtanh.f32 %v3163_v29 }
0x3153   :  { %v5829_v23 = vpop.eup %5828 }
0x3154   :  { %3166 = vrot.lane.b32.xlu0 %v5829_v23, %s5949_s23 }
0x31c6   :  { %v3167_v43 = vpop.permute.xlu0 %3166 }
0x31c7   :  { %v3169_v56 = vmul.f32 %v5827_v39, %v3167_v43 }
0x31c9   :  { %3171 = vrot.lane.b32.xlu1 %v3169_v56, %s5950_s25 }
0x31cd   :  { %3256 = vrot.lane.b32.xlu1 %v3163_v29, %s5955_s15 }
0x323b   :  { %v3172_v30 = vpop.permute.xlu1 %3171 }
0x323c   :  { %3174 = vst.msk [vmem:[#allocation3 + $0x8] sm:$0xff] %vm604_vm5, %v3172_v30  ;;  %5441 = vmatmul.mubr.msk.f32.vlgmr.msra.gmra.mrb[40].mxu1 %vm604_vm5, %v3172_v30 }
0x323d   :  { %5628 = vmatpush3.bf16.msra.mxu1 %v6698_v45  ;;  %5454 = vmatprep.mubr.msk.f32.mxu1 %vm5945_vm6, %v5944_v24 }
0x323e   :  { %5632 = vmatprep.subr.bf16.mxu1 %v5951_v59 }
0x323f   :  { %v3257_v44 = vpop.permute.xlu1 %3256 }
0x330f   :  { %v3243_v35 = vpop.f32.mrb[40].mxu1 }
0x3310   :  { %v3247_v9 = vadd.f32 %v3243_v35, %v2888_v53  ;;  %v5442_v27 = vpop.f32.mrb[41].mxu1 }
0x3312   :  { %5830 = vtanh.f32 %v3247_v9  ;;  %v5051_v58 = vmul.f32 -1.442695, %v3247_v9 }
0x3314   :  { %5832 = vpow2.f32 %v5051_v58 }
0x331c   :  { %v5831_v36 = vpop.eup %5830 }
0x331d   :  { %3261 = vrot.lane.b32.xlu0 %v5831_v36, %s5954_s4 }
0x331e   :  { %v5833_v37 = vpop.eup %5832 }
0x331f   :  { %v3251_v38 = vadd.f32 1.0, %v5833_v37 }
0x3321   :  { %5834 = vrcp.f32 %v3251_v38 }
0x332b   :  { %v5835_v40 = vpop.eup %5834 }
0x332c   :  { %v3259_v46 = vmul.f32 %v5835_v40, %v3257_v44 }
0x338f   :  { %v3262_v41 = vpop.permute.xlu0 %3261 }
0x3390   :  { %v3264_v34 = vmul.f32 %v5835_v40, %v3262_v41 }
0x3392   :  { %3266 = vrot.lane.b32.xlu0 %v3264_v34, %s5949_s23 }
0x3404   :  { %v3267_v55 = vpop.permute.xlu0 %3266 }
0x3405   :  { %v3269_v22 = vadd.f32 %v3267_v55, %v3259_v46 }
0x3407   :  { %5836 = vtanh.f32 %v3269_v22 }
0x3411   :  { %v5837_v61 = vpop.eup %5836 }
0x3412   :  { %3272 = vrot.lane.b32.xlu1 %v5837_v61, %s5949_s23 }
0x3484   :  { %v3273_v26 = vpop.permute.xlu1 %3272 }
0x3485   :  { %v3275_v50 = vmul.f32 %v5835_v40, %v3273_v26  ;;  %v3831_v26 = vld [vmem:[%s7033_s16] sm:$0xff] }
0x3487   :  { %3277 = vrot.lane.b32.xlu0 %v3275_v50, %s5942_s22  ;;  %v3832_v50 = vld [vmem:[%s7033_s16 + $0x8] sm:$0xff] }
0x34f9   :  { %v3278_v62 = vpop.permute.xlu0 %3277 }
0x34fa   :  { %3280 = vst.msk [vmem:[#allocation3 + $0x10] sm:$0xff] %vm604_vm5, %v3278_v62  ;;  %5448 = vmatmul.mubr.msk.f32.vlgmr.msra.gmra.mrb[44].mxu0 %vm604_vm5, %v3278_v62  ;;  %v5638_v62 = vpack.c.bf16 %v3832_v50, %v3831_v26 }
0x34fb   :  { %5631 = vmatpush3.bf16.msra.mxu0 %v6698_v45  ;;  %5461 = vmatprep.mubr.msk.f32.mxu0 %vm5945_vm6, %v5944_v24 }
0x34fc   :  { %5635 = vmatprep.subr.bf16.mxu0 %v5951_v59 }
0x35cd   :  { %v3349_v28 = vpop.f32.mrb[44].mxu0 }
0x35ce   :  { %3354 = vrot.lane.b32.xlu1 %v3349_v28, %s5955_s15  ;;  %v5449_v60 = vpop.f32.mrb[45].mxu0 }
0x35d2   :  { %3366 = vrot.lane.b32.xlu1 %v3269_v22, %s5955_s15 }
0x3640   :  { %v3355_v33 = vpop.permute.xlu1 %3354 }
0x3641   :  { %v3357_v63 = vadd.f32 %v3355_v33, %v2888_v53 }
0x3643   :  { %5838 = vtanh.f32 %v3357_v63  ;;  %v5053_v0 = vmul.f32 -1.442695, %v3357_v63  ;;  %v3823_v63 = vld [vmem:[#allocation3] sm:$0xff] }
0x3644   :  { %v3367_v57 = vpop.permute.xlu1 %3366 }
0x3645   :  { %5840 = vpow2.f32 %v5053_v0  ;;  %v3825_v0 = vld [vmem:[#allocation3 + $0x10] sm:$0xff] }
0x364d   :  { %v5839_v52 = vpop.eup %5838 }
0x364e   :  { %3371 = vrot.lane.b32.xlu0 %v5839_v52, %s5954_s4  ;;  %v3824_v52 = vld [vmem:[#allocation3 + $0x8] sm:$0xff] }
0x364f   :  { %v5841_v1 = vpop.eup %5840 }
0x3650   :  { %v3361_v18 = vadd.f32 1.0, %v5841_v1 }
0x3652   :  { %5842 = vrcp.f32 %v3361_v18 }
0x365c   :  { %v5843_v2 = vpop.eup %5842 }
0x365d   :  { %v3369_v32 = vmul.f32 %v5843_v2, %v3367_v57 }
0x36c0   :  { %v3372_v3 = vpop.permute.xlu0 %3371 }
0x36c1   :  { %v3374_v4 = vmul.f32 %v5843_v2, %v3372_v3  ;;  %v2810_v3 = vsub.s32 3, %v6715_v19 }
0x36c3   :  { %3376 = vrot.lane.b32.xlu0 %v3374_v4, %s5949_s23  ;;  %v2811_v4 = vrot.slane %v6721_v47, %v2810_v3 }
0x36c5   :  { %v6816_v57 = vadd.f32 %v6728_v51, %v2811_v4 }
0x3735   :  { %v3377_v5 = vpop.permute.xlu0 %3376 }
0x3736   :  { %v3379_v49 = vadd.f32 %v3377_v5, %v3369_v32 }
0x3738   :  { %5844 = vtanh.f32 %v3379_v49 }
0x3742   :  { %v5845_v7 = vpop.eup %5844 }
0x3743   :  { %3382 = vrot.lane.b32.xlu1 %v5845_v7, %s5949_s23 }
0x37b5   :  { %v3383_v8 = vpop.permute.xlu1 %3382 }
0x37b6   :  { %v3385_v10 = vmul.f32 %v5843_v2, %v3383_v8 }
0x37b8   :  { %3387 = vrot.lane.b32.xlu0 %v3385_v10, %s5950_s25 }
0x37bc   :  { %3472 = vrot.lane.b32.xlu0 %v3379_v49, %s5955_s15 }
0x382a   :  { %v3388_v11 = vpop.permute.xlu0 %3387 }
0x382b   :  { %3390 = vst.msk [vmem:[#allocation3 + $0x18] sm:$0xff] %vm604_vm5, %v3388_v11  ;;  %5455 = vmatmul.mubr.msk.f32.vlgmr.msra.gmra.mrb[42].mxu1 %vm604_vm5, %v3388_v11 }
0x382c   :  { %5634 = vmatpush3.bf16.msra.mxu1 %v6698_v45  ;;  %5468 = vmatprep.mubr.msk.f32.mxu1 %vm5945_vm6, %v5944_v24 }
0x382d   :  { %5639 = vmatprep.subr.bf16.mxu1 %v5638_v62 }
0x382e   :  { %v3473_v23 = vpop.permute.xlu0 %3472 }
0x3832   :  { %v3826_v1 = vld [vmem:[#allocation3 + $0x18] sm:$0xff] }
0x38fe   :  { %v3459_v15 = vpop.f32.mrb[42].mxu1 }
0x38ff   :  { %v3463_v16 = vadd.f32 %v3459_v15, %v2957_v54  ;;  %v5456_v17 = vpop.f32.mrb[43].mxu1 }
0x3901   :  { %5846 = vtanh.f32 %v3463_v16  ;;  %v5055_v6 = vmul.f32 -1.442695, %v3463_v16 }
0x3903   :  { %5848 = vpow2.f32 %v5055_v6 }
0x390b   :  { %v5847_v39 = vpop.eup %5846 }
0x390c   :  { %3477 = vrot.lane.b32.xlu1 %v5847_v39, %s5954_s4 }
0x390d   :  { %v5849_v20 = vpop.eup %5848 }
0x390e   :  { %v3467_v21 = vadd.f32 1.0, %v5849_v20 }
0x3910   :  { %5850 = vrcp.f32 %v3467_v21 }
0x391a   :  { %v5851_v14 = vpop.eup %5850 }
0x391b   :  { %v3475_v43 = vmul.f32 %v5851_v14, %v3473_v23 }
0x397e   :  { %v3478_v25 = vpop.permute.xlu1 %3477 }
0x397f   :  { %v3480_v29 = vmul.f32 %v5851_v14, %v3478_v25  ;;  %v3969_v25 = vld [vmem:[%s7034_s17] sm:$0xff] }
0x3981   :  { %3482 = vrot.lane.b32.xlu1 %v3480_v29, %s5949_s23  ;;  %v3970_v29 = vld [vmem:[%s7034_s17 + $0x8] sm:$0xff] }
0x3982   :  { %v6841_v23 = vpack.c.bf16 %v3970_v29, %v3969_v25 }
0x39f3   :  { %v3483_v48 = vpop.permute.xlu1 %3482 }
0x39f4   :  { %v3485_v56 = vadd.f32 %v3483_v48, %v3475_v43 }
0x39f6   :  { %5852 = vtanh.f32 %v3485_v56 }
0x3a00   :  { %v5853_v30 = vpop.eup %5852 }
0x3a01   :  { %3488 = vrot.lane.b32.xlu0 %v5853_v30, %s5949_s23 }
0x3a73   :  { %v3489_v31 = vpop.permute.xlu0 %3488 }
0x3a74   :  { %v3491_v42 = vmul.f32 %v5851_v14, %v3489_v31  ;;  %v6861_v31 = vld [vmem:[%s7035_s18] ss:$0 sm:$0xff] }
0x3a76   :  { %3493 = vrot.lane.b32.xlu1 %v3491_v42, %s5942_s22 }
0x3ae8   :  { %v3494_v53 = vpop.permute.xlu1 %3493 }
0x3ae9   :  { %3496 = vst.msk [vmem:[#allocation3 + $0x20] sm:$0xff] %vm604_vm5, %v3494_v53  ;;  %5462 = vmatmul.mubr.msk.f32.vlgmr.msra.gmra.mrb[46].mxu0 %vm604_vm5, %v3494_v53 }
0x3aea   :  { %5637 = vmatpush3.bf16.msra.mxu0 %v6698_v45  ;;  %5475 = vmatprep.mubr.msk.f32.mxu0 %vm5945_vm6, %v5944_v24 }
0x3aeb   :  { %5642 = vmatprep.subr.bf16.mxu0 %v5951_v59 }
0x3af0   :  { %v3827_v18 = vld [vmem:[#allocation3 + $0x20] sm:$0xff] }
0x3bbc   :  { %v3565_v35 = vpop.f32.mrb[46].mxu0 }
0x3bbd   :  { %3570 = vrot.lane.b32.xlu0 %v3565_v35, %s5955_s15  ;;  %v5463_v9 = vpop.f32.mrb[47].mxu0 }
0x3bc1   :  { %3582 = vrot.lane.b32.xlu0 %v3485_v56, %s5955_s15 }
0x3c2f   :  { %v3571_v27 = vpop.permute.xlu0 %3570 }
0x3c30   :  { %v3573_v36 = vadd.f32 %v3571_v27, %v2957_v54 }
0x3c32   :  { %5854 = vtanh.f32 %v3573_v36  ;;  %v5057_v37 = vmul.f32 -1.442695, %v3573_v36 }
0x3c33   :  { %v3583_v44 = vpop.permute.xlu0 %3582 }
0x3c34   :  { %5856 = vpow2.f32 %v5057_v37 }
0x3c3c   :  { %v5855_v58 = vpop.eup %5854 }
0x3c3d   :  { %3587 = vrot.lane.b32.xlu1 %v5855_v58, %s5954_s4 }
0x3c3e   :  { %v5857_v45 = vpop.eup %5856 }
0x3c3f   :  { %v3577_v38 = vadd.f32 1.0, %v5857_v45 }
0x3c41   :  { %5858 = vrcp.f32 %v3577_v38 }
0x3c4b   :  { %v5859_v40 = vpop.eup %5858 }
0x3c4c   :  { %v3585_v46 = vmul.f32 %v5859_v40, %v3583_v44 }
0x3caf   :  { %v3588_v41 = vpop.permute.xlu1 %3587 }
0x3cb0   :  { %v3590_v34 = vmul.f32 %v5859_v40, %v3588_v41 }
0x3cb2   :  { %3592 = vrot.lane.b32.xlu1 %v3590_v34, %s5949_s23 }
0x3d24   :  { %v3593_v55 = vpop.permute.xlu1 %3592 }
0x3d25   :  { %v3595_v22 = vadd.f32 %v3593_v55, %v3585_v46 }
0x3d27   :  { %5860 = vtanh.f32 %v3595_v22 }
0x3d31   :  { %v5861_v61 = vpop.eup %5860 }
0x3d32   :  { %3598 = vrot.lane.b32.xlu0 %v5861_v61, %s5949_s23 }
0x3da4   :  { %v3599_v28 = vpop.permute.xlu0 %3598 }
0x3da5   :  { %v3601_v60 = vmul.f32 %v5859_v40, %v3599_v28 }
0x3da7   :  { %3603 = vrot.lane.b32.xlu1 %v3601_v60, %s5950_s25 }
0x3dab   :  { %3688 = vrot.lane.b32.xlu1 %v3595_v22, %s5955_s15 }
0x3e19   :  { %v3604_v33 = vpop.permute.xlu1 %3603 }
0x3e1a   :  { %3606 = vst.msk [vmem:[#allocation3 + $0x28] sm:$0xff] %vm604_vm5, %v3604_v33  ;;  %5469 = vmatmul.mubr.msk.f32.vlgmr.msra.gmra.mrb[44].mxu1 %vm604_vm5, %v3604_v33 }
0x3e1b   :  { %5641 = vmatpush3.bf16.msra.mxu1 %v5638_v62  ;;  %5482 = vmatprep.mubr.msk.f32.mxu1 %vm604_vm5, %v3823_v63 }
0x3e1c   :  { %5654 = vmatprep.subr.bf16.mxu1 %v5951_v59 }
0x3e1d   :  { %v3689_v39 = vpop.permute.xlu1 %3688 }
0x3e1e   :  { %5483 = vmatmul.mubr.msk.f32.vlgmr.msra.gmra.mrb[46].mxu1 %vm604_vm5, %v3824_v52 }
0x3e1f   :  { %5485 = vmatprep.mubr.msk.f32.mxu1 %vm604_vm5, %v3825_v0  ;;  %5656 = vmatpush3.bf16.msra.mxu1 %v6841_v23 }
0x3e20   :  { %5660 = vmatprep.subr.bf16.mxu1 %v5951_v59 }
0x3e21   :  { %v3828_v2 = vld [vmem:[#allocation3 + $0x28] sm:$0xff] }
0x3e22   :  { %5486 = vmatmul.mubr.msk.f32.gmra.mrb[48].mxu1 %vm604_vm5, %v3826_v1 }
0x3e23   :  { %5488 = vmatprep.mubr.msk.f32.mxu1 %vm604_vm5, %v3827_v18 }
0x3e26   :  { %5489 = vmatmul.mubr.msk.f32.gmra.mrb[50].mxu1 %vm604_vm5, %v3828_v2 }
0x3eed   :  { %v3675_v32 = vpop.f32.mrb[44].mxu1 }
0x3eee   :  { %v3679_v5 = vadd.f32 %v3675_v32, %v6816_v57  ;;  %v5470_v49 = vpop.f32.mrb[45].mxu1 }
0x3ef0   :  { %5862 = vtanh.f32 %v3679_v5  ;;  %v5059_v47 = vmul.f32 -1.442695, %v3679_v5 }
0x3ef1   :  { %v6819_v7 = vpop.f32.mrb[46].mxu1 }
0x3ef2   :  { %v3930_v8 = vpop.f32.mrb[47].mxu1  ;;  %5864 = vpow2.f32 %v5059_v47  ;;  %v3936_v62 = vadd.f32 %v6819_v7, %v6861_v31 }
0x3ef3   :  { %v3931_v35 = vadd.f32 %v6861_v31, %v3930_v8 }
0x3ef5   :  { %v6821_v10 = vpop.f32.mrb[48].mxu1 }
0x3ef6   :  { %v6823_v11 = vpop.f32.mrb[49].mxu1 }
0x3ef7   :  { %v3941_v47 = vadd.f32 %v6861_v31, %v6823_v11 }
0x3ef9   :  { %v6825_v12 = vpop.f32.mrb[50].mxu1 }
0x3efa   :  { %v5863_v19 = vpop.eup %5862  ;;  %v6827_v13 = vpop.f32.mrb[51].mxu1 }
0x3efb   :  { %3693 = vrot.lane.b32.xlu0 %v5863_v19, %s5954_s4 }
0x3efc   :  { %v5865_v51 = vpop.eup %5864 }
0x3efd   :  { %v3683_v54 = vadd.f32 1.0, %v5865_v51 }
0x3eff   :  { %5866 = vrcp.f32 %v3683_v54 }
0x3f09   :  { %v5867_v15 = vpop.eup %5866 }
0x3f0a   :  { %v3691_v6 = vmul.f32 %v5867_v15, %v3689_v39 }
0x3f6d   :  { %v3694_v16 = vpop.permute.xlu0 %3693 }
0x3f6e   :  { %v3696_v17 = vmul.f32 %v5867_v15, %v3694_v16 }
0x3f70   :  { %3698 = vrot.lane.b32.xlu0 %v3696_v17, %s5949_s23 }
0x3fe2   :  { %v3699_v20 = vpop.permute.xlu0 %3698 }
0x3fe3   :  { %v6831_v21 = vadd.f32 %v3699_v20, %v3691_v6 }
0x3fe5   :  { %5868 = vtanh.f32 %v6831_v21 }
0x3fef   :  { %v5869_v14 = vpop.eup %5868 }
0x3ff0   :  { %3704 = vrot.lane.b32.xlu1 %v5869_v14, %s5949_s23 }
0x4062   :  { %v3705_v43 = vpop.permute.xlu1 %3704 }
0x4063   :  { %v3707_v48 = vmul.f32 %v5867_v15, %v3705_v43 }
0x4065   :  { %3709 = vrot.lane.b32.xlu0 %v3707_v48, %s5942_s22 }
0x40d7   :  { %v3710_v56 = vpop.permute.xlu0 %3709 }
0x40d8   :  { %3712 = vst.msk [vmem:[#allocation3 + $0x30] sm:$0xff] %vm604_vm5, %v3710_v56  ;;  %5476 = vmatmul.mubr.msk.f32.vlgmr.msra.gmra.mrb[48].mxu0 %vm604_vm5, %v3710_v56 }
0x40d9   :  { %5644 = vmatpush3.bf16.msra.mxu0 %v6841_v23  ;;  %5498 = vmatprep.mubr.msk.f32.mxu0 %vm5945_vm6, %v5944_v24 }
0x40da   :  { %5645 = vmatprep.subr.bf16.mxu0 %v5951_v59 }
0x40dc   :  { %5499 = vmatmul.mubr.f32.vlgmr.msra.gmra.mrb[50].mxu0 %v5944_v24 }
0x40dd   :  { %5647 = vmatpush3.bf16.msra.mxu0 %v6841_v23  ;;  %5505 = vmatprep.mubr.msk.f32.mxu0 %vm5945_vm6, %v5944_v24 }
0x40de   :  { %5648 = vmatprep.subr.bf16.mxu0 %v5951_v59 }
0x40df   :  { %v3829_v30 = vld [vmem:[#allocation3 + $0x30] sm:$0xff] }
0x40e0   :  { %5491 = vmatprep.mubr.msk.f32.mxu1 %vm604_vm5, %v3829_v30 }
0x41ab   :  { %v6863_v42 = vpop.f32.mrb[48].mxu0 }
0x41ac   :  { %v5477_v53 = vpop.f32.mrb[49].mxu0 }
0x41af   :  { %v4037_v9 = vpop.f32.mrb[50].mxu0 }
0x41b0   :  { %v4041_v27 = vadd.f32 %v4037_v9, %v3931_v35  ;;  %v5500_v36 = vpop.f32.mrb[51].mxu0 }
0x41b1   :  { %v3946_v36 = vadd.f32 %v6821_v10, %v6861_v31 }
0x41b2   :  { %5870 = vtanh.f32 %v4041_v27  ;;  %v5071_v37 = vmul.f32 -1.442695, %v4041_v27 }
0x41b4   :  { %5872 = vpow2.f32 %v5071_v37 }
0x41bc   :  { %v5871_v58 = vpop.eup %5870 }
0x41bd   :  { %4051 = vrot.lane.b32.xlu1 %v5871_v58, %s5954_s4 }
0x41be   :  { %v5873_v45 = vpop.eup %5872 }
0x41bf   :  { %v4045_v38 = vadd.f32 1.0, %v5873_v45 }
0x41c1   :  { %5874 = vrcp.f32 %v4045_v38 }
0x41cb   :  { %v5875_v40 = vpop.eup %5874 }
0x41cc   :  { %v4049_v44 = vmul.f32 0.0, %v5875_v40 }
0x422f   :  { %v4052_v41 = vpop.permute.xlu1 %4051 }
0x4230   :  { %v4054_v34 = vmul.f32 %v5875_v40, %v4052_v41 }
0x4232   :  { %4056 = vrot.lane.b32.xlu0 %v4054_v34, %s5949_s23 }
0x42a4   :  { %v4057_v46 = vpop.permute.xlu0 %4056 }
0x42a5   :  { %v4059_v55 = vadd.f32 %v4057_v46, %v4049_v44 }
0x42a7   :  { %5876 = vtanh.f32 %v4059_v55 }
0x42b1   :  { %v5877_v22 = vpop.eup %5876 }
0x42b2   :  { %4062 = vrot.lane.b32.xlu1 %v5877_v22, %s5949_s23 }
0x4324   :  { %v4063_v61 = vpop.permute.xlu1 %4062 }
0x4325   :  { %v4065_v26 = vmul.f32 %v5875_v40, %v4063_v61 }
0x4327   :  { %4067 = vrot.lane.b32.xlu0 %v4065_v26, %s5942_s22 }
0x4399   :  { %v4068_v50 = vpop.permute.xlu0 %4067 }
0x439a   :  { %4070 = vst.msk [vmem:[#allocation3] sm:$0xff] %vm604_vm5, %v4068_v50  ;;  %5506 = vmatmul.mubr.msk.f32.vlgmr.msra.gmra.mrb[52].mxu0 %vm604_vm5, %v4068_v50 }
0x439b   :  { %5650 = vmatpush3.bf16.msra.mxu0 %v6841_v23  ;;  %5512 = vmatprep.mubr.msk.f32.mxu0 %vm5945_vm6, %v5944_v24 }
0x439c   :  { %5651 = vmatprep.subr.bf16.mxu0 %v5951_v59 }
0x446d   :  { %v4139_v28 = vpop.f32.mrb[52].mxu0 }
0x446e   :  { %v4143_v60 = vadd.f32 %v4139_v28, %v3936_v62  ;;  %v5507_v33 = vpop.f32.mrb[53].mxu0 }
0x4470   :  { %5878 = vtanh.f32 %v4143_v60  ;;  %v5073_v52 = vmul.f32 -1.442695, %v4143_v60 }
0x4472   :  { %5880 = vpow2.f32 %v5073_v52 }
0x447a   :  { %v5879_v63 = vpop.eup %5878 }
0x447b   :  { %4153 = vrot.lane.b32.xlu1 %v5879_v63, %s5954_s4 }
0x447c   :  { %v5881_v0 = vpop.eup %5880 }
0x447d   :  { %v4147_v1 = vadd.f32 1.0, %v5881_v0 }
0x447f   :  { %5882 = vrcp.f32 %v4147_v1 }
0x4489   :  { %v5883_v18 = vpop.eup %5882 }
0x448a   :  { %v4151_v4 = vmul.f32 %v5883_v18, %v4059_v55 }
0x44ed   :  { %v4154_v2 = vpop.permute.xlu1 %4153 }
0x44ee   :  { %v4156_v3 = vmul.f32 %v5883_v18, %v4154_v2 }
0x44f0   :  { %4158 = vrot.lane.b32.xlu0 %v4156_v3, %s5949_s23 }
0x4562   :  { %v4159_v32 = vpop.permute.xlu0 %4158 }
0x4563   :  { %v4161_v5 = vadd.f32 %v4159_v32, %v4151_v4 }
0x4565   :  { %5884 = vtanh.f32 %v4161_v5 }
0x456f   :  { %v5885_v49 = vpop.eup %5884 }
0x4570   :  { %4164 = vrot.lane.b32.xlu1 %v5885_v49, %s5949_s23 }
0x45e2   :  { %v4165_v7 = vpop.permute.xlu1 %4164 }
0x45e3   :  { %v4167_v8 = vmul.f32 %v5883_v18, %v4165_v7  ;;  %v3951_v7 = vadd.f32 %v6861_v31, %v6827_v13 }
0x45e5   :  { %4169 = vrot.lane.b32.xlu0 %v4167_v8, %s5942_s22 }
0x4657   :  { %v4170_v19 = vpop.permute.xlu0 %4169 }
0x4658   :  { %4172 = vst.msk [vmem:[#allocation3 + $0x8] sm:$0xff] %vm604_vm5, %v4170_v19  ;;  %5513 = vmatmul.mubr.msk.f32.vlgmr.msra.gmra.mrb[54].mxu0 %vm604_vm5, %v4170_v19 }
0x4659   :  { %5653 = vmatpush3.bf16.msra.mxu0 %v6841_v23  ;;  %5519 = vmatprep.mubr.msk.f32.mxu0 %vm5945_vm6, %v5944_v24 }
0x465a   :  { %5657 = vmatprep.subr.bf16.mxu0 %v5951_v59 }
0x472b   :  { %v4241_v51 = vpop.f32.mrb[54].mxu0 }
0x472c   :  { %v4245_v54 = vadd.f32 %v4241_v51, %v3941_v47  ;;  %v5514_v15 = vpop.f32.mrb[55].mxu0 }
0x472e   :  { %5886 = vtanh.f32 %v4245_v54  ;;  %v5075_v17 = vmul.f32 -1.442695, %v4245_v54 }
0x4730   :  { %5888 = vpow2.f32 %v5075_v17 }
0x4738   :  { %v5887_v16 = vpop.eup %5886 }
0x4739   :  { %4255 = vrot.lane.b32.xlu1 %v5887_v16, %s5954_s4 }
0x473a   :  { %v5889_v39 = vpop.eup %5888 }
0x473b   :  { %v4249_v6 = vadd.f32 1.0, %v5889_v39 }
0x473d   :  { %5890 = vrcp.f32 %v4249_v6 }
0x4747   :  { %v5891_v20 = vpop.eup %5890 }
0x4748   :  { %v4253_v29 = vmul.f32 %v5891_v20, %v4161_v5 }
0x47ab   :  { %v4256_v14 = vpop.permute.xlu1 %4255 }
0x47ac   :  { %v4258_v25 = vmul.f32 %v5891_v20, %v4256_v14 }
0x47ae   :  { %4260 = vrot.lane.b32.xlu0 %v4258_v25, %s5949_s23 }
0x4820   :  { %v4261_v43 = vpop.permute.xlu0 %4260 }
0x4821   :  { %v4263_v11 = vadd.f32 %v4261_v43, %v4253_v29 }
0x4823   :  { %5892 = vtanh.f32 %v4263_v11 }
0x482d   :  { %v5893_v48 = vpop.eup %5892 }
0x482e   :  { %4266 = vrot.lane.b32.xlu1 %v5893_v48, %s5949_s23  ;;  %v3956_v48 = vadd.f32 %v6825_v12, %v6861_v31 }
0x4832   :  { %3786 = vrot.lane.b32.xlu1 %v6863_v42, %s5955_s15 }
0x48a0   :  { %v4267_v56 = vpop.permute.xlu1 %4266 }
0x48a1   :  { %v4269_v30 = vmul.f32 %v5891_v20, %v4267_v56 }
0x48a3   :  { %4271 = vrot.lane.b32.xlu0 %v4269_v30, %s5942_s22 }
0x48a4   :  { %v3787_v53 = vpop.permute.xlu1 %3786 }
0x48a5   :  { %v3789_v35 = vadd.f32 %v3787_v53, %v6816_v57 }
0x48a7   :  { %5894 = vtanh.f32 %v3789_v35  ;;  %v5061_v57 = vmul.f32 -1.442695, %v3789_v35 }
0x48a9   :  { %5896 = vpow2.f32 %v5061_v57 }
0x48b1   :  { %v5895_v9 = vpop.eup %5894 }
0x48b2   :  { %3803 = vrot.lane.b32.xlu0 %v5895_v9, %s5954_s4 }
0x48b3   :  { %v5897_v42 = vpop.eup %5896 }
0x48b6   :  { %3798 = vrot.lane.b32.xlu0 %v6831_v21, %s5955_s15  ;;  %v3793_v21 = vadd.f32 1.0, %v5897_v42 }
0x4915   :  { %v4272_v27 = vpop.permute.xlu0 %4271 }
0x4916   :  { %4274 = vst.msk [vmem:[#allocation3 + $0x10] sm:$0xff] %vm604_vm5, %v4272_v27  ;;  %5520 = vmatmul.mubr.msk.f32.vlgmr.msra.gmra.mrb[56].mxu0 %vm604_vm5, %v4272_v27 }
0x4917   :  { %5659 = vmatpush3.bf16.msra.mxu0 %v6841_v23  ;;  %5533 = vmatprep.mubr.msk.f32.mxu0 %vm5945_vm6, %v5944_v24 }
0x4918   :  { %5663 = vmatprep.subr.bf16.mxu0 %v5951_v59 }
0x4924   :  { %v3804_v40 = vpop.permute.xlu0 %3803 }
0x4928   :  { %v3799_v55 = vpop.permute.xlu0 %3798 }
0x49e9   :  { %v4343_v58 = vpop.f32.mrb[56].mxu0 }
0x49ea   :  { %v4347_v37 = vadd.f32 %v4343_v58, %v3946_v36  ;;  %v5521_v45 = vpop.f32.mrb[57].mxu0 }
0x49eb   :  { %v4794_v45 = vld [vmem:[%s7036_s19 + $0x8] sm:$0xff] }
0x49ec   :  { %5898 = vtanh.f32 %v4347_v37  ;;  %v5077_v59 = vmul.f32 -1.442695, %v4347_v37  ;;  %v4793_v37 = vld [vmem:[%s7036_s19] sm:$0xff] }
0x49ed   :  { %5900 = vrcp.f32 %v3793_v21 }
0x49ee   :  { %5902 = vpow2.f32 %v5077_v59  ;;  %v4785_v59 = vld [vmem:[#allocation3] sm:$0xff] }
0x49f6   :  { %v5899_v38 = vpop.eup %5898 }
0x49f7   :  { %4357 = vrot.lane.b32.xlu1 %v5899_v38, %s5954_s4  ;;  %v5901_v41 = vpop.eup %5900  ;;  %v5666_v38 = vpack.c.bf16 %v4794_v45, %v4793_v37 }
0x49f8   :  { %v3806_v34 = vmul.f32 %v5901_v41, %v3804_v40  ;;  %v5903_v44 = vpop.eup %5902  ;;  %v3801_v26 = vmul.f32 %v5901_v41, %v3799_v55 }
0x49f9   :  { %v4351_v46 = vadd.f32 1.0, %v5903_v44  ;;  %v4786_v44 = vld [vmem:[#allocation3 + $0x8] sm:$0xff] }
0x49fb   :  { %3808 = vrot.lane.b32.xlu1 %v3806_v34, %s5949_s23  ;;  %5904 = vrcp.f32 %v4351_v46  ;;  %v4787_v46 = vld [vmem:[#allocation3 + $0x10] sm:$0xff] }
0x4a05   :  { %v5905_v10 = vpop.eup %5904 }
0x4a06   :  { %v4355_v60 = vmul.f32 %v5905_v10, %v4263_v11 }
0x4a69   :  { %v4358_v22 = vpop.permute.xlu1 %4357 }
0x4a6a   :  { %v4360_v61 = vmul.f32 %v5905_v10, %v4358_v22 }
0x4a6c   :  { %4362 = vrot.lane.b32.xlu0 %v4360_v61, %s5949_s23 }
0x4a6d   :  { %v3809_v50 = vpop.permute.xlu1 %3808 }
0x4a6e   :  { %v3811_v62 = vadd.f32 %v3809_v50, %v3801_v26 }
0x4a70   :  { %5906 = vtanh.f32 %v3811_v62 }
0x4a7a   :  { %v5907_v28 = vpop.eup %5906 }
0x4a7b   :  { %3814 = vrot.lane.b32.xlu1 %v5907_v28, %s5949_s23  ;;  %v6967_v28 = vld [vmem:[%s7037_s20] ss:$0 sm:$0xff] }
0x4ade   :  { %v4363_v33 = vpop.permute.xlu0 %4362 }
0x4adf   :  { %v4365_v63 = vadd.f32 %v4363_v33, %v4355_v60 }
0x4ae1   :  { %5908 = vtanh.f32 %v4365_v63 }
0x4aeb   :  { %v5909_v52 = vpop.eup %5908 }
0x4aec   :  { %4368 = vrot.lane.b32.xlu0 %v5909_v52, %s5949_s23 }
0x4aed   :  { %v3815_v0 = vpop.permute.xlu1 %3814 }
0x4aee   :  { %v3817_v1 = vmul.f32 %v5901_v41, %v3815_v0 }
0x4af0   :  { %3819 = vrot.lane.b32.xlu1 %v3817_v1, %s5950_s25 }
0x4b5e   :  { %v4369_v18 = vpop.permute.xlu0 %4368 }
0x4b5f   :  { %v4371_v2 = vmul.f32 %v5905_v10, %v4369_v18 }
0x4b61   :  { %4373 = vrot.lane.b32.xlu0 %v4371_v2, %s5942_s22 }
0x4b62   :  { %v3820_v3 = vpop.permute.xlu1 %3819 }
0x4b63   :  { %3822 = vst.msk [vmem:[#allocation3 + $0x38] sm:$0xff] %vm604_vm5, %v3820_v3 }
0x4b6a   :  { %v3830_v4 = vld [vmem:[#allocation3 + $0x38] sm:$0xff] }
0x4b6b   :  { %5492 = vmatmul.mubr.msk.f32.gmra.mrb[52].mxu1 %vm604_vm5, %v3830_v4 }
0x4b6c   :  { %5526 = vmatprep.mubr.msk.f32.mxu1 %vm5945_vm6, %v5944_v24 }
0x4bd3   :  { %v4374_v32 = vpop.permute.xlu0 %4373 }
0x4bd4   :  { %4376 = vst.msk [vmem:[#allocation3 + $0x18] sm:$0xff] %vm604_vm5, %v4374_v32  ;;  %5527 = vmatmul.mubr.msk.f32.vlgmr.msra.gmra.mrb[54].mxu1 %vm604_vm5, %v4374_v32 }
0x4bd5   :  { %5662 = vmatpush3.bf16.msra.mxu1 %v6841_v23  ;;  %5540 = vmatprep.mubr.msk.f32.mxu1 %vm5945_vm6, %v5944_v24 }
0x4bd6   :  { %5667 = vmatprep.subr.bf16.mxu1 %v5666_v38 }
0x4bdb   :  { %v4788_v10 = vld [vmem:[#allocation3 + $0x18] sm:$0xff] }
0x4c3e   :  { %v6924_v5 = vpop.f32.mrb[52].mxu1 }
0x4c3f   :  { %v6926_v49 = vpop.f32.mrb[53].mxu1 }
0x4c40   :  { %v3961_v61 = vadd.f32 %v6861_v31, %v6926_v49 }
0x4ca7   :  { %v4445_v8 = vpop.f32.mrb[54].mxu1 }
0x4ca8   :  { %v4449_v19 = vadd.f32 %v4445_v8, %v3951_v7  ;;  %v5528_v47 = vpop.f32.mrb[55].mxu1 }
0x4caa   :  { %5910 = vtanh.f32 %v4449_v19  ;;  %v5079_v54 = vmul.f32 -1.442695, %v4449_v19 }
0x4cac   :  { %5912 = vpow2.f32 %v5079_v54 }
0x4cb4   :  { %v5911_v51 = vpop.eup %5910 }
0x4cb5   :  { %4459 = vrot.lane.b32.xlu1 %v5911_v51, %s5954_s4 }
0x4cb6   :  { %v5913_v15 = vpop.eup %5912 }
0x4cb7   :  { %v4453_v16 = vadd.f32 1.0, %v5913_v15 }
0x4cb9   :  { %5914 = vrcp.f32 %v4453_v16 }
0x4cc3   :  { %v5915_v17 = vpop.eup %5914 }
0x4cc4   :  { %v4457_v20 = vmul.f32 %v5915_v17, %v4365_v63 }
0x4d27   :  { %v4460_v39 = vpop.permute.xlu1 %4459 }
0x4d28   :  { %v4462_v6 = vmul.f32 %v5915_v17, %v4460_v39 }
0x4d2a   :  { %4464 = vrot.lane.b32.xlu0 %v4462_v6, %s5949_s23 }
0x4d9c   :  { %v4465_v14 = vpop.permute.xlu0 %4464 }
0x4d9d   :  { %v4467_v13 = vadd.f32 %v4465_v14, %v4457_v20 }
0x4d9f   :  { %5916 = vtanh.f32 %v4467_v13 }
0x4da9   :  { %v5917_v25 = vpop.eup %5916 }
0x4daa   :  { %4470 = vrot.lane.b32.xlu1 %v5917_v25, %s5949_s23 }
0x4e1c   :  { %v4471_v29 = vpop.permute.xlu1 %4470 }
0x4e1d   :  { %v4473_v43 = vmul.f32 %v5915_v17, %v4471_v29 }
0x4e1f   :  { %4475 = vrot.lane.b32.xlu0 %v4473_v43, %s5942_s22 }
0x4e91   :  { %v4476_v11 = vpop.permute.xlu0 %4475 }
0x4e92   :  { %4478 = vst.msk [vmem:[#allocation3 + $0x20] sm:$0xff] %vm604_vm5, %v4476_v11  ;;  %5534 = vmatmul.mubr.msk.f32.vlgmr.msra.gmra.mrb[58].mxu0 %vm604_vm5, %v4476_v11 }
0x4e93   :  { %5665 = vmatpush3.bf16.msra.mxu0 %v6841_v23  ;;  %5547 = vmatprep.mubr.msk.f32.mxu0 %vm5945_vm6, %v5944_v24 }
0x4e99   :  { %v4789_v55 = vld [vmem:[#allocation3 + $0x20] sm:$0xff] }
0x4f65   :  { %v4547_v56 = vpop.f32.mrb[58].mxu0 }
0x4f66   :  { %v4551_v30 = vadd.f32 %v4547_v56, %v3956_v48  ;;  %v5535_v53 = vpop.f32.mrb[59].mxu0 }
0x4f68   :  { %5918 = vtanh.f32 %v4551_v30  ;;  %v5081_v9 = vmul.f32 -1.442695, %v4551_v30 }
0x4f6a   :  { %5920 = vpow2.f32 %v5081_v9 }
0x4f72   :  { %v5919_v35 = vpop.eup %5918 }
0x4f73   :  { %4561 = vrot.lane.b32.xlu1 %v5919_v35, %s5954_s4 }
0x4f74   :  { %v5921_v27 = vpop.eup %5920 }
0x4f75   :  { %v4555_v57 = vadd.f32 1.0, %v5921_v27 }
0x4f77   :  { %5922 = vrcp.f32 %v4555_v57 }
0x4f81   :  { %v5923_v42 = vpop.eup %5922 }
0x4f82   :  { %v4559_v24 = vmul.f32 %v5923_v42, %v4467_v13 }
0x4fe5   :  { %v4562_v23 = vpop.permute.xlu1 %4561 }
0x4fe6   :  { %v4564_v36 = vmul.f32 %v5923_v42, %v4562_v23  ;;  %v3966_v23 = vadd.f32 %v6924_v5, %v6861_v31 }
0x4fe8   :  { %4566 = vrot.lane.b32.xlu0 %v4564_v36, %s5949_s23 }
0x505a   :  { %v4567_v58 = vpop.permute.xlu0 %4566 }
0x505b   :  { %v6943_v12 = vadd.f32 %v4567_v58, %v4559_v24 }
0x505d   :  { %5924 = vtanh.f32 %v6943_v12 }
0x5067   :  { %v5925_v21 = vpop.eup %5924 }
0x5068   :  { %4572 = vrot.lane.b32.xlu1 %v5925_v21, %s5949_s23 }
0x50da   :  { %v4573_v40 = vpop.permute.xlu1 %4572 }
0x50db   :  { %v4575_v41 = vmul.f32 %v5923_v42, %v4573_v40 }
0x50dd   :  { %4577 = vrot.lane.b32.xlu0 %v4575_v41, %s5942_s22 }
0x514f   :  { %v4578_v34 = vpop.permute.xlu0 %4577 }
0x5150   :  { %4580 = vst.msk [vmem:[#allocation3 + $0x28] sm:$0xff] %vm604_vm5, %v4578_v34  ;;  %5541 = vmatmul.mubr.msk.f32.vlgmr.msra.gmra.mrb[56].mxu1 %vm604_vm5, %v4578_v34 }
0x5151   :  { %5669 = vmatpush3.bf16.msra.mxu1 %v5666_v38  ;;  %5554 = vmatprep.mubr.msk.f32.mxu1 %vm604_vm5, %v4785_v59 }
0x5154   :  { %5555 = vmatmul.mubr.msk.f32.vlgmr.msra.gmra.mrb[58].mxu1 %vm604_vm5, %v4786_v44 }
0x5155   :  { %5557 = vmatprep.mubr.msk.f32.mxu1 %vm604_vm5, %v4787_v46 }
0x5157   :  { %v4790_v22 = vld [vmem:[#allocation3 + $0x28] sm:$0xff] }
0x5158   :  { %5558 = vmatmul.mubr.msk.f32.gmra.mrb[60].mxu1 %vm604_vm5, %v4788_v10 }
0x5159   :  { %5560 = vmatprep.mubr.msk.f32.mxu1 %vm604_vm5, %v4789_v55 }
0x515c   :  { %5561 = vmatmul.mubr.msk.f32.gmra.mrb[62].mxu1 %vm604_vm5, %v4790_v22 }
0x5223   :  { %v4649_v26 = vpop.f32.mrb[56].mxu1 }
0x5224   :  { %v4653_v50 = vadd.f32 %v4649_v26, %v3961_v61  ;;  %v5542_v62 = vpop.f32.mrb[57].mxu1 }
0x5226   :  { %5926 = vtanh.f32 %v4653_v50  ;;  %v5083_v13 = vmul.f32 -1.442695, %v4653_v50 }
0x5227   :  { %v5556_v60 = vpop.f32.mrb[58].mxu1 }
0x5228   :  { %v4898_v33 = vadd.f32 %v5556_v60, %v6967_v28  ;;  %v4892_v63 = vpop.f32.mrb[59].mxu1  ;;  %5928 = vpow2.f32 %v5083_v13 }
0x5229   :  { %v4893_v52 = vadd.f32 %v6967_v28, %v4892_v63 }
0x522a   :  { %vm4932_vm6 = vcmp.gt.f32.partialorder %v4898_v33, 0.0  ;;  %v4940_v0 = vmul.f32 0.9, %v4898_v33 }
0x522b   :  { %vm4931_vm1 = vcmp.gt.f32.partialorder %v4893_v52, 0.0  ;;  %v4939_v1 = vmul.f32 0.9, %v4893_v52  ;;  %v5559_v18 = vpop.f32.mrb[60].mxu1 }
0x522c   :  { %v4948_v2 = vsel %vm4932_vm6, %v4898_v33, %v4940_v0  ;;  %v4908_v3 = vadd.f32 %v5559_v18, %v6967_v28  ;;  %v4902_v4 = vpop.f32.mrb[61].mxu1 }
0x522d   :  { %4956 = vst [vmem:[%s7038_s21 + $0x8] sm:$0xff] %v4948_v2  ;;  %v4947_v32 = vsel %vm4931_vm1, %v4893_v52, %v4939_v1  ;;  %v4903_v49 = vadd.f32 %v6967_v28, %v4902_v4 }
0x522e   :  { %4955 = vst [vmem:[%s7038_s21] sm:$0xff] %v4947_v32  ;;  %vm4934_vm2 = vcmp.gt.f32.partialorder %v4908_v3, 0.0  ;;  %v4942_v7 = vmul.f32 0.9, %v4908_v3 }
0x522f   :  { %vm4933_vm3 = vcmp.gt.f32.partialorder %v4903_v49, 0.0  ;;  %v4941_v8 = vmul.f32 0.9, %v4903_v49  ;;  %v5562_v19 = vpop.f32.mrb[62].mxu1 }
0x5230   :  { %v5927_v47 = vpop.eup %5926  ;;  %v4950_v51 = vsel %vm4934_vm2, %v4908_v3, %v4942_v7  ;;  %v4918_v54 = vadd.f32 %v5562_v19, %v6967_v28  ;;  %v4912_v15 = vpop.f32.mrb[63].mxu1 }
0x5231   :  { %4958 = vst [vmem:[%s7038_s21 + $0x18] sm:$0xff] %v4950_v51  ;;  %v4949_v16 = vsel %vm4933_vm3, %v4903_v49, %v4941_v8  ;;  %v4913_v17 = vadd.f32 %v6967_v28, %v4912_v15  ;;  %4663 = vrot.lane.b32.xlu1 %v5927_v47, %s5954_s4 }
0x5232   :  { %4957 = vst [vmem:[%s7038_s21 + $0x10] sm:$0xff] %v4949_v16  ;;  %vm4936_vm4 = vcmp.gt.f32.partialorder %v4918_v54, 0.0  ;;  %v4944_v39 = vmul.f32 0.9, %v4918_v54  ;;  %v5929_v25 = vpop.eup %5928 }
0x5233   :  { %vm4935_vm7 = vcmp.gt.f32.partialorder %v4913_v17, 0.0  ;;  %v4943_v6 = vmul.f32 0.9, %v4913_v17  ;;  %v4657_v29 = vadd.f32 1.0, %v5929_v25 }
0x5234   :  { %v4952_v20 = vsel %vm4936_vm4, %v4918_v54, %v4944_v39 }
0x5235   :  { %4960 = vst [vmem:[%s7038_s21 + $0x28] sm:$0xff] %v4952_v20  ;;  %v4951_v14 = vsel %vm4935_vm7, %v4913_v17, %v4943_v6  ;;  %5930 = vrcp.f32 %v4657_v29 }
0x5236   :  { %4959 = vst [vmem:[%s7038_s21 + $0x20] sm:$0xff] %v4951_v14 }
0x523f   :  { %v5931_v43 = vpop.eup %5930 }
0x5240   :  { %v4661_v56 = vmul.f32 %v5931_v43, %v6943_v12 }
0x52a3   :  { %v4664_v11 = vpop.permute.xlu1 %4663 }
0x52a4   :  { %v4666_v48 = vmul.f32 %v5931_v43, %v4664_v11 }
0x52a6   :  { %4668 = vrot.lane.b32.xlu0 %v4666_v48, %s5949_s23 }
0x5318   :  { %v4669_v30 = vpop.permute.xlu0 %4668 }
0x5319   :  { %v4671_v53 = vadd.f32 %v4669_v30, %v4661_v56 }
0x531b   :  { %5932 = vtanh.f32 %v4671_v53 }
0x5325   :  { %v5933_v35 = vpop.eup %5932 }
0x5326   :  { %4674 = vrot.lane.b32.xlu1 %v5933_v35, %s5949_s23 }
0x5398   :  { %v4675_v9 = vpop.permute.xlu1 %4674 }
0x5399   :  { %v4677_v27 = vmul.f32 %v5931_v43, %v4675_v9 }
0x539b   :  { %4679 = vrot.lane.b32.xlu0 %v4677_v27, %s5942_s22 }
0x540d   :  { %v4680_v57 = vpop.permute.xlu0 %4679 }
0x540e   :  { %4682 = vst.msk [vmem:[#allocation3 + $0x30] sm:$0xff] %vm604_vm5, %v4680_v57  ;;  %5548 = vmatmul.mubr.msk.f32.vlgmr.msra.gmra.mrb[60].mxu0 %vm604_vm5, %v4680_v57 }
0x5415   :  { %v4791_v42 = vld [vmem:[#allocation3 + $0x30] sm:$0xff] }
0x5416   :  { %5563 = vmatprep.mubr.msk.f32.mxu1 %vm604_vm5, %v4791_v42 }
0x54e1   :  { %v4751_v36 = vpop.f32.mrb[60].mxu0 }
0x54e2   :  { %v4755_v24 = vadd.f32 %v4751_v36, %v3966_v23  ;;  %v5549_v58 = vpop.f32.mrb[61].mxu0 }
0x54e4   :  { %5934 = vtanh.f32 %v4755_v24  ;;  %v5085_v21 = vmul.f32 -1.442695, %v4755_v24 }
0x54e6   :  { %5936 = vpow2.f32 %v5085_v21 }
0x54ee   :  { %v5935_v12 = vpop.eup %5934 }
0x54ef   :  { %4765 = vrot.lane.b32.xlu1 %v5935_v12, %s5954_s4 }
0x54f0   :  { %v5937_v37 = vpop.eup %5936 }
0x54f1   :  { %v4759_v45 = vadd.f32 1.0, %v5937_v37 }
0x54f3   :  { %5938 = vrcp.f32 %v4759_v45 }
0x54fd   :  { %v5939_v38 = vpop.eup %5938 }
0x54fe   :  { %v4763_v34 = vmul.f32 %v5939_v38, %v4671_v53 }
0x5561   :  { %v4766_v40 = vpop.permute.xlu1 %4765 }
0x5562   :  { %v4768_v41 = vmul.f32 %v5939_v38, %v4766_v40 }
0x5564   :  { %4770 = vrot.lane.b32.xlu0 %v4768_v41, %s5949_s23 }
0x55d6   :  { %v4771_v59 = vpop.permute.xlu0 %4770 }
0x55d7   :  { %v4773_v31 = vadd.f32 %v4771_v59, %v4763_v34 }
0x55d9   :  { %5940 = vtanh.f32 %v4773_v31 }
0x55e3   :  { %v5941_v5 = vpop.eup %5940 }
0x55e4   :  { %4776 = vrot.lane.b32.xlu1 %v5941_v5, %s5949_s23 }
0x5656   :  { %v4777_v44 = vpop.permute.xlu1 %4776 }
0x5657   :  { %v4779_v46 = vmul.f32 %v5939_v38, %v4777_v44 }
0x5659   :  { %4781 = vrot.lane.b32.xlu0 %v4779_v46, %s5942_s22 }
0x56cb   :  { %v4782_v10 = vpop.permute.xlu0 %4781 }
0x56cc   :  { %4784 = vst.msk [vmem:[#allocation3 + $0x38] sm:$0xff] %vm604_vm5, %v4782_v10 }
0x56d3   :  { %v4792_v55 = vld [vmem:[#allocation3 + $0x38] sm:$0xff] }
0x56d4   :  { %5564 = vmatmul.mubr.msk.f32.gmra.mrb[64].mxu1 %vm604_vm5, %v4792_v55 }
0x57a7   :  { %v5565_v22 = vpop.f32.mrb[64].mxu1 }
0x57a8   :  { %v4928_v61 = vadd.f32 %v5565_v22, %v6967_v28  ;;  %v4922_v26 = vpop.f32.mrb[65].mxu1 }
0x57a9   :  { %v4923_v50 = vadd.f32 %v6967_v28, %v4922_v26 }
0x57aa   :  { %vm4938_vm8 = vcmp.gt.f32.partialorder %v4928_v61, 0.0  ;;  %v4946_v62 = vmul.f32 0.9, %v4928_v61 }
0x57ab   :  { %vm4937_vm10 = vcmp.gt.f32.partialorder %v4923_v50, 0.0  ;;  %v4945_v60 = vmul.f32 0.9, %v4923_v50 }
0x57ac   :  { %v4954_v33 = vsel %vm4938_vm8, %v4928_v61, %v4946_v62 }
0x57ad   :  { %4962 = vst [vmem:[%s7038_s21 + $0x38] sm:$0xff] %v4954_v33  ;;  %v4953_v63 = vsel %vm4937_vm10, %v4923_v50, %v4945_v60 }
0x57ae   :  { %4961 = vst [vmem:[%s7038_s21 + $0x30] sm:$0xff] %v4953_v63 }

</bundles_post_ra>
